<compile_context>
chip_gen: v5e
topology: v5e:2x2
jax: 0.10.0
libtpu: 0.0.40
codegen_flags: <defaults>
</compile_context>

<pallas_src>
import jax
import jax.numpy as jnp
from jax.experimental import pallas as pl
from jax.experimental.pallas import tpu as pltpu


def _round_up(x, m):
    return ((x + m - 1) // m) * m


def _full_spec(shape):
    return pl.BlockSpec(shape, lambda i, _n=len(shape): (0,) * _n)


# ----------------------------- GRU recurrence kernel -----------------------------
def gru_kernel(emb_ref, valid_ref, wih_ref, bih_ref, whh_ref, bhh_ref,
               out_ref, ht_ref, gi_ref):
    T, Bp, Ep = emb_ref.shape
    Hp = ht_ref.shape[-1]

    # Hoisted input projection: one big MXU matmul over all timesteps (M = T*Bp).
    emb2 = emb_ref[...].reshape(T * Bp, Ep)
    gi = jnp.dot(emb2, wih_ref[...], preferred_element_type=jnp.float32) + bih_ref[...]
    gi_ref[...] = gi.reshape(T, Bp, 3 * Hp)

    bhh = bhh_ref[...]                               # (1, 3Hp), hoisted out of the loop
    h0 = jnp.zeros((Bp, Hp), jnp.float32)            # init_hidden: zeros

    def step(t, h):
        gi_t = gi_ref[t]                             # (Bp, 3Hp), lane-aligned gate blocks
        gh = jnp.dot(h, whh_ref[...], preferred_element_type=jnp.float32) + bhh
        # PyTorch GRU gate order: r, z, n (each gate is a whole 128-lane block)
        r = jax.nn.sigmoid(gi_t[:, :Hp] + gh[:, :Hp])
        z = jax.nn.sigmoid(gi_t[:, Hp:2 * Hp] + gh[:, Hp:2 * Hp])
        n = jnp.tanh(gi_t[:, 2 * Hp:] + r * gh[:, 2 * Hp:])
        h_new = n + z * (h - n)                      # == (1 - z) * n + z * h
        v = valid_ref[t]                             # (Bp, Hp), 1.0 while t < lens[b]
        out_ref[t] = v * h_new                       # pad_packed_sequence zero-pads
        return h + v * (h_new - h)                   # packed-seq: freeze past lens[b]

    h_last = jax.lax.fori_loop(0, T, step, h0, unroll=True)
    ht_ref[...] = h_last                             # hidden[-1], written once


def gru_forward(emb_tbe, valid_tbh, wih, bih, whh, bhh):
    T, Bp, Ep = emb_tbe.shape
    Hp = whh.shape[0]
    return pl.pallas_call(
        gru_kernel,
        grid=(1,),
        in_specs=[
            _full_spec((T, Bp, Ep)),
            _full_spec((T, Bp, Hp)),
            _full_spec((Ep, 3 * Hp)),
            _full_spec((1, 3 * Hp)),
            _full_spec((Hp, 3 * Hp)),
            _full_spec((1, 3 * Hp)),
        ],
        out_specs=[_full_spec((T, Bp, Hp)), _full_spec((Bp, Hp))],
        out_shape=(jax.ShapeDtypeStruct((T, Bp, Hp), jnp.float32),
                   jax.ShapeDtypeStruct((Bp, Hp), jnp.float32)),
        scratch_shapes=[pltpu.VMEM((T, Bp, 3 * Hp), jnp.float32)],
        compiler_params=pltpu.CompilerParams(dimension_semantics=("arbitrary",)),
    )(emb_tbe, valid_tbh, wih, bih, whh, bhh)


# ------------------------- NARM attention / readout kernel ------------------------
def narm_attn_kernel(go_ref, ht_ref, mask_ref, a1_ref, a2_ref, vt_ref,
                     b1_ref, b2_ref, pred_ref):
    T, Bp, Hp = go_ref.shape
    go = go_ref[...]                                  # (T, Bp, Hp) -- no transpose needed
    ht = ht_ref[...]                                  # (Bp, Hp) == c_global
    go2 = go.reshape(T * Bp, Hp)

    q1 = jnp.dot(go2, a1_ref[...],
                 preferred_element_type=jnp.float32).reshape(T, Bp, Hp)
    q2 = jnp.dot(ht, a2_ref[...], preferred_element_type=jnp.float32)    # (Bp, Hp)

    s = jax.nn.sigmoid(q1 + mask_ref[...] * q2[None, :, :])              # (T, Bp, Hp)

    # v_t linear (H -> 1): VPU multiply + lane reduction instead of an N=1 MXU matmul.
    alp = jnp.sum(s * vt_ref[...], axis=-1, keepdims=True)               # (T, Bp, 1)
    c_local = jnp.sum(alp * go, axis=0)                                  # (Bp, Hp)

    # predictions = cat([c_local, c_global], 1) @ b.weight.T  (two matmuls)
    pred_ref[...] = (jnp.dot(c_local, b1_ref[...], preferred_element_type=jnp.float32)
                     + jnp.dot(ht, b2_ref[...], preferred_element_type=jnp.float32))


def narm_attention(gru_out_tbh, ht, mask_tbh, a1, a2, vt_row, b1, b2):
    T, Bp, Hp = gru_out_tbh.shape
    return pl.pallas_call(
        narm_attn_kernel,
        grid=(1,),
        in_specs=[_full_spec((T, Bp, Hp)), _full_spec((Bp, Hp)), _full_spec((T, Bp, Hp)),
                  _full_spec((Hp, Hp)), _full_spec((Hp, Hp)), _full_spec((1, Hp)),
                  _full_spec((Hp, Hp)), _full_spec((Hp, Hp))],
        out_specs=_full_spec((Bp, Hp)),
        out_shape=jax.ShapeDtypeStruct((Bp, Hp), jnp.float32),
        compiler_params=pltpu.CompilerParams(dimension_semantics=("arbitrary",)),
    )(gru_out_tbh, ht, mask_tbh, a1, a2, vt_row, b1, b2)


# ------------------------------------ wrapper -------------------------------------
def _pad_gates(w, H, Hp):
    """(rows, 3H) -> (rows, 3Hp) with each gate block zero-padded to lane-aligned Hp."""
    parts = [jnp.pad(w[:, g * H:(g + 1) * H], ((0, 0), (0, Hp - H))) for g in range(3)]
    return jnp.concatenate(parts, axis=1)


def narm_forward(seqs, lens, params):
    """Returns (gru_out (B, T, H), predictions (B, H)) like NARM.forward."""
    B, T = seqs.shape
    E = params["wih_t"].shape[0]
    H = params["whh_t"].shape[0]
    Bp = max(8, _round_up(B, 8))
    Ep = _round_up(E, 128)
    Hp = _round_up(H, 128)

    # ---- pad params to (8,128)-aligned layouts (zero-pad => identical numerics) ----
    wih_p = jnp.pad(_pad_gates(params["wih_t"], H, Hp), ((0, Ep - E), (0, 0)))
    whh_p = jnp.pad(_pad_gates(params["whh_t"], H, Hp), ((0, Hp - H), (0, 0)))
    bih_p = _pad_gates(params["bih"], H, Hp)
    bhh_p = _pad_gates(params["bhh"], H, Hp)
    a1_p = jnp.pad(params["a1_t"], ((0, Hp - H), (0, Hp - H)))
    a2_p = jnp.pad(params["a2_t"], ((0, Hp - H), (0, Hp - H)))
    vt_p = jnp.pad(params["vt_row"], ((0, 0), (0, Hp - H)))
    b1_p = jnp.pad(params["b1_t"], ((0, Hp - H), (0, Hp - H)))
    b2_p = jnp.pad(params["b2_t"], ((0, Hp - H), (0, Hp - H)))
    emb_p = jnp.pad(params["emb"], ((0, 0), (0, Ep - E))).astype(jnp.float32)

    # ---- glue: gather embeddings directly in (T, Bp, Ep) layout (no extra transpose) ----
    seqs_tb = jnp.pad(seqs.T, ((0, 0), (0, Bp - B)))                       # (T, Bp)
    lens_p = jnp.pad(lens, (0, Bp - B))                                    # (Bp,)
    emb_tbe = emb_p[seqs_tb]                                               # (T, Bp, Ep)

    t_idx = jnp.arange(T, dtype=jnp.int32)
    valid = (t_idx[:, None] < lens_p[None, :]).astype(jnp.float32)         # (T, Bp)
    valid_tbh = jnp.broadcast_to(valid[:, :, None], (T, Bp, Hp))           # lane-dense
    mask = (seqs_tb > 0).astype(jnp.float32)                               # (T, Bp)
    mask_tbh = jnp.broadcast_to(mask[:, :, None], (T, Bp, Hp))

    gru_out_p, ht_p = gru_forward(emb_tbe, valid_tbh, wih_p, bih_p, whh_p, bhh_p)
    pred_p = narm_attention(gru_out_p, ht_p, mask_tbh, a1_p, a2_p, vt_p, b1_p, b2_p)

    # module output is batch_first and unpadded: slice then transpose once (glue)
    gru_out = jnp.transpose(gru_out_p[:, :B, :H], (1, 0, 2))               # (B, T, H)
    pred = pred_p[:B, :H]                                                  # (B, H)
    return gru_out, pred


# -------------------------------- pure-JAX reference ------------------------------
def narm_reference(seqs, lens, params):
    HI = jax.lax.Precision.HIGHEST
    B, T = seqs.shape
    H = params["whh_t"].shape[0]
    emb = params["emb"][seqs].astype(jnp.float32)                # (B, T, E)
    h = jnp.zeros((B, H), jnp.float32)
    outs = []
    for t in range(T):
        x = emb[:, t]
        gi = jnp.dot(x, params["wih_t"], precision=HI) + params["bih"]
        gh = jnp.dot(h, params["whh_t"], precision=HI) + params["bhh"]
        r = jax.nn.sigmoid(gi[:, :H] + gh[:, :H])
        z = jax.nn.sigmoid(gi[:, H:2 * H] + gh[:, H:2 * H])
        n = jnp.tanh(gi[:, 2 * H:] + r * gh[:, 2 * H:])
        h_new = (1.0 - z) * n + z * h
        v = (t < lens).astype(jnp.float32)[:, None]
        h = v * h_new + (1.0 - v) * h
        outs.append(v * h)
    gru_out = jnp.stack(outs, axis=1)                            # (B, T, H)
    ht = h
    q1 = jnp.einsum("bth,hk->btk", gru_out, params["a1_t"], precision=HI)
    q2 = jnp.dot(ht, params["a2_t"], precision=HI)
    mask = (seqs > 0).astype(jnp.float32)
    s = jax.nn.sigmoid(q1 + mask[:, :, None] * q2[:, None, :])
    alp = jnp.sum(s * params["vt_row"], axis=-1, keepdims=True)  # (B, T, 1)
    c_local = jnp.sum(alp * gru_out, axis=1)
    pred = (jnp.dot(c_local, params["b1_t"], precision=HI)
            + jnp.dot(ht, params["b2_t"], precision=HI))
    return gru_out, pred


# --------------------------------- param creation ----------------------------------
def make_params(key, n_items, E, H):
    ks = jax.random.split(key, 9)

    def xavier(k, shape):
        std = (2.0 / (shape[0] + shape[1])) ** 0.5
        return std * jax.random.normal(k, shape, jnp.float32)

    # nn.Embedding(n_items, E) -> xavier_normal_ in _init_weights
    emb = xavier(ks[0], (n_items, E))
    # nn.GRU default init: U(-1/sqrt(H), 1/sqrt(H)); gate order [r, z, n]
    kgru = 1.0 / (H ** 0.5)
    wih = jax.random.uniform(ks[1], (3 * H, E), jnp.float32, -kgru, kgru)
    whh = jax.random.uniform(ks[2], (3 * H, H), jnp.float32, -kgru, kgru)
    bih = jax.random.uniform(ks[3], (3 * H,), jnp.float32, -kgru, kgru)
    bhh = jax.random.uniform(ks[4], (3 * H,), jnp.float32, -kgru, kgru)
    # Linears (bias=False), xavier_normal_; store as x @ W.T friendly transposes
    a1 = xavier(ks[5], (H, H))
    a2 = xavier(ks[6], (H, H))
    vt = xavier(ks[7], (1, H))
    bw = xavier(ks[8], (H, 2 * H))
    return dict(
        emb=emb,
        wih_t=wih.T, whh_t=whh.T,
        bih=bih.reshape(1, 3 * H), bhh=bhh.reshape(1, 3 * H),
        a1_t=a1.T, a2_t=a2.T, vt_row=vt,
        b1_t=bw[:, :H].T, b2_t=bw[:, H:].T,
    )


if __name__ == "__main__":
    # small shapes consistent with the module: batch=4, maxlen=8, emb=hidden=32
    B, T, E, H, n_items = 4, 8, 32, 32, 50
    key = jax.random.PRNGKey(0)
    kp, ks = jax.random.split(key)
    params = make_params(kp, n_items, E, H)

    # lengths sorted descending (pack_padded_sequence enforce_sorted=True); pad with 0
    lens = jnp.array([8, 6, 4, 2], dtype=jnp.int32)
    items = jax.random.randint(ks, (B, T), 1, n_items, dtype=jnp.int32)
    seqs = jnp.where(jnp.arange(T)[None, :] < lens[:, None], items, 0)

    narm_forward_jit = jax.jit(narm_forward)
    gru_out, pred = narm_forward_jit(seqs, lens, params)
    jax.block_until_ready((gru_out, pred))

    gru_ref, pred_ref = narm_reference(seqs, lens, params)
    assert gru_out.shape == (B, T, H) and pred.shape == (B, H)
    assert jnp.allclose(gru_out, gru_ref, rtol=1e-3, atol=1e-3)
    assert jnp.allclose(pred, pred_ref, rtol=1e-3, atol=1e-3)
    print("KERNEL_OK")
</pallas_src>

<mosaic_0001>
module attributes {stable_mosaic.version = 11 : i64} {
  func.func @gru_kernel(%arg0: i32, %arg1: memref<8x8x128xf32, #tpu.memory_space<vmem>>, %arg2: memref<8x8x128xf32, #tpu.memory_space<vmem>>, %arg3: memref<128x384xf32, #tpu.memory_space<vmem>>, %arg4: memref<1x384xf32, #tpu.memory_space<vmem>>, %arg5: memref<128x384xf32, #tpu.memory_space<vmem>>, %arg6: memref<1x384xf32, #tpu.memory_space<vmem>>, %arg7: memref<8x8x128xf32, #tpu.memory_space<vmem>>, %arg8: memref<8x128xf32, #tpu.memory_space<vmem>>, %arg9: memref<8x8x384xf32, #tpu.memory_space<vmem>>) attributes {dimension_semantics = [#tpu.dimension_semantics<arbitrary>], iteration_bounds = array<i64: 1>, scalar_prefetch = 0 : i64, scratch_operands = 1 : i64, tpu.core_type = #tpu.core_type<tc>, window_params = [{pipeline_mode = #tpu.pipeline_mode<synchronous>, transform_indices = @transform_0, window_bounds = array<i64: 8, 8, 128>}, {pipeline_mode = #tpu.pipeline_mode<synchronous>, transform_indices = @transform_1, window_bounds = array<i64: 8, 8, 128>}, {pipeline_mode = #tpu.pipeline_mode<synchronous>, transform_indices = @transform_2, window_bounds = array<i64: 128, 384>}, {pipeline_mode = #tpu.pipeline_mode<synchronous>, transform_indices = @transform_3, window_bounds = array<i64: 1, 384>}, {pipeline_mode = #tpu.pipeline_mode<synchronous>, transform_indices = @transform_4, window_bounds = array<i64: 128, 384>}, {pipeline_mode = #tpu.pipeline_mode<synchronous>, transform_indices = @transform_5, window_bounds = array<i64: 1, 384>}, {pipeline_mode = #tpu.pipeline_mode<synchronous>, transform_indices = @transform_6, window_bounds = array<i64: 8, 8, 128>}, {pipeline_mode = #tpu.pipeline_mode<synchronous>, transform_indices = @transform_7, window_bounds = array<i64: 8, 128>}]} {
    %c0 = arith.constant 0 : index
    %c0_0 = arith.constant 0 : index
    %c0_1 = arith.constant 0 : index
    %0 = vector.load %arg1[%c0, %c0_0, %c0_1] : memref<8x8x128xf32, #tpu.memory_space<vmem>>, vector<8x8x128xf32>
    %1 = vector.shape_cast %0 : vector<8x8x128xf32> to vector<64x128xf32>
    %c0_2 = arith.constant 0 : index
    %c0_3 = arith.constant 0 : index
    %2 = vector.load %arg3[%c0_2, %c0_3] : memref<128x384xf32, #tpu.memory_space<vmem>>, vector<128x384xf32>
    %cst = arith.constant dense<0.000000e+00> : vector<64x384xf32>
    %3 = tpu.matmul %1, %2, %cst {dimension_numbers = #tpu.dot_dimension_numbers<[1], [0], [0], [1], [0, 0, 1, 1], [], []>} : vector<64x128xf32>, vector<128x384xf32>, vector<64x384xf32> -> vector<64x384xf32>
    %c0_4 = arith.constant 0 : index
    %c0_5 = arith.constant 0 : index
    %4 = vector.load %arg4[%c0_4, %c0_5] : memref<1x384xf32, #tpu.memory_space<vmem>>, vector<1x384xf32>
    %5 = vector.broadcast %4 : vector<1x384xf32> to vector<64x384xf32>
    %6 = arith.addf %3, %5 : vector<64x384xf32>
    %7 = vector.shape_cast %6 : vector<64x384xf32> to vector<8x8x384xf32>
    %c0_6 = arith.constant 0 : index
    %c0_7 = arith.constant 0 : index
    %c0_8 = arith.constant 0 : index
    %8 = vector.load %arg9[%c0_6, %c0_7, %c0_8] : memref<8x8x384xf32, #tpu.memory_space<vmem>>, vector<8x8x384xf32>
    tpu.vector_store %arg9[%c0_6, %c0_7, %c0_8], %7 {strides = array<i32>} : memref<8x8x384xf32, #tpu.memory_space<vmem>>, vector<8x8x384xf32>,
    %c0_9 = arith.constant 0 : index
    %c0_10 = arith.constant 0 : index
    %9 = vector.load %arg6[%c0_9, %c0_10] : memref<1x384xf32, #tpu.memory_space<vmem>>, vector<1x384xf32>
    %cst_11 = arith.constant 0.000000e+00 : f32
    %10 = vector.broadcast %cst_11 : f32 to vector<8x128xf32>
    %c0_i32 = arith.constant 0 : i32
    %11 = arith.index_cast %c0_i32 : i32 to index
    %c0_12 = arith.constant 0 : index
    %c0_13 = arith.constant 0 : index
    %12 = vector.load %arg9[%11, %c0_12, %c0_13] : memref<8x8x384xf32, #tpu.memory_space<vmem>>, vector<1x8x384xf32>
    %13 = vector.shape_cast %12 : vector<1x8x384xf32> to vector<8x384xf32>
    %c0_14 = arith.constant 0 : index
    %c0_15 = arith.constant 0 : index
    %14 = vector.load %arg5[%c0_14, %c0_15] : memref<128x384xf32, #tpu.memory_space<vmem>>, vector<128x384xf32>
    %cst_16 = arith.constant dense<0.000000e+00> : vector<8x384xf32>
    %15 = tpu.matmul %10, %14, %cst_16 {dimension_numbers = #tpu.dot_dimension_numbers<[1], [0], [0], [1], [0, 0, 1, 1], [], []>} : vector<8x128xf32>, vector<128x384xf32>, vector<8x384xf32> -> vector<8x384xf32>
    %16 = vector.broadcast %9 : vector<1x384xf32> to vector<8x384xf32>
    %17 = arith.addf %15, %16 : vector<8x384xf32>
    %18 = vector.extract_strided_slice %13 {offsets = [0, 0], sizes = [8, 128], strides = [1, 1]} : vector<8x384xf32> to vector<8x128xf32>
    %19 = vector.extract_strided_slice %17 {offsets = [0, 0], sizes = [8, 128], strides = [1, 1]} : vector<8x384xf32> to vector<8x128xf32>
    %20 = arith.addf %18, %19 : vector<8x128xf32>
    %21 = arith.negf %20 : vector<8x128xf32>
    %22 = math.exp %21 : vector<8x128xf32>
    %cst_17 = arith.constant 1.000000e+00 : f32
    %23 = vector.broadcast %cst_17 : f32 to vector<8x128xf32>
    %24 = arith.addf %23, %22 : vector<8x128xf32>
    %25 = arith.divf %23, %24 : vector<8x128xf32>
    %26 = vector.extract_strided_slice %13 {offsets = [0, 128], sizes = [8, 128], strides = [1, 1]} : vector<8x384xf32> to vector<8x128xf32>
    %27 = vector.extract_strided_slice %17 {offsets = [0, 128], sizes = [8, 128], strides = [1, 1]} : vector<8x384xf32> to vector<8x128xf32>
    %28 = arith.addf %26, %27 : vector<8x128xf32>
    %29 = arith.negf %28 : vector<8x128xf32>
    %30 = math.exp %29 : vector<8x128xf32>
    %cst_18 = arith.constant 1.000000e+00 : f32
    %31 = vector.broadcast %cst_18 : f32 to vector<8x128xf32>
    %32 = arith.addf %31, %30 : vector<8x128xf32>
    %33 = arith.divf %31, %32 : vector<8x128xf32>
    %34 = vector.extract_strided_slice %13 {offsets = [0, 256], sizes = [8, 128], strides = [1, 1]} : vector<8x384xf32> to vector<8x128xf32>
    %35 = vector.extract_strided_slice %17 {offsets = [0, 256], sizes = [8, 128], strides = [1, 1]} : vector<8x384xf32> to vector<8x128xf32>
    %36 = arith.mulf %25, %35 : vector<8x128xf32>
    %37 = arith.addf %34, %36 : vector<8x128xf32>
    %38 = math.tanh %37 : vector<8x128xf32>
    %39 = arith.subf %10, %38 : vector<8x128xf32>
    %40 = arith.mulf %33, %39 : vector<8x128xf32>
    %41 = arith.addf %38, %40 : vector<8x128xf32>
    %42 = arith.index_cast %c0_i32 : i32 to index
    %c0_19 = arith.constant 0 : index
    %c0_20 = arith.constant 0 : index
    %43 = vector.load %arg2[%42, %c0_19, %c0_20] : memref<8x8x128xf32, #tpu.memory_space<vmem>>, vector<1x8x128xf32>
    %44 = vector.shape_cast %43 : vector<1x8x128xf32> to vector<8x128xf32>
    %45 = arith.mulf %44, %41 : vector<8x128xf32>
    %46 = arith.index_cast %c0_i32 : i32 to index
    %c0_21 = arith.constant 0 : index
    %c0_22 = arith.constant 0 : index
    %47 = vector.load %arg7[%46, %c0_21, %c0_22] : memref<8x8x128xf32, #tpu.memory_space<vmem>>, vector<1x8x128xf32>
    %48 = vector.shape_cast %47 : vector<1x8x128xf32> to vector<8x128xf32>
    %49 = vector.shape_cast %45 : vector<8x128xf32> to vector<1x8x128xf32>
    tpu.vector_store %arg7[%46, %c0_21, %c0_22], %49 {strides = array<i32>} : memref<8x8x128xf32, #tpu.memory_space<vmem>>, vector<1x8x128xf32>,
    %50 = arith.subf %41, %10 : vector<8x128xf32>
    %51 = arith.mulf %44, %50 : vector<8x128xf32>
    %52 = arith.addf %10, %51 : vector<8x128xf32>
    %c1_i32 = arith.constant 1 : i32
    %53 = arith.index_cast %c1_i32 : i32 to index
    %c0_23 = arith.constant 0 : index
    %c0_24 = arith.constant 0 : index
    %54 = vector.load %arg9[%53, %c0_23, %c0_24] : memref<8x8x384xf32, #tpu.memory_space<vmem>>, vector<1x8x384xf32>
    %55 = vector.shape_cast %54 : vector<1x8x384xf32> to vector<8x384xf32>
    %c0_25 = arith.constant 0 : index
    %c0_26 = arith.constant 0 : index
    %56 = vector.load %arg5[%c0_25, %c0_26] : memref<128x384xf32, #tpu.memory_space<vmem>>, vector<128x384xf32>
    %cst_27 = arith.constant dense<0.000000e+00> : vector<8x384xf32>
    %57 = tpu.matmul %52, %56, %cst_27 {dimension_numbers = #tpu.dot_dimension_numbers<[1], [0], [0], [1], [0, 0, 1, 1], [], []>} : vector<8x128xf32>, vector<128x384xf32>, vector<8x384xf32> -> vector<8x384xf32>
    %58 = vector.broadcast %9 : vector<1x384xf32> to vector<8x384xf32>
    %59 = arith.addf %57, %58 : vector<8x384xf32>
    %60 = vector.extract_strided_slice %55 {offsets = [0, 0], sizes = [8, 128], strides = [1, 1]} : vector<8x384xf32> to vector<8x128xf32>
    %61 = vector.extract_strided_slice %59 {offsets = [0, 0], sizes = [8, 128], strides = [1, 1]} : vector<8x384xf32> to vector<8x128xf32>
    %62 = arith.addf %60, %61 : vector<8x128xf32>
    %63 = arith.negf %62 : vector<8x128xf32>
    %64 = math.exp %63 : vector<8x128xf32>
    %cst_28 = arith.constant 1.000000e+00 : f32
    %65 = vector.broadcast %cst_28 : f32 to vector<8x128xf32>
    %66 = arith.addf %65, %64 : vector<8x128xf32>
    %67 = arith.divf %65, %66 : vector<8x128xf32>
    %68 = vector.extract_strided_slice %55 {offsets = [0, 128], sizes = [8, 128], strides = [1, 1]} : vector<8x384xf32> to vector<8x128xf32>
    %69 = vector.extract_strided_slice %59 {offsets = [0, 128], sizes = [8, 128], strides = [1, 1]} : vector<8x384xf32> to vector<8x128xf32>
    %70 = arith.addf %68, %69 : vector<8x128xf32>
    %71 = arith.negf %70 : vector<8x128xf32>
    %72 = math.exp %71 : vector<8x128xf32>
    %cst_29 = arith.constant 1.000000e+00 : f32
    %73 = vector.broadcast %cst_29 : f32 to vector<8x128xf32>
    %74 = arith.addf %73, %72 : vector<8x128xf32>
    %75 = arith.divf %73, %74 : vector<8x128xf32>
    %76 = vector.extract_strided_slice %55 {offsets = [0, 256], sizes = [8, 128], strides = [1, 1]} : vector<8x384xf32> to vector<8x128xf32>
    %77 = vector.extract_strided_slice %59 {offsets = [0, 256], sizes = [8, 128], strides = [1, 1]} : vector<8x384xf32> to vector<8x128xf32>
    %78 = arith.mulf %67, %77 : vector<8x128xf32>
    %79 = arith.addf %76, %78 : vector<8x128xf32>
    %80 = math.tanh %79 : vector<8x128xf32>
    %81 = arith.subf %52, %80 : vector<8x128xf32>
    %82 = arith.mulf %75, %81 : vector<8x128xf32>
    %83 = arith.addf %80, %82 : vector<8x128xf32>
    %84 = arith.index_cast %c1_i32 : i32 to index
    %c0_30 = arith.constant 0 : index
    %c0_31 = arith.constant 0 : index
    %85 = vector.load %arg2[%84, %c0_30, %c0_31] : memref<8x8x128xf32, #tpu.memory_space<vmem>>, vector<1x8x128xf32>
    %86 = vector.shape_cast %85 : vector<1x8x128xf32> to vector<8x128xf32>
    %87 = arith.mulf %86, %83 : vector<8x128xf32>
    %88 = arith.index_cast %c1_i32 : i32 to index
    %c0_32 = arith.constant 0 : index
    %c0_33 = arith.constant 0 : index
    %89 = vector.load %arg7[%88, %c0_32, %c0_33] : memref<8x8x128xf32, #tpu.memory_space<vmem>>, vector<1x8x128xf32>
    %90 = vector.shape_cast %89 : vector<1x8x128xf32> to vector<8x128xf32>
    %91 = vector.shape_cast %87 : vector<8x128xf32> to vector<1x8x128xf32>
    tpu.vector_store %arg7[%88, %c0_32, %c0_33], %91 {strides = array<i32>} : memref<8x8x128xf32, #tpu.memory_space<vmem>>, vector<1x8x128xf32>,
    %92 = arith.subf %83, %52 : vector<8x128xf32>
    %93 = arith.mulf %86, %92 : vector<8x128xf32>
    %94 = arith.addf %52, %93 : vector<8x128xf32>
    %c2_i32 = arith.constant 2 : i32
    %95 = arith.index_cast %c2_i32 : i32 to index
    %c0_34 = arith.constant 0 : index
    %c0_35 = arith.constant 0 : index
    %96 = vector.load %arg9[%95, %c0_34, %c0_35] : memref<8x8x384xf32, #tpu.memory_space<vmem>>, vector<1x8x384xf32>
    %97 = vector.shape_cast %96 : vector<1x8x384xf32> to vector<8x384xf32>
    %c0_36 = arith.constant 0 : index
    %c0_37 = arith.constant 0 : index
    %98 = vector.load %arg5[%c0_36, %c0_37] : memref<128x384xf32, #tpu.memory_space<vmem>>, vector<128x384xf32>
    %cst_38 = arith.constant dense<0.000000e+00> : vector<8x384xf32>
    %99 = tpu.matmul %94, %98, %cst_38 {dimension_numbers = #tpu.dot_dimension_numbers<[1], [0], [0], [1], [0, 0, 1, 1], [], []>} : vector<8x128xf32>, vector<128x384xf32>, vector<8x384xf32> -> vector<8x384xf32>
    %100 = vector.broadcast %9 : vector<1x384xf32> to vector<8x384xf32>
    %101 = arith.addf %99, %100 : vector<8x384xf32>
    %102 = vector.extract_strided_slice %97 {offsets = [0, 0], sizes = [8, 128], strides = [1, 1]} : vector<8x384xf32> to vector<8x128xf32>
    %103 = vector.extract_strided_slice %101 {offsets = [0, 0], sizes = [8, 128], strides = [1, 1]} : vector<8x384xf32> to vector<8x128xf32>
    %104 = arith.addf %102, %103 : vector<8x128xf32>
    %105 = arith.negf %104 : vector<8x128xf32>
    %106 = math.exp %105 : vector<8x128xf32>
    %cst_39 = arith.constant 1.000000e+00 : f32
    %107 = vector.broadcast %cst_39 : f32 to vector<8x128xf32>
    %108 = arith.addf %107, %106 : vector<8x128xf32>
    %109 = arith.divf %107, %108 : vector<8x128xf32>
    %110 = vector.extract_strided_slice %97 {offsets = [0, 128], sizes = [8, 128], strides = [1, 1]} : vector<8x384xf32> to vector<8x128xf32>
    %111 = vector.extract_strided_slice %101 {offsets = [0, 128], sizes = [8, 128], strides = [1, 1]} : vector<8x384xf32> to vector<8x128xf32>
    %112 = arith.addf %110, %111 : vector<8x128xf32>
    %113 = arith.negf %112 : vector<8x128xf32>
    %114 = math.exp %113 : vector<8x128xf32>
    %cst_40 = arith.constant 1.000000e+00 : f32
    %115 = vector.broadcast %cst_40 : f32 to vector<8x128xf32>
    %116 = arith.addf %115, %114 : vector<8x128xf32>
    %117 = arith.divf %115, %116 : vector<8x128xf32>
    %118 = vector.extract_strided_slice %97 {offsets = [0, 256], sizes = [8, 128], strides = [1, 1]} : vector<8x384xf32> to vector<8x128xf32>
    %119 = vector.extract_strided_slice %101 {offsets = [0, 256], sizes = [8, 128], strides = [1, 1]} : vector<8x384xf32> to vector<8x128xf32>
    %120 = arith.mulf %109, %119 : vector<8x128xf32>
    %121 = arith.addf %118, %120 : vector<8x128xf32>
    %122 = math.tanh %121 : vector<8x128xf32>
    %123 = arith.subf %94, %122 : vector<8x128xf32>
    %124 = arith.mulf %117, %123 : vector<8x128xf32>
    %125 = arith.addf %122, %124 : vector<8x128xf32>
    %126 = arith.index_cast %c2_i32 : i32 to index
    %c0_41 = arith.constant 0 : index
    %c0_42 = arith.constant 0 : index
    %127 = vector.load %arg2[%126, %c0_41, %c0_42] : memref<8x8x128xf32, #tpu.memory_space<vmem>>, vector<1x8x128xf32>
    %128 = vector.shape_cast %127 : vector<1x8x128xf32> to vector<8x128xf32>
    %129 = arith.mulf %128, %125 : vector<8x128xf32>
    %130 = arith.index_cast %c2_i32 : i32 to index
    %c0_43 = arith.constant 0 : index
    %c0_44 = arith.constant 0 : index
    %131 = vector.load %arg7[%130, %c0_43, %c0_44] : memref<8x8x128xf32, #tpu.memory_space<vmem>>, vector<1x8x128xf32>
    %132 = vector.shape_cast %131 : vector<1x8x128xf32> to vector<8x128xf32>
    %133 = vector.shape_cast %129 : vector<8x128xf32> to vector<1x8x128xf32>
    tpu.vector_store %arg7[%130, %c0_43, %c0_44], %133 {strides = array<i32>} : memref<8x8x128xf32, #tpu.memory_space<vmem>>, vector<1x8x128xf32>,
    %134 = arith.subf %125, %94 : vector<8x128xf32>
    %135 = arith.mulf %128, %134 : vector<8x128xf32>
    %136 = arith.addf %94, %135 : vector<8x128xf32>
    %c3_i32 = arith.constant 3 : i32
    %137 = arith.index_cast %c3_i32 : i32 to index
    %c0_45 = arith.constant 0 : index
    %c0_46 = arith.constant 0 : index
    %138 = vector.load %arg9[%137, %c0_45, %c0_46] : memref<8x8x384xf32, #tpu.memory_space<vmem>>, vector<1x8x384xf32>
    %139 = vector.shape_cast %138 : vector<1x8x384xf32> to vector<8x384xf32>
    %c0_47 = arith.constant 0 : index
    %c0_48 = arith.constant 0 : index
    %140 = vector.load %arg5[%c0_47, %c0_48] : memref<128x384xf32, #tpu.memory_space<vmem>>, vector<128x384xf32>
    %cst_49 = arith.constant dense<0.000000e+00> : vector<8x384xf32>
    %141 = tpu.matmul %136, %140, %cst_49 {dimension_numbers = #tpu.dot_dimension_numbers<[1], [0], [0], [1], [0, 0, 1, 1], [], []>} : vector<8x128xf32>, vector<128x384xf32>, vector<8x384xf32> -> vector<8x384xf32>
    %142 = vector.broadcast %9 : vector<1x384xf32> to vector<8x384xf32>
    %143 = arith.addf %141, %142 : vector<8x384xf32>
    %144 = vector.extract_strided_slice %139 {offsets = [0, 0], sizes = [8, 128], strides = [1, 1]} : vector<8x384xf32> to vector<8x128xf32>
    %145 = vector.extract_strided_slice %143 {offsets = [0, 0], sizes = [8, 128], strides = [1, 1]} : vector<8x384xf32> to vector<8x128xf32>
    %146 = arith.addf %144, %145 : vector<8x128xf32>
    %147 = arith.negf %146 : vector<8x128xf32>
    %148 = math.exp %147 : vector<8x128xf32>
    %cst_50 = arith.constant 1.000000e+00 : f32
    %149 = vector.broadcast %cst_50 : f32 to vector<8x128xf32>
    %150 = arith.addf %149, %148 : vector<8x128xf32>
    %151 = arith.divf %149, %150 : vector<8x128xf32>
    %152 = vector.extract_strided_slice %139 {offsets = [0, 128], sizes = [8, 128], strides = [1, 1]} : vector<8x384xf32> to vector<8x128xf32>
    %153 = vector.extract_strided_slice %143 {offsets = [0, 128], sizes = [8, 128], strides = [1, 1]} : vector<8x384xf32> to vector<8x128xf32>
    %154 = arith.addf %152, %153 : vector<8x128xf32>
    %155 = arith.negf %154 : vector<8x128xf32>
    %156 = math.exp %155 : vector<8x128xf32>
    %cst_51 = arith.constant 1.000000e+00 : f32
    %157 = vector.broadcast %cst_51 : f32 to vector<8x128xf32>
    %158 = arith.addf %157, %156 : vector<8x128xf32>
    %159 = arith.divf %157, %158 : vector<8x128xf32>
    %160 = vector.extract_strided_slice %139 {offsets = [0, 256], sizes = [8, 128], strides = [1, 1]} : vector<8x384xf32> to vector<8x128xf32>
    %161 = vector.extract_strided_slice %143 {offsets = [0, 256], sizes = [8, 128], strides = [1, 1]} : vector<8x384xf32> to vector<8x128xf32>
    %162 = arith.mulf %151, %161 : vector<8x128xf32>
    %163 = arith.addf %160, %162 : vector<8x128xf32>
    %164 = math.tanh %163 : vector<8x128xf32>
    %165 = arith.subf %136, %164 : vector<8x128xf32>
    %166 = arith.mulf %159, %165 : vector<8x128xf32>
    %167 = arith.addf %164, %166 : vector<8x128xf32>
    %168 = arith.index_cast %c3_i32 : i32 to index
    %c0_52 = arith.constant 0 : index
    %c0_53 = arith.constant 0 : index
    %169 = vector.load %arg2[%168, %c0_52, %c0_53] : memref<8x8x128xf32, #tpu.memory_space<vmem>>, vector<1x8x128xf32>
    %170 = vector.shape_cast %169 : vector<1x8x128xf32> to vector<8x128xf32>
    %171 = arith.mulf %170, %167 : vector<8x128xf32>
    %172 = arith.index_cast %c3_i32 : i32 to index
    %c0_54 = arith.constant 0 : index
    %c0_55 = arith.constant 0 : index
    %173 = vector.load %arg7[%172, %c0_54, %c0_55] : memref<8x8x128xf32, #tpu.memory_space<vmem>>, vector<1x8x128xf32>
    %174 = vector.shape_cast %173 : vector<1x8x128xf32> to vector<8x128xf32>
    %175 = vector.shape_cast %171 : vector<8x128xf32> to vector<1x8x128xf32>
    tpu.vector_store %arg7[%172, %c0_54, %c0_55], %175 {strides = array<i32>} : memref<8x8x128xf32, #tpu.memory_space<vmem>>, vector<1x8x128xf32>,
    %176 = arith.subf %167, %136 : vector<8x128xf32>
    %177 = arith.mulf %170, %176 : vector<8x128xf32>
    %178 = arith.addf %136, %177 : vector<8x128xf32>
    %c4_i32 = arith.constant 4 : i32
    %179 = arith.index_cast %c4_i32 : i32 to index
    %c0_56 = arith.constant 0 : index
    %c0_57 = arith.constant 0 : index
    %180 = vector.load %arg9[%179, %c0_56, %c0_57] : memref<8x8x384xf32, #tpu.memory_space<vmem>>, vector<1x8x384xf32>
    %181 = vector.shape_cast %180 : vector<1x8x384xf32> to vector<8x384xf32>
    %c0_58 = arith.constant 0 : index
    %c0_59 = arith.constant 0 : index
    %182 = vector.load %arg5[%c0_58, %c0_59] : memref<128x384xf32, #tpu.memory_space<vmem>>, vector<128x384xf32>
    %cst_60 = arith.constant dense<0.000000e+00> : vector<8x384xf32>
    %183 = tpu.matmul %178, %182, %cst_60 {dimension_numbers = #tpu.dot_dimension_numbers<[1], [0], [0], [1], [0, 0, 1, 1], [], []>} : vector<8x128xf32>, vector<128x384xf32>, vector<8x384xf32> -> vector<8x384xf32>
    %184 = vector.broadcast %9 : vector<1x384xf32> to vector<8x384xf32>
    %185 = arith.addf %183, %184 : vector<8x384xf32>
    %186 = vector.extract_strided_slice %181 {offsets = [0, 0], sizes = [8, 128], strides = [1, 1]} : vector<8x384xf32> to vector<8x128xf32>
    %187 = vector.extract_strided_slice %185 {offsets = [0, 0], sizes = [8, 128], strides = [1, 1]} : vector<8x384xf32> to vector<8x128xf32>
    %188 = arith.addf %186, %187 : vector<8x128xf32>
    %189 = arith.negf %188 : vector<8x128xf32>
    %190 = math.exp %189 : vector<8x128xf32>
    %cst_61 = arith.constant 1.000000e+00 : f32
    %191 = vector.broadcast %cst_61 : f32 to vector<8x128xf32>
    %192 = arith.addf %191, %190 : vector<8x128xf32>
    %193 = arith.divf %191, %192 : vector<8x128xf32>
    %194 = vector.extract_strided_slice %181 {offsets = [0, 128], sizes = [8, 128], strides = [1, 1]} : vector<8x384xf32> to vector<8x128xf32>
    %195 = vector.extract_strided_slice %185 {offsets = [0, 128], sizes = [8, 128], strides = [1, 1]} : vector<8x384xf32> to vector<8x128xf32>
    %196 = arith.addf %194, %195 : vector<8x128xf32>
    %197 = arith.negf %196 : vector<8x128xf32>
    %198 = math.exp %197 : vector<8x128xf32>
    %cst_62 = arith.constant 1.000000e+00 : f32
    %199 = vector.broadcast %cst_62 : f32 to vector<8x128xf32>
    %200 = arith.addf %199, %198 : vector<8x128xf32>
    %201 = arith.divf %199, %200 : vector<8x128xf32>
    %202 = vector.extract_strided_slice %181 {offsets = [0, 256], sizes = [8, 128], strides = [1, 1]} : vector<8x384xf32> to vector<8x128xf32>
    %203 = vector.extract_strided_slice %185 {offsets = [0, 256], sizes = [8, 128], strides = [1, 1]} : vector<8x384xf32> to vector<8x128xf32>
    %204 = arith.mulf %193, %203 : vector<8x128xf32>
    %205 = arith.addf %202, %204 : vector<8x128xf32>
    %206 = math.tanh %205 : vector<8x128xf32>
    %207 = arith.subf %178, %206 : vector<8x128xf32>
    %208 = arith.mulf %201, %207 : vector<8x128xf32>
    %209 = arith.addf %206, %208 : vector<8x128xf32>
    %210 = arith.index_cast %c4_i32 : i32 to index
    %c0_63 = arith.constant 0 : index
    %c0_64 = arith.constant 0 : index
    %211 = vector.load %arg2[%210, %c0_63, %c0_64] : memref<8x8x128xf32, #tpu.memory_space<vmem>>, vector<1x8x128xf32>
    %212 = vector.shape_cast %211 : vector<1x8x128xf32> to vector<8x128xf32>
    %213 = arith.mulf %212, %209 : vector<8x128xf32>
    %214 = arith.index_cast %c4_i32 : i32 to index
    %c0_65 = arith.constant 0 : index
    %c0_66 = arith.constant 0 : index
    %215 = vector.load %arg7[%214, %c0_65, %c0_66] : memref<8x8x128xf32, #tpu.memory_space<vmem>>, vector<1x8x128xf32>
    %216 = vector.shape_cast %215 : vector<1x8x128xf32> to vector<8x128xf32>
    %217 = vector.shape_cast %213 : vector<8x128xf32> to vector<1x8x128xf32>
    tpu.vector_store %arg7[%214, %c0_65, %c0_66], %217 {strides = array<i32>} : memref<8x8x128xf32, #tpu.memory_space<vmem>>, vector<1x8x128xf32>,
    %218 = arith.subf %209, %178 : vector<8x128xf32>
    %219 = arith.mulf %212, %218 : vector<8x128xf32>
    %220 = arith.addf %178, %219 : vector<8x128xf32>
    %c5_i32 = arith.constant 5 : i32
    %221 = arith.index_cast %c5_i32 : i32 to index
    %c0_67 = arith.constant 0 : index
    %c0_68 = arith.constant 0 : index
    %222 = vector.load %arg9[%221, %c0_67, %c0_68] : memref<8x8x384xf32, #tpu.memory_space<vmem>>, vector<1x8x384xf32>
    %223 = vector.shape_cast %222 : vector<1x8x384xf32> to vector<8x384xf32>
    %c0_69 = arith.constant 0 : index
    %c0_70 = arith.constant 0 : index
    %224 = vector.load %arg5[%c0_69, %c0_70] : memref<128x384xf32, #tpu.memory_space<vmem>>, vector<128x384xf32>
    %cst_71 = arith.constant dense<0.000000e+00> : vector<8x384xf32>
    %225 = tpu.matmul %220, %224, %cst_71 {dimension_numbers = #tpu.dot_dimension_numbers<[1], [0], [0], [1], [0, 0, 1, 1], [], []>} : vector<8x128xf32>, vector<128x384xf32>, vector<8x384xf32> -> vector<8x384xf32>
    %226 = vector.broadcast %9 : vector<1x384xf32> to vector<8x384xf32>
    %227 = arith.addf %225, %226 : vector<8x384xf32>
    %228 = vector.extract_strided_slice %223 {offsets = [0, 0], sizes = [8, 128], strides = [1, 1]} : vector<8x384xf32> to vector<8x128xf32>
    %229 = vector.extract_strided_slice %227 {offsets = [0, 0], sizes = [8, 128], strides = [1, 1]} : vector<8x384xf32> to vector<8x128xf32>
    %230 = arith.addf %228, %229 : vector<8x128xf32>
    %231 = arith.negf %230 : vector<8x128xf32>
    %232 = math.exp %231 : vector<8x128xf32>
    %cst_72 = arith.constant 1.000000e+00 : f32
    %233 = vector.broadcast %cst_72 : f32 to vector<8x128xf32>
    %234 = arith.addf %233, %232 : vector<8x128xf32>
    %235 = arith.divf %233, %234 : vector<8x128xf32>
    %236 = vector.extract_strided_slice %223 {offsets = [0, 128], sizes = [8, 128], strides = [1, 1]} : vector<8x384xf32> to vector<8x128xf32>
    %237 = vector.extract_strided_slice %227 {offsets = [0, 128], sizes = [8, 128], strides = [1, 1]} : vector<8x384xf32> to vector<8x128xf32>
    %238 = arith.addf %236, %237 : vector<8x128xf32>
    %239 = arith.negf %238 : vector<8x128xf32>
    %240 = math.exp %239 : vector<8x128xf32>
    %cst_73 = arith.constant 1.000000e+00 : f32
    %241 = vector.broadcast %cst_73 : f32 to vector<8x128xf32>
    %242 = arith.addf %241, %240 : vector<8x128xf32>
    %243 = arith.divf %241, %242 : vector<8x128xf32>
    %244 = vector.extract_strided_slice %223 {offsets = [0, 256], sizes = [8, 128], strides = [1, 1]} : vector<8x384xf32> to vector<8x128xf32>
    %245 = vector.extract_strided_slice %227 {offsets = [0, 256], sizes = [8, 128], strides = [1, 1]} : vector<8x384xf32> to vector<8x128xf32>
    %246 = arith.mulf %235, %245 : vector<8x128xf32>
    %247 = arith.addf %244, %246 : vector<8x128xf32>
    %248 = math.tanh %247 : vector<8x128xf32>
    %249 = arith.subf %220, %248 : vector<8x128xf32>
    %250 = arith.mulf %243, %249 : vector<8x128xf32>
    %251 = arith.addf %248, %250 : vector<8x128xf32>
    %252 = arith.index_cast %c5_i32 : i32 to index
    %c0_74 = arith.constant 0 : index
    %c0_75 = arith.constant 0 : index
    %253 = vector.load %arg2[%252, %c0_74, %c0_75] : memref<8x8x128xf32, #tpu.memory_space<vmem>>, vector<1x8x128xf32>
    %254 = vector.shape_cast %253 : vector<1x8x128xf32> to vector<8x128xf32>
    %255 = arith.mulf %254, %251 : vector<8x128xf32>
    %256 = arith.index_cast %c5_i32 : i32 to index
    %c0_76 = arith.constant 0 : index
    %c0_77 = arith.constant 0 : index
    %257 = vector.load %arg7[%256, %c0_76, %c0_77] : memref<8x8x128xf32, #tpu.memory_space<vmem>>, vector<1x8x128xf32>
    %258 = vector.shape_cast %257 : vector<1x8x128xf32> to vector<8x128xf32>
    %259 = vector.shape_cast %255 : vector<8x128xf32> to vector<1x8x128xf32>
    tpu.vector_store %arg7[%256, %c0_76, %c0_77], %259 {strides = array<i32>} : memref<8x8x128xf32, #tpu.memory_space<vmem>>, vector<1x8x128xf32>,
    %260 = arith.subf %251, %220 : vector<8x128xf32>
    %261 = arith.mulf %254, %260 : vector<8x128xf32>
    %262 = arith.addf %220, %261 : vector<8x128xf32>
    %c6_i32 = arith.constant 6 : i32
    %263 = arith.index_cast %c6_i32 : i32 to index
    %c0_78 = arith.constant 0 : index
    %c0_79 = arith.constant 0 : index
    %264 = vector.load %arg9[%263, %c0_78, %c0_79] : memref<8x8x384xf32, #tpu.memory_space<vmem>>, vector<1x8x384xf32>
    %265 = vector.shape_cast %264 : vector<1x8x384xf32> to vector<8x384xf32>
    %c0_80 = arith.constant 0 : index
    %c0_81 = arith.constant 0 : index
    %266 = vector.load %arg5[%c0_80, %c0_81] : memref<128x384xf32, #tpu.memory_space<vmem>>, vector<128x384xf32>
    %cst_82 = arith.constant dense<0.000000e+00> : vector<8x384xf32>
    %267 = tpu.matmul %262, %266, %cst_82 {dimension_numbers = #tpu.dot_dimension_numbers<[1], [0], [0], [1], [0, 0, 1, 1], [], []>} : vector<8x128xf32>, vector<128x384xf32>, vector<8x384xf32> -> vector<8x384xf32>
    %268 = vector.broadcast %9 : vector<1x384xf32> to vector<8x384xf32>
    %269 = arith.addf %267, %268 : vector<8x384xf32>
    %270 = vector.extract_strided_slice %265 {offsets = [0, 0], sizes = [8, 128], strides = [1, 1]} : vector<8x384xf32> to vector<8x128xf32>
    %271 = vector.extract_strided_slice %269 {offsets = [0, 0], sizes = [8, 128], strides = [1, 1]} : vector<8x384xf32> to vector<8x128xf32>
    %272 = arith.addf %270, %271 : vector<8x128xf32>
    %273 = arith.negf %272 : vector<8x128xf32>
    %274 = math.exp %273 : vector<8x128xf32>
    %cst_83 = arith.constant 1.000000e+00 : f32
    %275 = vector.broadcast %cst_83 : f32 to vector<8x128xf32>
    %276 = arith.addf %275, %274 : vector<8x128xf32>
    %277 = arith.divf %275, %276 : vector<8x128xf32>
    %278 = vector.extract_strided_slice %265 {offsets = [0, 128], sizes = [8, 128], strides = [1, 1]} : vector<8x384xf32> to vector<8x128xf32>
    %279 = vector.extract_strided_slice %269 {offsets = [0, 128], sizes = [8, 128], strides = [1, 1]} : vector<8x384xf32> to vector<8x128xf32>
    %280 = arith.addf %278, %279 : vector<8x128xf32>
    %281 = arith.negf %280 : vector<8x128xf32>
    %282 = math.exp %281 : vector<8x128xf32>
    %cst_84 = arith.constant 1.000000e+00 : f32
    %283 = vector.broadcast %cst_84 : f32 to vector<8x128xf32>
    %284 = arith.addf %283, %282 : vector<8x128xf32>
    %285 = arith.divf %283, %284 : vector<8x128xf32>
    %286 = vector.extract_strided_slice %265 {offsets = [0, 256], sizes = [8, 128], strides = [1, 1]} : vector<8x384xf32> to vector<8x128xf32>
    %287 = vector.extract_strided_slice %269 {offsets = [0, 256], sizes = [8, 128], strides = [1, 1]} : vector<8x384xf32> to vector<8x128xf32>
    %288 = arith.mulf %277, %287 : vector<8x128xf32>
    %289 = arith.addf %286, %288 : vector<8x128xf32>
    %290 = math.tanh %289 : vector<8x128xf32>
    %291 = arith.subf %262, %290 : vector<8x128xf32>
    %292 = arith.mulf %285, %291 : vector<8x128xf32>
    %293 = arith.addf %290, %292 : vector<8x128xf32>
    %294 = arith.index_cast %c6_i32 : i32 to index
    %c0_85 = arith.constant 0 : index
    %c0_86 = arith.constant 0 : index
    %295 = vector.load %arg2[%294, %c0_85, %c0_86] : memref<8x8x128xf32, #tpu.memory_space<vmem>>, vector<1x8x128xf32>
    %296 = vector.shape_cast %295 : vector<1x8x128xf32> to vector<8x128xf32>
    %297 = arith.mulf %296, %293 : vector<8x128xf32>
    %298 = arith.index_cast %c6_i32 : i32 to index
    %c0_87 = arith.constant 0 : index
    %c0_88 = arith.constant 0 : index
    %299 = vector.load %arg7[%298, %c0_87, %c0_88] : memref<8x8x128xf32, #tpu.memory_space<vmem>>, vector<1x8x128xf32>
    %300 = vector.shape_cast %299 : vector<1x8x128xf32> to vector<8x128xf32>
    %301 = vector.shape_cast %297 : vector<8x128xf32> to vector<1x8x128xf32>
    tpu.vector_store %arg7[%298, %c0_87, %c0_88], %301 {strides = array<i32>} : memref<8x8x128xf32, #tpu.memory_space<vmem>>, vector<1x8x128xf32>,
    %302 = arith.subf %293, %262 : vector<8x128xf32>
    %303 = arith.mulf %296, %302 : vector<8x128xf32>
    %304 = arith.addf %262, %303 : vector<8x128xf32>
    %c7_i32 = arith.constant 7 : i32
    %305 = arith.index_cast %c7_i32 : i32 to index
    %c0_89 = arith.constant 0 : index
    %c0_90 = arith.constant 0 : index
    %306 = vector.load %arg9[%305, %c0_89, %c0_90] : memref<8x8x384xf32, #tpu.memory_space<vmem>>, vector<1x8x384xf32>
    %307 = vector.shape_cast %306 : vector<1x8x384xf32> to vector<8x384xf32>
    %c0_91 = arith.constant 0 : index
    %c0_92 = arith.constant 0 : index
    %308 = vector.load %arg5[%c0_91, %c0_92] : memref<128x384xf32, #tpu.memory_space<vmem>>, vector<128x384xf32>
    %cst_93 = arith.constant dense<0.000000e+00> : vector<8x384xf32>
    %309 = tpu.matmul %304, %308, %cst_93 {dimension_numbers = #tpu.dot_dimension_numbers<[1], [0], [0], [1], [0, 0, 1, 1], [], []>} : vector<8x128xf32>, vector<128x384xf32>, vector<8x384xf32> -> vector<8x384xf32>
    %310 = vector.broadcast %9 : vector<1x384xf32> to vector<8x384xf32>
    %311 = arith.addf %309, %310 : vector<8x384xf32>
    %312 = vector.extract_strided_slice %307 {offsets = [0, 0], sizes = [8, 128], strides = [1, 1]} : vector<8x384xf32> to vector<8x128xf32>
    %313 = vector.extract_strided_slice %311 {offsets = [0, 0], sizes = [8, 128], strides = [1, 1]} : vector<8x384xf32> to vector<8x128xf32>
    %314 = arith.addf %312, %313 : vector<8x128xf32>
    %315 = arith.negf %314 : vector<8x128xf32>
    %316 = math.exp %315 : vector<8x128xf32>
    %cst_94 = arith.constant 1.000000e+00 : f32
    %317 = vector.broadcast %cst_94 : f32 to vector<8x128xf32>
    %318 = arith.addf %317, %316 : vector<8x128xf32>
    %319 = arith.divf %317, %318 : vector<8x128xf32>
    %320 = vector.extract_strided_slice %307 {offsets = [0, 128], sizes = [8, 128], strides = [1, 1]} : vector<8x384xf32> to vector<8x128xf32>
    %321 = vector.extract_strided_slice %311 {offsets = [0, 128], sizes = [8, 128], strides = [1, 1]} : vector<8x384xf32> to vector<8x128xf32>
    %322 = arith.addf %320, %321 : vector<8x128xf32>
    %323 = arith.negf %322 : vector<8x128xf32>
    %324 = math.exp %323 : vector<8x128xf32>
    %cst_95 = arith.constant 1.000000e+00 : f32
    %325 = vector.broadcast %cst_95 : f32 to vector<8x128xf32>
    %326 = arith.addf %325, %324 : vector<8x128xf32>
    %327 = arith.divf %325, %326 : vector<8x128xf32>
    %328 = vector.extract_strided_slice %307 {offsets = [0, 256], sizes = [8, 128], strides = [1, 1]} : vector<8x384xf32> to vector<8x128xf32>
    %329 = vector.extract_strided_slice %311 {offsets = [0, 256], sizes = [8, 128], strides = [1, 1]} : vector<8x384xf32> to vector<8x128xf32>
    %330 = arith.mulf %319, %329 : vector<8x128xf32>
    %331 = arith.addf %328, %330 : vector<8x128xf32>
    %332 = math.tanh %331 : vector<8x128xf32>
    %333 = arith.subf %304, %332 : vector<8x128xf32>
    %334 = arith.mulf %327, %333 : vector<8x128xf32>
    %335 = arith.addf %332, %334 : vector<8x128xf32>
    %336 = arith.index_cast %c7_i32 : i32 to index
    %c0_96 = arith.constant 0 : index
    %c0_97 = arith.constant 0 : index
    %337 = vector.load %arg2[%336, %c0_96, %c0_97] : memref<8x8x128xf32, #tpu.memory_space<vmem>>, vector<1x8x128xf32>
    %338 = vector.shape_cast %337 : vector<1x8x128xf32> to vector<8x128xf32>
    %339 = arith.mulf %338, %335 : vector<8x128xf32>
    %340 = arith.index_cast %c7_i32 : i32 to index
    %c0_98 = arith.constant 0 : index
    %c0_99 = arith.constant 0 : index
    %341 = vector.load %arg7[%340, %c0_98, %c0_99] : memref<8x8x128xf32, #tpu.memory_space<vmem>>, vector<1x8x128xf32>
    %342 = vector.shape_cast %341 : vector<1x8x128xf32> to vector<8x128xf32>
    %343 = vector.shape_cast %339 : vector<8x128xf32> to vector<1x8x128xf32>
    tpu.vector_store %arg7[%340, %c0_98, %c0_99], %343 {strides = array<i32>} : memref<8x8x128xf32, #tpu.memory_space<vmem>>, vector<1x8x128xf32>,
    %344 = arith.subf %335, %304 : vector<8x128xf32>
    %345 = arith.mulf %338, %344 : vector<8x128xf32>
    %346 = arith.addf %304, %345 : vector<8x128xf32>
    %c8_i32 = arith.constant 8 : i32
    %c0_100 = arith.constant 0 : index
    %c0_101 = arith.constant 0 : index
    %347 = vector.load %arg8[%c0_100, %c0_101] : memref<8x128xf32, #tpu.memory_space<vmem>>, vector<8x128xf32>
    tpu.vector_store %arg8[%c0_100, %c0_101], %346 {strides = array<i32>} : memref<8x128xf32, #tpu.memory_space<vmem>>, vector<8x128xf32>,
    return
  }
  func.func @transform_0(%arg0: i32) -> (i32, i32, i32) {
    %c0_i32 = arith.constant 0 : i32
    %c0_i32_0 = arith.constant 0 : i32
    %c0_i32_1 = arith.constant 0 : i32
    %c0_i32_2 = arith.constant 0 : i32
    return %c0_i32, %c0_i32_0, %c0_i32_1 : i32, i32, i32
  }
  func.func @transform_1(%arg0: i32) -> (i32, i32, i32) {
    %c0_i32 = arith.constant 0 : i32
    %c0_i32_0 = arith.constant 0 : i32
    %c0_i32_1 = arith.constant 0 : i32
    %c0_i32_2 = arith.constant 0 : i32
    return %c0_i32, %c0_i32_0, %c0_i32_1 : i32, i32, i32
  }
  func.func @transform_2(%arg0: i32) -> (i32, i32) {
    %c0_i32 = arith.constant 0 : i32
    %c0_i32_0 = arith.constant 0 : i32
    %c0_i32_1 = arith.constant 0 : i32
    return %c0_i32, %c0_i32_0 : i32, i32
  }
  func.func @transform_3(%arg0: i32) -> (i32, i32) {
    %c0_i32 = arith.constant 0 : i32
    %c0_i32_0 = arith.constant 0 : i32
    %c0_i32_1 = arith.constant 0 : i32
    return %c0_i32, %c0_i32_0 : i32, i32
  }
  func.func @transform_4(%arg0: i32) -> (i32, i32) {
    %c0_i32 = arith.constant 0 : i32
    %c0_i32_0 = arith.constant 0 : i32
    %c0_i32_1 = arith.constant 0 : i32
    return %c0_i32, %c0_i32_0 : i32, i32
  }
  func.func @transform_5(%arg0: i32) -> (i32, i32) {
    %c0_i32 = arith.constant 0 : i32
    %c0_i32_0 = arith.constant 0 : i32
    %c0_i32_1 = arith.constant 0 : i32
    return %c0_i32, %c0_i32_0 : i32, i32
  }
  func.func @transform_6(%arg0: i32) -> (i32, i32, i32) {
    %c0_i32 = arith.constant 0 : i32
    %c0_i32_0 = arith.constant 0 : i32
    %c0_i32_1 = arith.constant 0 : i32
    %c0_i32_2 = arith.constant 0 : i32
    return %c0_i32, %c0_i32_0, %c0_i32_1 : i32, i32, i32
  }
  func.func @transform_7(%arg0: i32) -> (i32, i32) {
    %c0_i32 = arith.constant 0 : i32
    %c0_i32_0 = arith.constant 0 : i32
    %c0_i32_1 = arith.constant 0 : i32
    return %c0_i32, %c0_i32_0 : i32, i32
  }
}

module attributes {stable_mosaic.version = 11 : i64} {
  func.func @narm_attn_kernel(%arg0: i32, %arg1: memref<8x8x128xf32, #tpu.memory_space<vmem>>, %arg2: memref<8x128xf32, #tpu.memory_space<vmem>>, %arg3: memref<8x8x128xf32, #tpu.memory_space<vmem>>, %arg4: memref<128x128xf32, #tpu.memory_space<vmem>>, %arg5: memref<128x128xf32, #tpu.memory_space<vmem>>, %arg6: memref<1x128xf32, #tpu.memory_space<vmem>>, %arg7: memref<128x128xf32, #tpu.memory_space<vmem>>, %arg8: memref<128x128xf32, #tpu.memory_space<vmem>>, %arg9: memref<8x128xf32, #tpu.memory_space<vmem>>) attributes {dimension_semantics = [#tpu.dimension_semantics<arbitrary>], iteration_bounds = array<i64: 1>, scalar_prefetch = 0 : i64, scratch_operands = 0 : i64, tpu.core_type = #tpu.core_type<tc>, window_params = [{pipeline_mode = #tpu.pipeline_mode<synchronous>, transform_indices = @transform_0, window_bounds = array<i64: 8, 8, 128>}, {pipeline_mode = #tpu.pipeline_mode<synchronous>, transform_indices = @transform_1, window_bounds = array<i64: 8, 128>}, {pipeline_mode = #tpu.pipeline_mode<synchronous>, transform_indices = @transform_2, window_bounds = array<i64: 8, 8, 128>}, {pipeline_mode = #tpu.pipeline_mode<synchronous>, transform_indices = @transform_3, window_bounds = array<i64: 128, 128>}, {pipeline_mode = #tpu.pipeline_mode<synchronous>, transform_indices = @transform_4, window_bounds = array<i64: 128, 128>}, {pipeline_mode = #tpu.pipeline_mode<synchronous>, transform_indices = @transform_5, window_bounds = array<i64: 1, 128>}, {pipeline_mode = #tpu.pipeline_mode<synchronous>, transform_indices = @transform_6, window_bounds = array<i64: 128, 128>}, {pipeline_mode = #tpu.pipeline_mode<synchronous>, transform_indices = @transform_7, window_bounds = array<i64: 128, 128>}, {pipeline_mode = #tpu.pipeline_mode<synchronous>, transform_indices = @transform_8, window_bounds = array<i64: 8, 128>}]} {
    %c0 = arith.constant 0 : index
    %c0_0 = arith.constant 0 : index
    %c0_1 = arith.constant 0 : index
    %0 = vector.load %arg1[%c0, %c0_0, %c0_1] : memref<8x8x128xf32, #tpu.memory_space<vmem>>, vector<8x8x128xf32>
    %c0_2 = arith.constant 0 : index
    %c0_3 = arith.constant 0 : index
    %1 = vector.load %arg2[%c0_2, %c0_3] : memref<8x128xf32, #tpu.memory_space<vmem>>, vector<8x128xf32>
    %2 = vector.shape_cast %0 : vector<8x8x128xf32> to vector<64x128xf32>
    %c0_4 = arith.constant 0 : index
    %c0_5 = arith.constant 0 : index
    %3 = vector.load %arg4[%c0_4, %c0_5] : memref<128x128xf32, #tpu.memory_space<vmem>>, vector<128x128xf32>
    %cst = arith.constant dense<0.000000e+00> : vector<64x128xf32>
    %4 = tpu.matmul %2, %3, %cst {dimension_numbers = #tpu.dot_dimension_numbers<[1], [0], [0], [1], [0, 0, 1, 1], [], []>} : vector<64x128xf32>, vector<128x128xf32>, vector<64x128xf32> -> vector<64x128xf32>
    %5 = vector.shape_cast %4 : vector<64x128xf32> to vector<8x8x128xf32>
    %c0_6 = arith.constant 0 : index
    %c0_7 = arith.constant 0 : index
    %6 = vector.load %arg5[%c0_6, %c0_7] : memref<128x128xf32, #tpu.memory_space<vmem>>, vector<128x128xf32>
    %cst_8 = arith.constant dense<0.000000e+00> : vector<8x128xf32>
    %7 = tpu.matmul %1, %6, %cst_8 {dimension_numbers = #tpu.dot_dimension_numbers<[1], [0], [0], [1], [0, 0, 1, 1], [], []>} : vector<8x128xf32>, vector<128x128xf32>, vector<8x128xf32> -> vector<8x128xf32>
    %c0_9 = arith.constant 0 : index
    %c0_10 = arith.constant 0 : index
    %c0_11 = arith.constant 0 : index
    %8 = vector.load %arg3[%c0_9, %c0_10, %c0_11] : memref<8x8x128xf32, #tpu.memory_space<vmem>>, vector<8x8x128xf32>
    %9 = vector.shape_cast %7 : vector<8x128xf32> to vector<1x8x128xf32>
    %10 = vector.broadcast %9 : vector<1x8x128xf32> to vector<8x8x128xf32>
    %11 = arith.mulf %8, %10 : vector<8x8x128xf32>
    %12 = arith.addf %5, %11 : vector<8x8x128xf32>
    %13 = arith.negf %12 : vector<8x8x128xf32>
    %14 = math.exp %13 : vector<8x8x128xf32>
    %cst_12 = arith.constant 1.000000e+00 : f32
    %15 = vector.broadcast %cst_12 : f32 to vector<8x8x128xf32>
    %16 = arith.addf %15, %14 : vector<8x8x128xf32>
    %17 = arith.divf %15, %16 : vector<8x8x128xf32>
    %c0_13 = arith.constant 0 : index
    %c0_14 = arith.constant 0 : index
    %18 = vector.load %arg6[%c0_13, %c0_14] : memref<1x128xf32, #tpu.memory_space<vmem>>, vector<1x128xf32>
    %19 = vector.shape_cast %18 : vector<1x128xf32> to vector<1x1x128xf32>
    %20 = vector.broadcast %19 : vector<1x1x128xf32> to vector<8x8x128xf32>
    %21 = arith.mulf %17, %20 : vector<8x8x128xf32>
    %cst_15 = arith.constant dense<0.000000e+00> : vector<8x8xf32>
    %22 = vector.multi_reduction <add>, %21, %cst_15 [2] : vector<8x8x128xf32> to vector<8x8xf32>
    %23 = vector.shape_cast %22 : vector<8x8xf32> to vector<8x8x1xf32>
    %24 = vector.broadcast %23 : vector<8x8x1xf32> to vector<8x8x128xf32>
    %25 = arith.mulf %24, %0 : vector<8x8x128xf32>
    %cst_16 = arith.constant dense<0.000000e+00> : vector<8x128xf32>
    %26 = vector.multi_reduction <add>, %25, %cst_16 [0] : vector<8x8x128xf32> to vector<8x128xf32>
    %c0_17 = arith.constant 0 : index
    %c0_18 = arith.constant 0 : index
    %27 = vector.load %arg7[%c0_17, %c0_18] : memref<128x128xf32, #tpu.memory_space<vmem>>, vector<128x128xf32>
    %cst_19 = arith.constant dense<0.000000e+00> : vector<8x128xf32>
    %28 = tpu.matmul %26, %27, %cst_19 {dimension_numbers = #tpu.dot_dimension_numbers<[1], [0], [0], [1], [0, 0, 1, 1], [], []>} : vector<8x128xf32>, vector<128x128xf32>, vector<8x128xf32> -> vector<8x128xf32>
    %c0_20 = arith.constant 0 : index
    %c0_21 = arith.constant 0 : index
    %29 = vector.load %arg8[%c0_20, %c0_21] : memref<128x128xf32, #tpu.memory_space<vmem>>, vector<128x128xf32>
    %cst_22 = arith.constant dense<0.000000e+00> : vector<8x128xf32>
    %30 = tpu.matmul %1, %29, %cst_22 {dimension_numbers = #tpu.dot_dimension_numbers<[1], [0], [0], [1], [0, 0, 1, 1], [], []>} : vector<8x128xf32>, vector<128x128xf32>, vector<8x128xf32> -> vector<8x128xf32>
    %31 = arith.addf %28, %30 : vector<8x128xf32>
    %c0_23 = arith.constant 0 : index
    %c0_24 = arith.constant 0 : index
    %32 = vector.load %arg9[%c0_23, %c0_24] : memref<8x128xf32, #tpu.memory_space<vmem>>, vector<8x128xf32>
    tpu.vector_store %arg9[%c0_23, %c0_24], %31 {strides = array<i32>} : memref<8x128xf32, #tpu.memory_space<vmem>>, vector<8x128xf32>,
    return
  }
  func.func @transform_0(%arg0: i32) -> (i32, i32, i32) {
    %c0_i32 = arith.constant 0 : i32
    %c0_i32_0 = arith.constant 0 : i32
    %c0_i32_1 = arith.constant 0 : i32
    %c0_i32_2 = arith.constant 0 : i32
    return %c0_i32, %c0_i32_0, %c0_i32_1 : i32, i32, i32
  }
  func.func @transform_1(%arg0: i32) -> (i32, i32) {
    %c0_i32 = arith.constant 0 : i32
    %c0_i32_0 = arith.constant 0 : i32
    %c0_i32_1 = arith.constant 0 : i32
    return %c0_i32, %c0_i32_0 : i32, i32
  }
  func.func @transform_2(%arg0: i32) -> (i32, i32, i32) {
    %c0_i32 = arith.constant 0 : i32
    %c0_i32_0 = arith.constant 0 : i32
    %c0_i32_1 = arith.constant 0 : i32
    %c0_i32_2 = arith.constant 0 : i32
    return %c0_i32, %c0_i32_0, %c0_i32_1 : i32, i32, i32
  }
  func.func @transform_3(%arg0: i32) -> (i32, i32) {
    %c0_i32 = arith.constant 0 : i32
    %c0_i32_0 = arith.constant 0 : i32
    %c0_i32_1 = arith.constant 0 : i32
    return %c0_i32, %c0_i32_0 : i32, i32
  }
  func.func @transform_4(%arg0: i32) -> (i32, i32) {
    %c0_i32 = arith.constant 0 : i32
    %c0_i32_0 = arith.constant 0 : i32
    %c0_i32_1 = arith.constant 0 : i32
    return %c0_i32, %c0_i32_0 : i32, i32
  }
  func.func @transform_5(%arg0: i32) -> (i32, i32) {
    %c0_i32 = arith.constant 0 : i32
    %c0_i32_0 = arith.constant 0 : i32
    %c0_i32_1 = arith.constant 0 : i32
    return %c0_i32, %c0_i32_0 : i32, i32
  }
  func.func @transform_6(%arg0: i32) -> (i32, i32) {
    %c0_i32 = arith.constant 0 : i32
    %c0_i32_0 = arith.constant 0 : i32
    %c0_i32_1 = arith.constant 0 : i32
    return %c0_i32, %c0_i32_0 : i32, i32
  }
  func.func @transform_7(%arg0: i32) -> (i32, i32) {
    %c0_i32 = arith.constant 0 : i32
    %c0_i32_0 = arith.constant 0 : i32
    %c0_i32_1 = arith.constant 0 : i32
    return %c0_i32, %c0_i32_0 : i32, i32
  }
  func.func @transform_8(%arg0: i32) -> (i32, i32) {
    %c0_i32 = arith.constant 0 : i32
    %c0_i32_0 = arith.constant 0 : i32
    %c0_i32_1 = arith.constant 0 : i32
    return %c0_i32, %c0_i32_0 : i32, i32
  }
}

</mosaic_0001>

<bundles_post_ra>
// kernel: narm_forward.3
= control target key start
LH: loop header
LB: loop body
LE: loop exit
PB: predicated region body
PF: predicated region fallthrough
CT: control target
= control target key end

     0   :  { %s1015_s3 = inlined_call_operand.vmem [shape: f32[128,128], index: 3, kind: input, shape index: {}]   ;;  %s1016_s0 = inlined_call_operand.vmem [shape: f32[8,8,128], index: 0, kind: input, shape index: {}]   ;;  %s1017_s4 = inlined_call_operand.vmem [shape: f32[128,128], index: 4, kind: input, shape index: {}]   ;;  %s1018_s1 = inlined_call_operand.vmem [shape: f32[8,128], index: 1, kind: input, shape index: {}]   ;;  %s1019_s5 = inlined_call_operand.vmem [shape: f32[1,128], index: 5, kind: input, shape index: {}]   ;;  %s1020_s2 = inlined_call_operand.vmem [shape: f32[8,8,128], index: 2, kind: input, shape index: {}]   ;;  %s1021_s7 = inlined_call_operand.vmem [shape: f32[128,128], index: 7, kind: input, shape index: {}]   ;;  %s1022_s6 = inlined_call_operand.vmem [shape: f32[128,128], index: 6, kind: input, shape index: {}]   ;;  %s1023_s8 = inlined_call_operand.vmem [shape: f32[8,128], index: 8, kind: output, shape index: {}]  }
   0x1   :  { %v53_v0 = vld [vmem:[%s1015_s3 + $0x78] sm:$0xff]  ;;  %v52_v1 = vld [vmem:[%s1015_s3 + $0x70] sm:$0xff]  ;;  %v51_v2 = vld [vmem:[%s1015_s3 + $0x68] sm:$0xff] }
   0x2   :  { %435 = vmatpush.msra.mxu1 %v53_v0  ;;  %54 = vmatpush.msra.mxu0 %v53_v0  ;;  %v50_v3 = vld [vmem:[%s1015_s3 + $0x60] sm:$0xff]  ;;  %v49_v4 = vld [vmem:[%s1015_s3 + $0x58] sm:$0xff]  ;;  %v48_v5 = vld [vmem:[%s1015_s3 + $0x50] sm:$0xff] }
   0x3   :  { %436 = vmatpush.msra.mxu2 %v53_v0  ;;  %v47_v6 = vld [vmem:[%s1015_s3 + $0x48] sm:$0xff]  ;;  %v46_v7 = vld [vmem:[%s1015_s3 + $0x40] sm:$0xff]  ;;  %v45_v8 = vld [vmem:[%s1015_s3 + $0x38] sm:$0xff] }
   0x4   :  { %437 = vmatpush.msra.mxu1 %v52_v1  ;;  %55 = vmatpush.msra.mxu0 %v52_v1  ;;  %v44_v9 = vld [vmem:[%s1015_s3 + $0x30] sm:$0xff]  ;;  %v43_v10 = vld [vmem:[%s1015_s3 + $0x28] sm:$0xff]  ;;  %v42_v11 = vld [vmem:[%s1015_s3 + $0x20] sm:$0xff] }
   0x5   :  { %438 = vmatpush.msra.mxu2 %v52_v1  ;;  %v41_v12 = vld [vmem:[%s1015_s3 + $0x18] sm:$0xff]  ;;  %v40_v13 = vld [vmem:[%s1015_s3 + $0x10] sm:$0xff]  ;;  %v39_v14 = vld [vmem:[%s1015_s3 + $0x8] sm:$0xff] }
   0x6   :  { %439 = vmatpush.msra.mxu1 %v51_v2  ;;  %56 = vmatpush.msra.mxu0 %v51_v2  ;;  %v38_v15 = vld [vmem:[%s1015_s3] sm:$0xff]  ;;  %v596_v16 = vld [vmem:[%s1016_s0 + $0x18] sm:$0xff]  ;;  %v109_v20 = vld [vmem:[%s1017_s4 + $0x70] sm:$0xff] }
   0x7   :  { %440 = vmatpush.msra.mxu2 %v51_v2  ;;  %v601_v17 = vld [vmem:[%s1016_s0] sm:$0xff]  ;;  %v110_v18 = vld [vmem:[%s1017_s4 + $0x78] sm:$0xff]  ;;  %v108_v21 = vld [vmem:[%s1017_s4 + $0x68] sm:$0xff] }
   0x8   :  { %441 = vmatpush.msra.mxu1 %v50_v3  ;;  %57 = vmatpush.msra.mxu0 %v50_v3  ;;  %v609_v19 = vld [vmem:[%s1016_s0 + $0x38] sm:$0xff]  ;;  %v107_v22 = vld [vmem:[%s1017_s4 + $0x60] sm:$0xff]  ;;  %v631_v24 = vld [vmem:[%s1016_s0 + $0x8] sm:$0xff] }
   0x9   :  { %442 = vmatpush.msra.mxu2 %v50_v3  ;;  %v626_v23 = vld [vmem:[%s1016_s0 + $0x20] sm:$0xff]  ;;  %v106_v25 = vld [vmem:[%s1017_s4 + $0x58] sm:$0xff]  ;;  %v105_v26 = vld [vmem:[%s1017_s4 + $0x50] sm:$0xff] }
   0xa   :  { %443 = vmatpush.msra.mxu1 %v49_v4  ;;  %58 = vmatpush.msra.mxu0 %v49_v4  ;;  %v104_v27 = vld [vmem:[%s1017_s4 + $0x48] sm:$0xff]  ;;  %v103_v28 = vld [vmem:[%s1017_s4 + $0x40] sm:$0xff]  ;;  %v655_v30 = vld [vmem:[%s1016_s0 + $0x10] sm:$0xff] }
   0xb   :  { %444 = vmatpush.msra.mxu2 %v49_v4  ;;  %v650_v29 = vld [vmem:[%s1016_s0 + $0x28] sm:$0xff]  ;;  %v102_v31 = vld [vmem:[%s1017_s4 + $0x38] sm:$0xff]  ;;  %v101_v32 = vld [vmem:[%s1017_s4 + $0x30] sm:$0xff] }
   0xc   :  { %445 = vmatpush.msra.mxu1 %v48_v5  ;;  %59 = vmatpush.msra.mxu0 %v48_v5  ;;  %v100_v33 = vld [vmem:[%s1017_s4 + $0x28] sm:$0xff]  ;;  %v99_v34 = vld [vmem:[%s1017_s4 + $0x20] sm:$0xff]  ;;  %v674_v35 = vld [vmem:[%s1016_s0 + $0x30] sm:$0xff] }
   0xd   :  { %446 = vmatpush.msra.mxu2 %v48_v5  ;;  %v98_v36 = vld [vmem:[%s1017_s4 + $0x18] sm:$0xff]  ;;  %v97_v37 = vld [vmem:[%s1017_s4 + $0x10] sm:$0xff]  ;;  %v96_v38 = vld [vmem:[%s1017_s4 + $0x8] sm:$0xff] }
   0xe   :  { %447 = vmatpush.msra.mxu1 %v47_v6  ;;  %60 = vmatpush.msra.mxu0 %v47_v6  ;;  %v95_v39 = vld [vmem:[%s1017_s4] sm:$0xff]  ;;  %v132_v48 = vld [vmem:[%s1020_s2 + $0x8] sm:$0xff]  ;;  %v134_v49 = vld [vmem:[%s1020_s2 + $0x18] sm:$0xff] }
   0xf   :  { %448 = vmatpush.msra.mxu2 %v47_v6  ;;  %v692_v40 = vld [vmem:[%s1018_s1] sm:$0xff]  ;;  %v136_v51 = vld [vmem:[%s1020_s2 + $0x28] sm:$0xff]  ;;  %v133_v52 = vld [vmem:[%s1020_s2 + $0x10] sm:$0xff] }
  0x10   :  { %449 = vmatpush.msra.mxu1 %v46_v7  ;;  %61 = vmatpush.msra.mxu0 %v46_v7  ;;  %v131_v47 = vld [vmem:[%s1020_s2] sm:$0xff]  ;;  %v138_v53 = vld [vmem:[%s1020_s2 + $0x38] sm:$0xff] }
  0x11   :  { %450 = vmatpush.msra.mxu2 %v46_v7  ;;  %v135_v50 = vld [vmem:[%s1020_s2 + $0x20] sm:$0xff] }
  0x12   :  { %451 = vmatpush.msra.mxu1 %v45_v8  ;;  %62 = vmatpush.msra.mxu0 %v45_v8 }
  0x13   :  { %452 = vmatpush.msra.mxu2 %v45_v8 }
  0x14   :  { %453 = vmatpush.msra.mxu1 %v44_v9  ;;  %63 = vmatpush.msra.mxu0 %v44_v9 }
  0x15   :  { %454 = vmatpush.msra.mxu2 %v44_v9 }
  0x16   :  { %455 = vmatpush.msra.mxu1 %v43_v10  ;;  %64 = vmatpush.msra.mxu0 %v43_v10 }
  0x17   :  { %456 = vmatpush.msra.mxu2 %v43_v10 }
  0x18   :  { %457 = vmatpush.msra.mxu1 %v42_v11  ;;  %65 = vmatpush.msra.mxu0 %v42_v11 }
  0x19   :  { %458 = vmatpush.msra.mxu2 %v42_v11 }
  0x1a   :  { %459 = vmatpush.msra.mxu1 %v41_v12  ;;  %66 = vmatpush.msra.mxu0 %v41_v12 }
  0x1b   :  { %460 = vmatpush.msra.mxu2 %v41_v12  ;;  %v137_v12 = vld [vmem:[%s1020_s2 + $0x30] sm:$0xff] }
  0x1c   :  { %461 = vmatpush.msra.mxu1 %v40_v13  ;;  %67 = vmatpush.msra.mxu0 %v40_v13 }
  0x1d   :  { %462 = vmatpush.msra.mxu2 %v40_v13 }
  0x1e   :  { %463 = vmatpush.msra.mxu1 %v39_v14  ;;  %68 = vmatpush.msra.mxu0 %v39_v14 }
  0x1f   :  { %464 = vmatpush.msra.mxu2 %v39_v14 }
  0x20   :  { %465 = vmatpush.msra.mxu1 %v38_v15  ;;  %69 = vmatpush.msra.mxu0 %v38_v15 }
  0x21   :  { %79 = vmatmul.f32.vlgmr.msra.gmra.mxu1 %v596_v16  ;;  %70 = vmatmul.f32.vlgmr.msra.gmra.mxu0 %v601_v17 }
  0x22   :  { %111 = vmatpush.msrb.mxu1 %v110_v18  ;;  %466 = vmatpush.msra.mxu2 %v38_v15 }
  0x23   :  { %91 = vmatmul.f32.vlgmr.msra.gmra.mxu2 %v609_v19 }
  0x24   :  { %112 = vmatpush.msrb.mxu1 %v109_v20 }
  0x26   :  { %113 = vmatpush.msrb.mxu1 %v108_v21 }
  0x28   :  { %114 = vmatpush.msrb.mxu1 %v107_v22 }
  0x29   :  { %82 = vmatmul.f32.gmra.mxu1 %v626_v23  ;;  %73 = vmatmul.f32.gmra.mxu0 %v631_v24 }
  0x2a   :  { %115 = vmatpush.msrb.mxu1 %v106_v25 }
  0x2c   :  { %116 = vmatpush.msrb.mxu1 %v105_v26 }
  0x2e   :  { %117 = vmatpush.msrb.mxu1 %v104_v27 }
  0x30   :  { %118 = vmatpush.msrb.mxu1 %v103_v28 }
  0x31   :  { %85 = vmatmul.f32.gmra.mxu1 %v650_v29  ;;  %76 = vmatmul.f32.gmra.mxu0 %v655_v30 }
  0x32   :  { %119 = vmatpush.msrb.mxu1 %v102_v31 }
  0x34   :  { %120 = vmatpush.msrb.mxu1 %v101_v32 }
  0x36   :  { %121 = vmatpush.msrb.mxu1 %v100_v33 }
  0x38   :  { %122 = vmatpush.msrb.mxu1 %v99_v34 }
  0x39   :  { %88 = vmatmul.f32.gmra.mxu1 %v674_v35 }
  0x3a   :  { %123 = vmatpush.msrb.mxu1 %v98_v36 }
  0x3c   :  { %124 = vmatpush.msrb.mxu1 %v97_v37 }
  0x3e   :  { %125 = vmatpush.msrb.mxu1 %v96_v38 }
  0x40   :  { %126 = vmatpush.msrb.mxu1 %v95_v39 }
  0x41   :  { %127 = vmatmul.f32.vlgmr.msrb.gmra.mxu1 %v692_v40 }
  0x9e   :  { %v80_v41 = vpop.f32.mrf.mxu1  ;;  %v71_v43 = vpop.f32.mrf.mxu0 }
  0xa6   :  { %v83_v42 = vpop.f32.mrf.mxu1  ;;  %v74_v45 = vpop.f32.mrf.mxu0 }
  0xa7   :  { %v92_v59 = vpop.f32.mrf.mxu2 }
  0xae   :  { %v86_v44 = vpop.f32.mrf.mxu1  ;;  %v77_v58 = vpop.f32.mrf.mxu0 }
  0xb6   :  { %v89_v46 = vpop.f32.mrf.mxu1 }
  0xbe   :  { %v128_v54 = vpop.f32.mrf.mxu1 }
  0xbf   :  { %v140_v55 = vmul.f32 %v132_v48, %v128_v54  ;;  %v142_v56 = vmul.f32 %v134_v49, %v128_v54  ;;  %v143_v57 = vmul.f32 %v135_v50, %v128_v54  ;;  %v139_v60 = vmul.f32 %v131_v47, %v128_v54 }
  0xc0   :  { %v144_v61 = vmul.f32 %v136_v51, %v128_v54  ;;  %v141_v62 = vmul.f32 %v133_v52, %v128_v54  ;;  %v146_v63 = vmul.f32 %v138_v53, %v128_v54  ;;  %v145_v15 = vmul.f32 %v137_v12, %v128_v54 }
  0xc1   :  { %v148_v0 = vadd.f32 %v140_v55, %v74_v45  ;;  %v150_v1 = vadd.f32 %v142_v56, %v80_v41  ;;  %v151_v5 = vadd.f32 %v143_v57, %v83_v42  ;;  %v147_v8 = vadd.f32 %v139_v60, %v71_v43  ;;  %v381_v56 = vld [vmem:[%s1021_s7 + $0x78] sm:$0xff]  ;;  %v380_v60 = vld [vmem:[%s1021_s7 + $0x70] sm:$0xff] }
  0xc2   :  { %v152_v2 = vadd.f32 %v144_v61, %v86_v44  ;;  %v149_v3 = vadd.f32 %v141_v62, %v77_v58  ;;  %v154_v4 = vadd.f32 %v146_v63, %v92_v59  ;;  %v153_v26 = vadd.f32 %v145_v15, %v89_v46  ;;  %v365_v57 = vld [vmem:[%s1022_s6 + $0x78] sm:$0xff]  ;;  %382 = vmatpush.msrb.mxu2 %v381_v56  ;;  %v364_v61 = vld [vmem:[%s1022_s6 + $0x70] sm:$0xff]  ;;  %v378_v15 = vld [vmem:[%s1021_s7 + $0x60] sm:$0xff] }
  0xc3   :  { %v428_v6 = vmul.f32 -1.442695, %v148_v0  ;;  %v430_v7 = vmul.f32 -1.442695, %v150_v1  ;;  %v431_v13 = vmul.f32 -1.442695, %v151_v5  ;;  %402 = vmatpush.msra.mxu3 %v365_v57 }
  0xc4   :  { %v432_v9 = vmul.f32 -1.442695, %v152_v2  ;;  %v429_v10 = vmul.f32 -1.442695, %v149_v3  ;;  %v434_v11 = vmul.f32 -1.442695, %v154_v4  ;;  %383 = vmatpush.msrb.mxu2 %v380_v60 }
  0xc5   :  { %468 = vpow2.f32 %v428_v6  ;;  %v427_v14 = vmul.f32 -1.442695, %v147_v8  ;;  %v433_v36 = vmul.f32 -1.442695, %v153_v26  ;;  %v379_v2 = vld [vmem:[%s1021_s7 + $0x68] sm:$0xff]  ;;  %403 = vmatpush.msra.mxu3 %v364_v61  ;;  %v350_v6 = vld [vmem:[%s1022_s6] sm:$0xff] }
  0xc6   :  { %470 = vpow2.f32 %v430_v7  ;;  %v363_v3 = vld [vmem:[%s1022_s6 + $0x68] sm:$0xff]  ;;  %384 = vmatpush.msrb.mxu2 %v379_v2 }
  0xc7   :  { %472 = vpow2.f32 %v432_v9  ;;  %404 = vmatpush.msra.mxu3 %v363_v3 }
  0xc8   :  { %474 = vpow2.f32 %v429_v10  ;;  %385 = vmatpush.msrb.mxu2 %v378_v15 }
  0xc9   :  { %476 = vpow2.f32 %v434_v11 }
  0xca   :  { %478 = vpow2.f32 %v431_v13 }
  0xcb   :  { %v469_v18 = vpop.eup %468  ;;  %480 = vpow2.f32 %v427_v14 }
  0xcc   :  { %v471_v20 = vpop.eup %470  ;;  %v719_v21 = vadd.f32 1.0, %v469_v18 }
  0xcd   :  { %v473_v22 = vpop.eup %472  ;;  %v721_v25 = vadd.f32 1.0, %v471_v20 }
  0xce   :  { %v723_v27 = vadd.f32 1.0, %v473_v22  ;;  %482 = vrcp.f32 %v719_v21  ;;  %v475_v28 = vpop.eup %474  ;;  %v211_v43 = vand.u32 2147483647, %v719_v21  ;;  %v213_v46 = vand.u32 2147483648, %v719_v21 }
  0xcf   :  { %484 = vrcp.f32 %v721_v25  ;;  %v477_v31 = vpop.eup %476  ;;  %v727_v32 = vadd.f32 1.0, %v475_v28  ;;  %v241_v47 = vand.u32 2147483647, %v721_v25  ;;  %vm237_vm4 = vweird.f32 %v721_v25  ;;  %v362_v28 = vld [vmem:[%s1022_s6 + $0x60] sm:$0xff] }
  0xd0   :  { %486 = vrcp.f32 %v723_v27  ;;  %v479_v33 = vpop.eup %478  ;;  %v733_v38 = vadd.f32 1.0, %v477_v31  ;;  %v271_v59 = vand.u32 2147483647, %v723_v27  ;;  %vm267_vm6 = vweird.f32 %v723_v27  ;;  %405 = vmatpush.msra.mxu3 %v362_v28 }
  0xd1   :  { %v481_v34 = vpop.eup %480  ;;  %488 = vrcp.f32 %v727_v32  ;;  %v731_v37 = vadd.f32 1.0, %v479_v33  ;;  %v226_v45 = vand.u32 2147483647, %v727_v32  ;;  %v228_v53 = vand.u32 2147483648, %v727_v32 }
  0xd2   :  { %v735_v39 = vadd.f32 1.0, %v481_v34  ;;  %vm222_vm1 = vweird.f32 %v727_v32  ;;  %vm207_vm8 = vweird.f32 %v719_v21 }
  0xd3   :  { %490 = vrcp.f32 %v731_v37  ;;  %v256_v48 = vand.u32 2147483647, %v731_v37  ;;  %v258_v49 = vand.u32 2147483648, %v731_v37  ;;  %vm252_vm0 = vweird.f32 %v731_v37 }
  0xd4   :  { %v737_v41 = vpop.eup %482  ;;  %492 = vrcp.f32 %v735_v39  ;;  %v198_v52 = vand.u32 2147483648, %v735_v39  ;;  %vm192_vm2 = vweird.f32 %v735_v39  ;;  %v196_v63 = vand.u32 2147483647, %v735_v39 }
  0xd5   :  { %v740_v42 = vpop.eup %484  ;;  %494 = vpow2.f32 %v433_v36  ;;  %v203_v54 = vmul.f32 %v737_v41, %v719_v21  ;;  %vm793_vm3 = vcmp.eq.f32.partialorder %v256_v48, 8.507059e+37  ;;  %v259_v7 = vor.u32 1.1754944e-38, %v258_v49  ;;  %v824_v36 = vld [vmem:[%s1019_s5] ss:$0 sm:$0xff] }
  0xd6   :  { %v744_v44 = vpop.eup %486  ;;  %496 = vrcp.f32 %v733_v38  ;;  %v233_v55 = vmul.f32 %v740_v42, %v721_v25  ;;  %v199_v12 = vor.u32 1.1754944e-38, %v198_v52  ;;  %vm800_vm5 = vcmp.eq.f32.partialorder %v226_v45, 8.507059e+37 }
  0xd7   :  { %v263_v50 = vmul.f32 %v744_v44, %v723_v27  ;;  %v754_v51 = vpop.eup %488  ;;  %v204_v9 = vsub.f32 1.0, %v203_v54  ;;  %v229_v14 = vor.u32 1.1754944e-38, %v228_v53  ;;  %vm268_vm10 = vweird.f32 %v744_v44 }
  0xd8   :  { %v218_v58 = vmul.f32 %v754_v51, %v727_v32  ;;  %v234_v1 = vsub.f32 1.0, %v233_v55  ;;  %vm223_vm7 = vweird.f32 %v754_v51  ;;  %vm208_vm13 = vweird.f32 %v737_v41 }
  0xd9   :  { %v779_v62 = vpop.eup %490  ;;  %v264_v0 = vsub.f32 1.0, %v263_v50  ;;  %v205_v48 = vmul.f32 %v737_v41, %v204_v9  ;;  %vm224_vm12 = vmor %vm222_vm1, %vm223_vm7  ;;  %vm238_vm14 = vweird.f32 %v740_v42  ;;  %vm212_vm7 = vcmp.eq.f32.partialorder %v211_v43, 8.507059e+37 }
  0xda   :  { %v789_v4 = vpop.eup %492  ;;  %v248_v5 = vmul.f32 %v779_v62, %v731_v37  ;;  %v219_v8 = vsub.f32 1.0, %v218_v58  ;;  %v235_v26 = vmul.f32 %v740_v42, %v234_v1  ;;  %vm253_vm9 = vweird.f32 %v779_v62  ;;  %v369_v1 = vld [vmem:[%s1021_s7 + $0x18] sm:$0xff] }
  0xdb   :  { %v495_v10 = vpop.eup %494  ;;  %v188_v11 = vmul.f32 %v789_v4, %v735_v39  ;;  %v265_v33 = vmul.f32 %v744_v44, %v264_v0  ;;  %vm193_vm11 = vweird.f32 %v789_v4  ;;  %vm254_vm15 = vmor %vm252_vm0, %vm253_vm9  ;;  %v243_v58 = vand.u32 2147483648, %v721_v25  ;;  %v352_v39 = vld [vmem:[%s1022_s6 + $0x10] sm:$0xff] }
  0xdc   :  { %v808_v18 = vpop.eup %496  ;;  %v249_v20 = vsub.f32 1.0, %v248_v5  ;;  %v220_v22 = vmul.f32 %v754_v51, %v219_v8  ;;  %v828_v49 = vadd.f32 1.0, %v495_v10  ;;  %v236_v54 = vadd.f32 %v740_v42, %v235_v26  ;;  %vm194_vm1 = vmor %vm192_vm2, %vm193_vm11 }
  0xdd   :  { %v189_v31 = vsub.f32 1.0, %v188_v11  ;;  %v293_v55 = vmul.f32 %v808_v18, %v733_v38  ;;  %v266_v57 = vadd.f32 %v744_v44, %v265_v33  ;;  %v206_v37 = vadd.f32 %v737_v41, %v205_v48  ;;  %vm870_vm2 = vmor %vm237_vm4, %vm238_vm14 }
  0xde   :  { %v250_v34 = vmul.f32 %v779_v62, %v249_v20  ;;  %v221_v45 = vadd.f32 %v754_v51, %v220_v22  ;;  %498 = vrcp.f32 %v828_v49  ;;  %vm197_vm0 = vcmp.eq.f32.partialorder %v196_v63, 8.507059e+37  ;;  %vm891_vm4 = vmor %vm207_vm8, %vm208_vm13 }
  0xdf   :  { %v190_v50 = vmul.f32 %v789_v4, %v189_v31  ;;  %v240_v63 = vsel %vm870_vm2, %v740_v42, %v236_v54  ;;  %v210_v42 = vsel %vm891_vm4, %v737_v41, %v206_v37  ;;  %v214_v11 = vor.u32 1.1754944e-38, %v213_v46  ;;  %v360_v54 = vld [vmem:[%s1022_s6 + $0x50] sm:$0xff]  ;;  %v371_v37 = vld [vmem:[%s1021_s7 + $0x28] sm:$0xff] }
  0xe0   :  { %v251_v52 = vadd.f32 %v779_v62, %v250_v34  ;;  %v225_v53 = vsel %vm224_vm12, %v754_v51, %v221_v45  ;;  %vm298_vm8 = vweird.f32 %v808_v18  ;;  %vm297_vm9 = vweird.f32 %v733_v38 }
  0xe1   :  { %v191_v32 = vadd.f32 %v789_v4, %v190_v50  ;;  %v230_v56 = vsel %vm800_vm5, %v229_v14, %v225_v53  ;;  %vm242_vm5 = vcmp.eq.f32.partialorder %v241_v47, 8.507059e+37  ;;  %v303_v14 = vand.u32 2147483648, %v733_v38  ;;  %v376_v53 = vld [vmem:[%s1021_s7 + $0x50] sm:$0xff] }
  0xe2   :  { %v255_v51 = vsel %vm254_vm15, %v779_v62, %v251_v52  ;;  %v313_v60 = vmul.f32 %v824_v36, %v230_v56  ;;  %v273_v62 = vand.u32 2147483648, %v723_v27  ;;  %v301_v27 = vand.u32 2147483647, %v733_v38  ;;  %v377_v52 = vld [vmem:[%s1021_s7 + $0x58] sm:$0xff]  ;;  %v358_v56 = vld [vmem:[%s1022_s6 + $0x40] sm:$0xff] }
  0xe3   :  { %v260_v61 = vsel %vm793_vm3, %v259_v7, %v255_v51  ;;  %v195_v0 = vsel %vm194_vm1, %v789_v4, %v191_v32  ;;  %vm879_vm3 = vmor %vm267_vm6, %vm268_vm10  ;;  %v294_v4 = vsub.f32 1.0, %v293_v55  ;;  %v244_v7 = vor.u32 1.1754944e-38, %v243_v58  ;;  %386 = vmatpush.msrb.mxu2 %v377_v52  ;;  %v359_v55 = vld [vmem:[%s1022_s6 + $0x48] sm:$0xff]  ;;  %v374_v32 = vld [vmem:[%s1021_s7 + $0x40] sm:$0xff] }
  0xe4   :  { %v315_v2 = vmul.f32 %v824_v36, %v260_v61  ;;  %v200_v3 = vsel %vm197_vm0, %v199_v12, %v195_v0  ;;  %323 = vadd.xlane.f32.xlu1 %v313_v60  ;;  %v270_v8 = vsel %vm879_vm3, %v744_v44, %v266_v57  ;;  %v274_v10 = vor.u32 1.1754944e-38, %v273_v62  ;;  %v499_v13 = vpop.eup %498  ;;  %vm917_vm10 = vmor %vm297_vm9, %vm298_vm8  ;;  %v373_v57 = vld [vmem:[%s1021_s7 + $0x38] sm:$0xff]  ;;  %v372_v51 = vld [vmem:[%s1021_s7 + $0x30] sm:$0xff] }
  0xe5   :  { %v311_v5 = vmul.f32 %v824_v36, %v200_v3  ;;  %v295_v9 = vmul.f32 %v808_v18, %v294_v4  ;;  %v245_v12 = vsel %vm242_vm5, %v244_v7, %v240_v63  ;;  %vm272_vm6 = vcmp.eq.f32.partialorder %v271_v59, 8.507059e+37  ;;  %387 = vmatpush.msrb.mxu2 %v376_v53  ;;  %v357_v58 = vld [vmem:[%s1022_s6 + $0x38] sm:$0xff]  ;;  %v356_v60 = vld [vmem:[%s1022_s6 + $0x30] sm:$0xff]  ;;  %v355_v61 = vld [vmem:[%s1022_s6 + $0x28] sm:$0xff] }
  0xe6   :  { %327 = vadd.xlane.f32.xlu2 %v315_v2  ;;  %v275_v25 = vsel %vm272_vm6, %v274_v10, %v270_v8  ;;  %v215_v44 = vsel %vm212_vm7, %v214_v11, %v210_v42  ;;  %v278_v47 = vmul.f32 %v499_v13, %v828_v49  ;;  %v314_v46 = vmul.f32 %v824_v36, %v245_v12  ;;  %v370_v0 = vld [vmem:[%s1021_s7 + $0x20] sm:$0xff]  ;;  %v353_v2 = vld [vmem:[%s1022_s6 + $0x18] sm:$0xff]  ;;  %v368_v3 = vld [vmem:[%s1021_s7 + $0x10] sm:$0xff] }
  0xe7   :  { %319 = vadd.xlane.f32.xlu0 %v311_v5  ;;  %v296_v41 = vadd.f32 %v808_v18, %v295_v9  ;;  %v316_v43 = vmul.f32 %v824_v36, %v275_v25  ;;  %v312_v15 = vmul.f32 %v824_v36, %v215_v44  ;;  %v288_v20 = vand.u32 2147483648, %v828_v49  ;;  %v354_v62 = vld [vmem:[%s1022_s6 + $0x20] sm:$0xff]  ;;  %v367_v63 = vld [vmem:[%s1021_s7 + $0x8] sm:$0xff] }
  0xe8   :  { %v279_v59 = vsub.f32 1.0, %v278_v47  ;;  %vm283_vm11 = vweird.f32 %v499_v13  ;;  %v286_v38 = vand.u32 2147483647, %v828_v49  ;;  %v304_v28 = vor.u32 1.1754944e-38, %v303_v14  ;;  %v351_v4 = vld [vmem:[%s1022_s6 + $0x8] sm:$0xff]  ;;  %v366_v5 = vld [vmem:[%s1021_s7] sm:$0xff] }
  0xe9   :  { %v300_v22 = vsel %vm917_vm10, %v808_v18, %v296_v41  ;;  %vm302_vm12 = vcmp.eq.f32.partialorder %v301_v27, 8.507059e+37  ;;  %vm282_vm13 = vweird.f32 %v828_v49  ;;  %v289_v34 = vor.u32 1.1754944e-38, %v288_v20  ;;  %v361_v49 = vld [vmem:[%s1022_s6 + $0x58] sm:$0xff] }
  0xea   :  { %v280_v26 = vmul.f32 %v499_v13, %v279_v59  ;;  %v305_v33 = vsel %vm302_vm12, %v304_v28, %v300_v22  ;;  %vm284_vm14 = vmor %vm282_vm13, %vm283_vm11  ;;  %vm287_vm15 = vcmp.eq.f32.partialorder %v286_v38, 8.507059e+37  ;;  %406 = vmatpush.msra.mxu3 %v361_v49 }
  0xeb   :  { %v318_v50 = vmul.f32 %v824_v36, %v305_v33 }
  0xec   :  { %325 = vadd.xlane.f32.xlu1 %v314_v46  ;;  %v281_v31 = vadd.f32 %v499_v13, %v280_v26  ;;  %407 = vmatpush.msra.mxu3 %v360_v54 }
  0xee   :  { %329 = vadd.xlane.f32.xlu2 %v316_v43  ;;  %v285_v45 = vsel %vm284_vm14, %v499_v13, %v281_v31  ;;  %408 = vmatpush.msra.mxu3 %v359_v55 }
  0xef   :  { %321 = vadd.xlane.f32.xlu0 %v312_v15  ;;  %v290_v48 = vsel %vm287_vm15, %v289_v34, %v285_v45 }
  0xf0   :  { %v317_v18 = vmul.f32 %v824_v36, %v290_v48  ;;  %v375_v36 = vld [vmem:[%s1021_s7 + $0x48] sm:$0xff]  ;;  %409 = vmatpush.msra.mxu3 %v358_v56 }
  0xf1   :  { %388 = vmatpush.msrb.mxu2 %v375_v36 }
  0xf2   :  { %410 = vmatpush.msra.mxu3 %v357_v58 }
  0xf3   :  { %389 = vmatpush.msrb.mxu2 %v374_v32 }
  0xf4   :  { %333 = vadd.xlane.f32.xlu1 %v318_v50  ;;  %411 = vmatpush.msra.mxu3 %v356_v60 }
  0xf5   :  { %390 = vmatpush.msrb.mxu2 %v373_v57 }
  0xf6   :  { %412 = vmatpush.msra.mxu3 %v355_v61 }
  0xf7   :  { %331 = vadd.xlane.f32.xlu0 %v317_v18  ;;  %391 = vmatpush.msrb.mxu2 %v372_v51 }
  0xf8   :  { %413 = vmatpush.msra.mxu3 %v354_v62 }
  0xf9   :  { %392 = vmatpush.msrb.mxu2 %v371_v37 }
  0xfa   :  { %414 = vmatpush.msra.mxu3 %v353_v2 }
  0xfb   :  { %393 = vmatpush.msrb.mxu2 %v370_v0 }
  0xfc   :  { %415 = vmatpush.msra.mxu3 %v352_v39 }
  0xfd   :  { %394 = vmatpush.msrb.mxu2 %v369_v1 }
  0xfe   :  { %416 = vmatpush.msra.mxu3 %v351_v4 }
  0xff   :  { %395 = vmatpush.msrb.mxu2 %v368_v3 }
 0x100   :  { %417 = vmatpush.msra.mxu3 %v350_v6 }
 0x101   :  { %396 = vmatpush.msrb.mxu2 %v367_v63 }
 0x103   :  { %397 = vmatpush.msrb.mxu2 %v366_v5 }
 0x104   :  { %398 = vmatmul.f32.vlgmr.msrb.gmra.mxu2 %v692_v40 }
 0x157   :  { %v324_v7 = vpop.xlane.xlu1 %323 }
 0x158   :  { %v337_v13 = vmul.f32 %v324_v7, %v655_v30 }
 0x159   :  { %v328_v42 = vpop.xlane.xlu2 %327 }
 0x15a   :  { %v320_v8 = vpop.xlane.xlu0 %319  ;;  %v339_v14 = vmul.f32 %v328_v42, %v626_v23 }
 0x15b   :  { %v335_v11 = vmul.f32 %v320_v8, %v601_v17 }
 0x15f   :  { %v326_v10 = vpop.xlane.xlu1 %325 }
 0x160   :  { %v338_v44 = vmul.f32 %v326_v10, %v596_v16 }
 0x161   :  { %v330_v47 = vpop.xlane.xlu2 %329 }
 0x162   :  { %v322_v9 = vpop.xlane.xlu0 %321  ;;  %v340_v40 = vmul.f32 %v330_v47, %v650_v29 }
 0x163   :  { %v336_v12 = vmul.f32 %v322_v9, %v631_v24 }
 0x165   :  { %v343_v41 = vadd.f32 %v336_v12, %v335_v11 }
 0x167   :  { %v344_v25 = vadd.f32 %v343_v41, %v337_v13  ;;  %v334_v21 = vpop.xlane.xlu1 %333 }
 0x168   :  { %v342_v24 = vmul.f32 %v334_v21, %v609_v19 }
 0x169   :  { %v345_v46 = vadd.f32 %v344_v25, %v338_v44 }
 0x16a   :  { %v332_v27 = vpop.xlane.xlu0 %331 }
 0x16b   :  { %v346_v59 = vadd.f32 %v345_v46, %v339_v14  ;;  %v341_v43 = vmul.f32 %v332_v27, %v674_v35 }
 0x16d   :  { %v347_v17 = vadd.f32 %v346_v59, %v340_v40 }
 0x16f   :  { %v348_v15 = vadd.f32 %v347_v17, %v341_v43 }
 0x171   :  { %v349_v30 = vadd.f32 %v348_v15, %v342_v24 }
 0x173   :  { %418 = vmatmul.f32.vlgmr.msra.gmra.mxu3 %v349_v30 }
 0x187   :  { %v399_v20 = vpop.f32.mrf.mxu2 }
 0x1f6   :  { %v419_v22 = vpop.f32.mrf.mxu3 }
 0x1f7   :  { %v420_v16 = vadd.f32 %v419_v22, %v399_v20 }
 0x1f9   :  { %422 = vst [vmem:[%s1023_s8] sm:$0xff] %v420_v16 }

// kernel: narm_forward.2
= control target key start
LH: loop header
LB: loop body
LE: loop exit
PB: predicated region body
PF: predicated region fallthrough
CT: control target
= control target key end

     0   :  { %v1687_v47 = vmov 0.0   ;;  %s3151_s2 = inlined_call_operand.vmem [shape: f32[128,384], index: 2, kind: input, shape index: {}]   ;;  %s3152_s4 = inlined_call_operand.vmem [shape: f32[128,384], index: 4, kind: input, shape index: {}]   ;;  %s3153_s0 = inlined_call_operand.vmem [shape: f32[8,8,128], index: 0, kind: input, shape index: {}]   ;;  %s3154_s3 = inlined_call_operand.vmem [shape: f32[1,384], index: 3, kind: input, shape index: {}]   ;;  %s3155_s5 = inlined_call_operand.vmem [shape: f32[1,384], index: 5, kind: input, shape index: {}]   ;;  %s3156_s1 = inlined_call_operand.vmem [shape: f32[8,8,128], index: 1, kind: input, shape index: {}]   ;;  %s3157_s6 = inlined_call_operand.vmem [shape: f32[8,8,128], index: 6, kind: output, shape index: {0}]   ;;  %s3158_s7 = inlined_call_operand.vmem [shape: f32[8,128], index: 7, kind: output, shape index: {1}]  }
   0x1   :  { %v78_v0 = vld [vmem:[%s3151_s2 + $0x168] sm:$0xff]  ;;  %v75_v2 = vld [vmem:[%s3151_s2 + $0x150] sm:$0xff]  ;;  %v72_v4 = vld [vmem:[%s3151_s2 + $0x138] sm:$0xff] }
   0x2   :  { %v1734_v1 = vld [vmem:[%s3152_s4 + $0x168] sm:$0xff]  ;;  %89 = vmatpush.msra.mxu0 %v78_v0  ;;  %v1743_v3 = vld [vmem:[%s3152_s4 + $0x150] sm:$0xff]  ;;  %v1751_v5 = vld [vmem:[%s3152_s4 + $0x138] sm:$0xff] }
   0x3   :  { %295 = vmatpush.msra.mxu3 %v1734_v1  ;;  %v69_v6 = vld [vmem:[%s3151_s2 + $0x120] sm:$0xff]  ;;  %v66_v8 = vld [vmem:[%s3151_s2 + $0x108] sm:$0xff]  ;;  %v63_v10 = vld [vmem:[%s3151_s2 + $0xf0] sm:$0xff] }
   0x4   :  { %90 = vmatpush.msra.mxu0 %v75_v2  ;;  %v1760_v7 = vld [vmem:[%s3152_s4 + $0x120] sm:$0xff]  ;;  %v1769_v9 = vld [vmem:[%s3152_s4 + $0x108] sm:$0xff]  ;;  %v1778_v11 = vld [vmem:[%s3152_s4 + $0xf0] sm:$0xff] }
   0x5   :  { %296 = vmatpush.msra.mxu3 %v1743_v3  ;;  %v60_v12 = vld [vmem:[%s3151_s2 + $0xd8] sm:$0xff]  ;;  %v57_v14 = vld [vmem:[%s3151_s2 + $0xc0] sm:$0xff]  ;;  %v79_v16 = vld [vmem:[%s3151_s2 + $0x170] sm:$0xff] }
   0x6   :  { %91 = vmatpush.msra.mxu0 %v72_v4  ;;  %v1787_v13 = vld [vmem:[%s3152_s4 + $0xd8] sm:$0xff]  ;;  %v1796_v15 = vld [vmem:[%s3152_s4 + $0xc0] sm:$0xff]  ;;  %v54_v18 = vld [vmem:[%s3151_s2 + $0xa8] sm:$0xff]  ;;  %130 = vmatpush.msra.mxu1 %v79_v16 }
   0x7   :  { %297 = vmatpush.msra.mxu3 %v1751_v5  ;;  %v76_v17 = vld [vmem:[%s3151_s2 + $0x158] sm:$0xff]  ;;  %v1811_v19 = vld [vmem:[%s3152_s4 + $0xa8] sm:$0xff]  ;;  %v73_v20 = vld [vmem:[%s3151_s2 + $0x140] sm:$0xff] }
   0x8   :  { %92 = vmatpush.msra.mxu0 %v69_v6  ;;  %v51_v21 = vld [vmem:[%s3151_s2 + $0x90] sm:$0xff]  ;;  %131 = vmatpush.msra.mxu1 %v76_v17  ;;  %v70_v23 = vld [vmem:[%s3151_s2 + $0x128] sm:$0xff]  ;;  %v48_v24 = vld [vmem:[%s3151_s2 + $0x78] sm:$0xff] }
   0x9   :  { %298 = vmatpush.msra.mxu3 %v1760_v7  ;;  %v1823_v22 = vld [vmem:[%s3152_s4 + $0x90] sm:$0xff]  ;;  %v1835_v25 = vld [vmem:[%s3152_s4 + $0x78] sm:$0xff]  ;;  %v45_v27 = vld [vmem:[%s3151_s2 + $0x60] sm:$0xff] }
   0xa   :  { %93 = vmatpush.msra.mxu0 %v66_v8  ;;  %132 = vmatpush.msra.mxu1 %v73_v20  ;;  %v67_v26 = vld [vmem:[%s3151_s2 + $0x110] sm:$0xff]  ;;  %v1847_v28 = vld [vmem:[%s3152_s4 + $0x60] sm:$0xff]  ;;  %v64_v29 = vld [vmem:[%s3151_s2 + $0xf8] sm:$0xff] }
   0xb   :  { %299 = vmatpush.msra.mxu3 %v1769_v9  ;;  %v42_v30 = vld [vmem:[%s3151_s2 + $0x48] sm:$0xff]  ;;  %v61_v32 = vld [vmem:[%s3151_s2 + $0xe0] sm:$0xff]  ;;  %v39_v33 = vld [vmem:[%s3151_s2 + $0x30] sm:$0xff] }
   0xc   :  { %94 = vmatpush.msra.mxu0 %v63_v10  ;;  %133 = vmatpush.msra.mxu1 %v70_v23  ;;  %v1859_v31 = vld [vmem:[%s3152_s4 + $0x48] sm:$0xff]  ;;  %v1871_v34 = vld [vmem:[%s3152_s4 + $0x30] sm:$0xff]  ;;  %v36_v36 = vld [vmem:[%s3151_s2 + $0x18] sm:$0xff] }
   0xd   :  { %300 = vmatpush.msra.mxu3 %v1778_v11  ;;  %v58_v35 = vld [vmem:[%s3151_s2 + $0xc8] sm:$0xff]  ;;  %v1883_v37 = vld [vmem:[%s3152_s4 + $0x18] sm:$0xff]  ;;  %v55_v38 = vld [vmem:[%s3151_s2 + $0xb0] sm:$0xff] }
   0xe   :  { %95 = vmatpush.msra.mxu0 %v60_v12  ;;  %134 = vmatpush.msra.mxu1 %v67_v26  ;;  %v33_v39 = vld [vmem:[%s3151_s2] sm:$0xff]  ;;  %v80_v42 = vld [vmem:[%s3151_s2 + $0x178] sm:$0xff]  ;;  %v1909_v43 = vld [vmem:[%s3152_s4 + $0x170] sm:$0xff] }
   0xf   :  { %301 = vmatpush.msra.mxu3 %v1787_v13  ;;  %v1895_v40 = vld [vmem:[%s3152_s4] sm:$0xff]  ;;  %v1914_v44 = vld [vmem:[%s3152_s4 + $0x178] sm:$0xff]  ;;  %171 = vmatpush.msra.mxu2 %v80_v42  ;;  %v74_v51 = vld [vmem:[%s3151_s2 + $0x148] sm:$0xff] }
  0x10   :  { %96 = vmatpush.msra.mxu0 %v57_v14  ;;  %135 = vmatpush.msra.mxu1 %v64_v29  ;;  %v1901_v41 = vld [vmem:[%s3153_s0] sm:$0xff]  ;;  %v52_v45 = vld [vmem:[%s3151_s2 + $0x98] sm:$0xff]  ;;  %v1951_v53 = vld [vmem:[%s3152_s4 + $0x148] sm:$0xff] }
  0x11   :  { %302 = vmatpush.msra.mxu3 %v1796_v15  ;;  %v77_v46 = vld [vmem:[%s3151_s2 + $0x160] sm:$0xff]  ;;  %v1928_v48 = vld [vmem:[%s3152_s4 + $0x158] sm:$0xff]  ;;  %v46_v54 = vld [vmem:[%s3151_s2 + $0x68] sm:$0xff] }
  0x12   :  { %97 = vmatpush.msra.mxu0 %v54_v18  ;;  %136 = vmatpush.msra.mxu1 %v61_v32  ;;  %v1933_v49 = vld [vmem:[%s3152_s4 + $0x160] sm:$0xff]  ;;  %v71_v55 = vld [vmem:[%s3151_s2 + $0x130] sm:$0xff]  ;;  %v1964_v56 = vld [vmem:[%s3152_s4 + $0x128] sm:$0xff] }
  0x13   :  { %303 = vmatpush.msra.mxu3 %v1811_v19  ;;  %v49_v50 = vld [vmem:[%s3151_s2 + $0x80] sm:$0xff]  ;;  %172 = vmatpush.msra.mxu2 %v77_v46  ;;  %v1969_v57 = vld [vmem:[%s3152_s4 + $0x130] sm:$0xff]  ;;  %v1975_v58 = vld [vmem:[%s3153_s0 + $0x8] sm:$0xff] }
  0x14   :  { %98 = vmatpush.msra.mxu0 %v51_v21  ;;  %137 = vmatpush.msra.mxu1 %v58_v35  ;;  %v1946_v52 = vld [vmem:[%s3152_s4 + $0x140] sm:$0xff]  ;;  %v43_v59 = vld [vmem:[%s3151_s2 + $0x50] sm:$0xff]  ;;  %v1989_v61 = vld [vmem:[%s3152_s4 + $0x118] sm:$0xff] }
  0x15   :  { %304 = vmatpush.msra.mxu3 %v1823_v22  ;;  %173 = vmatpush.msra.mxu2 %v74_v51  ;;  %v1984_v60 = vld [vmem:[%s3152_s4 + $0x110] sm:$0xff]  ;;  %v40_v62 = vld [vmem:[%s3151_s2 + $0x38] sm:$0xff]  ;;  %v2008_v2 = vld [vmem:[%s3152_s4 + $0x100] sm:$0xff] }
  0x16   :  { %99 = vmatpush.msra.mxu0 %v48_v24  ;;  %138 = vmatpush.msra.mxu1 %v55_v38  ;;  %v68_v63 = vld [vmem:[%s3151_s2 + $0x118] sm:$0xff]  ;;  %v37_v4 = vld [vmem:[%s3151_s2 + $0x20] sm:$0xff]  ;;  %v2026_v10 = vld [vmem:[%s3152_s4 + $0xe8] sm:$0xff] }
  0x17   :  { %305 = vmatpush.msra.mxu3 %v1835_v25  ;;  %174 = vmatpush.msra.mxu2 %v71_v55  ;;  %v2003_v0 = vld [vmem:[%s3152_s4 + $0xf8] sm:$0xff]  ;;  %v65_v6 = vld [vmem:[%s3151_s2 + $0x100] sm:$0xff]  ;;  %v34_v12 = vld [vmem:[%s3151_s2 + $0x8] sm:$0xff] }
  0x18   :  { %100 = vmatpush.msra.mxu0 %v45_v27  ;;  %139 = vmatpush.msra.mxu1 %v52_v45  ;;  %v2021_v8 = vld [vmem:[%s3152_s4 + $0xe0] sm:$0xff]  ;;  %v62_v14 = vld [vmem:[%s3151_s2 + $0xe8] sm:$0xff]  ;;  %v2044_v17 = vld [vmem:[%s3152_s4 + $0xd0] sm:$0xff] }
  0x19   :  { %306 = vmatpush.msra.mxu3 %v1847_v28  ;;  %175 = vmatpush.msra.mxu2 %v68_v63  ;;  %v2039_v16 = vld [vmem:[%s3152_s4 + $0xc8] sm:$0xff]  ;;  %v2050_v18 = vld [vmem:[%s3153_s0 + $0x10] sm:$0xff]  ;;  %v2061_v21 = vld [vmem:[%s3152_s4 + $0xb8] sm:$0xff] }
  0x1a   :  { %101 = vmatpush.msra.mxu0 %v42_v30  ;;  %140 = vmatpush.msra.mxu1 %v49_v50  ;;  %v2056_v20 = vld [vmem:[%s3152_s4 + $0xb0] sm:$0xff]  ;;  %v2072_v24 = vld [vmem:[%s3152_s4 + $0x98] sm:$0xff]  ;;  %v2077_v26 = vld [vmem:[%s3152_s4 + $0xa0] sm:$0xff] }
  0x1b   :  { %307 = vmatpush.msra.mxu3 %v1859_v31  ;;  %176 = vmatpush.msra.mxu2 %v65_v6  ;;  %v59_v23 = vld [vmem:[%s3151_s2 + $0xd0] sm:$0xff]  ;;  %v56_v27 = vld [vmem:[%s3151_s2 + $0xb8] sm:$0xff]  ;;  %v2088_v29 = vld [vmem:[%s3152_s4 + $0x80] sm:$0xff] }
  0x1c   :  { %102 = vmatpush.msra.mxu0 %v39_v33  ;;  %141 = vmatpush.msra.mxu1 %v46_v54  ;;  %v2093_v30 = vld [vmem:[%s3152_s4 + $0x88] sm:$0xff]  ;;  %v53_v32 = vld [vmem:[%s3151_s2 + $0xa0] sm:$0xff]  ;;  %v2109_v35 = vld [vmem:[%s3152_s4 + $0x70] sm:$0xff] }
  0x1d   :  { %308 = vmatpush.msra.mxu3 %v1871_v34  ;;  %177 = vmatpush.msra.mxu2 %v62_v14  ;;  %v2104_v33 = vld [vmem:[%s3152_s4 + $0x68] sm:$0xff]  ;;  %v2130_v42 = vld [vmem:[%s3152_s4 + $0x58] sm:$0xff]  ;;  %v47_v45 = vld [vmem:[%s3151_s2 + $0x70] sm:$0xff] }
  0x1e   :  { %103 = vmatpush.msra.mxu0 %v36_v36  ;;  %142 = vmatpush.msra.mxu1 %v43_v59  ;;  %v2116_v36 = vld [vmem:[%s3153_s0 + $0x18] sm:$0xff]  ;;  %v50_v38 = vld [vmem:[%s3151_s2 + $0x88] sm:$0xff]  ;;  %v2147_v50 = vld [vmem:[%s3152_s4 + $0x40] sm:$0xff] }
  0x1f   :  { %309 = vmatpush.msra.mxu3 %v1883_v37  ;;  %178 = vmatpush.msra.mxu2 %v59_v23  ;;  %v2142_v46 = vld [vmem:[%s3152_s4 + $0x38] sm:$0xff]  ;;  %v2157_v54 = vld [vmem:[%s3152_s4 + $0x20] sm:$0xff]  ;;  %v2162_v55 = vld [vmem:[%s3152_s4 + $0x28] sm:$0xff] }
  0x20   :  { %104 = vmatpush.msra.mxu0 %v33_v39  ;;  %143 = vmatpush.msra.mxu1 %v40_v62  ;;  %v2125_v39 = vld [vmem:[%s3152_s4 + $0x50] sm:$0xff]  ;;  %v44_v51 = vld [vmem:[%s3151_s2 + $0x58] sm:$0xff]  ;;  %v41_v59 = vld [vmem:[%s3151_s2 + $0x40] sm:$0xff] }
  0x21   :  { %310 = vmatpush.msra.mxu3 %v1895_v40  ;;  %105 = vmatmul.f32.vlgmr.msra.gmra.mxu0 %v1901_v41  ;;  %v2173_v62 = vld [vmem:[%s3152_s4 + $0x8] sm:$0xff]  ;;  %v2178_v63 = vld [vmem:[%s3152_s4 + $0x10] sm:$0xff] }
  0x22   :  { %311 = vmatmul.f32.vlgmr.msra.gmra.mxu3 %v1687_v47  ;;  %335 = vmatpush.msrb.mxu0 %v1914_v44  ;;  %v38_v6 = vld [vmem:[%s3151_s2 + $0x28] sm:$0xff] }
  0x23   :  { %315 = vmatpush.msrb.mxu3 %v1909_v43  ;;  %144 = vmatpush.msra.mxu1 %v37_v4  ;;  %v2185_v4 = vld [vmem:[%s3153_s0 + $0x20] sm:$0xff]  ;;  %v2208_v14 = vld [vmem:[%s3153_s0 + $0x28] sm:$0xff] }
  0x24   :  { %336 = vmatpush.msrb.mxu0 %v1933_v49  ;;  %179 = vmatpush.msra.mxu2 %v56_v27 }
  0x25   :  { %316 = vmatpush.msrb.mxu3 %v1928_v48  ;;  %145 = vmatpush.msra.mxu1 %v34_v12  ;;  %v35_v12 = vld [vmem:[%s3151_s2 + $0x10] sm:$0xff] }
  0x26   :  { %337 = vmatpush.msrb.mxu0 %v1951_v53  ;;  %146 = vmatmul.f32.vlgmr.msra.gmra.mxu1 %v1901_v41 }
  0x27   :  { %317 = vmatpush.msrb.mxu3 %v1946_v52  ;;  %457 = vmatpush.msrb.mxu1 %v1734_v1 }
  0x28   :  { %338 = vmatpush.msrb.mxu0 %v1969_v57  ;;  %180 = vmatpush.msra.mxu2 %v53_v32 }
  0x29   :  { %318 = vmatpush.msrb.mxu3 %v1964_v56  ;;  %108 = vmatmul.f32.gmra.mxu0 %v1975_v58 }
  0x2a   :  { %339 = vmatpush.msrb.mxu0 %v1989_v61  ;;  %458 = vmatpush.msrb.mxu1 %v1743_v3 }
  0x2b   :  { %319 = vmatpush.msrb.mxu3 %v1984_v60  ;;  %181 = vmatpush.msra.mxu2 %v50_v38 }
  0x2c   :  { %340 = vmatpush.msrb.mxu0 %v2008_v2  ;;  %459 = vmatpush.msrb.mxu1 %v1751_v5 }
  0x2d   :  { %320 = vmatpush.msrb.mxu3 %v2003_v0  ;;  %182 = vmatpush.msra.mxu2 %v47_v45 }
  0x2e   :  { %341 = vmatpush.msrb.mxu0 %v2026_v10  ;;  %149 = vmatmul.f32.gmra.mxu1 %v1975_v58 }
  0x2f   :  { %321 = vmatpush.msrb.mxu3 %v2021_v8  ;;  %183 = vmatpush.msra.mxu2 %v44_v51 }
  0x30   :  { %342 = vmatpush.msrb.mxu0 %v2044_v17  ;;  %460 = vmatpush.msrb.mxu1 %v1760_v7 }
  0x31   :  { %322 = vmatpush.msrb.mxu3 %v2039_v16  ;;  %111 = vmatmul.f32.gmra.mxu0 %v2050_v18 }
  0x32   :  { %343 = vmatpush.msrb.mxu0 %v2061_v21  ;;  %184 = vmatpush.msra.mxu2 %v41_v59 }
  0x33   :  { %323 = vmatpush.msrb.mxu3 %v2056_v20  ;;  %461 = vmatpush.msrb.mxu1 %v1769_v9 }
  0x34   :  { %344 = vmatpush.msrb.mxu0 %v2077_v26  ;;  %185 = vmatpush.msra.mxu2 %v38_v6 }
  0x35   :  { %324 = vmatpush.msrb.mxu3 %v2072_v24  ;;  %462 = vmatpush.msrb.mxu1 %v1778_v11 }
  0x36   :  { %345 = vmatpush.msrb.mxu0 %v2093_v30  ;;  %152 = vmatmul.f32.gmra.mxu1 %v2050_v18 }
  0x37   :  { %325 = vmatpush.msrb.mxu3 %v2088_v29  ;;  %186 = vmatpush.msra.mxu2 %v35_v12 }
  0x38   :  { %346 = vmatpush.msrb.mxu0 %v2109_v35  ;;  %463 = vmatpush.msrb.mxu1 %v1787_v13 }
  0x39   :  { %326 = vmatpush.msrb.mxu3 %v2104_v33  ;;  %114 = vmatmul.f32.gmra.mxu0 %v2116_v36 }
  0x3a   :  { %347 = vmatpush.msrb.mxu0 %v2130_v42  ;;  %187 = vmatmul.f32.vlgmr.msra.gmra.mxu2 %v1901_v41 }
  0x3b   :  { %327 = vmatpush.msrb.mxu3 %v2125_v39  ;;  %477 = vmatpush.msrb.mxu2 %v1909_v43 }
  0x3c   :  { %348 = vmatpush.msrb.mxu0 %v2147_v50  ;;  %464 = vmatpush.msrb.mxu1 %v1796_v15 }
  0x3d   :  { %328 = vmatpush.msrb.mxu3 %v2142_v46  ;;  %478 = vmatpush.msrb.mxu2 %v1928_v48 }
  0x3e   :  { %349 = vmatpush.msrb.mxu0 %v2162_v55  ;;  %465 = vmatpush.msrb.mxu1 %v1811_v19 }
  0x3f   :  { %329 = vmatpush.msrb.mxu3 %v2157_v54  ;;  %479 = vmatpush.msrb.mxu2 %v1946_v52 }
  0x40   :  { %350 = vmatpush.msrb.mxu0 %v2178_v63  ;;  %466 = vmatpush.msrb.mxu1 %v1823_v22 }
  0x41   :  { %330 = vmatpush.msrb.mxu3 %v2173_v62  ;;  %117 = vmatmul.f32.gmra.mxu0 %v2185_v4 }
  0x42   :  { %331 = vmatmul.f32.vlgmr.msrb.gmra.mxu3 %v1687_v47  ;;  %623 = vmatpush.msra.mxu0 %v1734_v1  ;;  %v2229_v1 = vld [vmem:[%s3153_s0 + $0x30] sm:$0xff] }
  0x43   :  { %497 = vmatpush.msra.mxu3 %v1914_v44  ;;  %155 = vmatmul.f32.gmra.mxu1 %v2116_v36 }
  0x44   :  { %480 = vmatpush.msrb.mxu2 %v1964_v56  ;;  %467 = vmatpush.msrb.mxu1 %v1835_v25 }
  0x45   :  { %498 = vmatpush.msra.mxu3 %v1933_v49  ;;  %190 = vmatmul.f32.gmra.mxu2 %v1975_v58 }
  0x46   :  { %481 = vmatpush.msrb.mxu2 %v1984_v60  ;;  %468 = vmatpush.msrb.mxu1 %v1847_v28 }
  0x47   :  { %499 = vmatpush.msra.mxu3 %v1951_v53  ;;  %624 = vmatpush.msra.mxu0 %v1743_v3  ;;  %v32_v3 = vld [vmem:[%s3153_s0 + $0x38] sm:$0xff] }
  0x48   :  { %482 = vmatpush.msrb.mxu2 %v2003_v0  ;;  %469 = vmatpush.msrb.mxu1 %v1859_v31 }
  0x49   :  { %120 = vmatmul.f32.gmra.mxu0 %v2208_v14  ;;  %500 = vmatpush.msra.mxu3 %v1969_v57 }
  0x4a   :  { %483 = vmatpush.msrb.mxu2 %v2021_v8  ;;  %470 = vmatpush.msrb.mxu1 %v1871_v34 }
  0x4b   :  { %501 = vmatpush.msra.mxu3 %v1989_v61  ;;  %158 = vmatmul.f32.gmra.mxu1 %v2185_v4 }
  0x4c   :  { %484 = vmatpush.msrb.mxu2 %v2039_v16  ;;  %471 = vmatpush.msrb.mxu1 %v1883_v37 }
  0x4d   :  { %502 = vmatpush.msra.mxu3 %v2008_v2  ;;  %193 = vmatmul.f32.gmra.mxu2 %v2050_v18 }
  0x4e   :  { %485 = vmatpush.msrb.mxu2 %v2056_v20  ;;  %472 = vmatpush.msrb.mxu1 %v1895_v40 }
  0x4f   :  { %503 = vmatpush.msra.mxu3 %v2026_v10  ;;  %625 = vmatpush.msra.mxu0 %v1751_v5 }
  0x50   :  { %643 = vmatpush.msra.mxu1 %v1909_v43  ;;  %486 = vmatpush.msrb.mxu2 %v2072_v24 }
  0x51   :  { %123 = vmatmul.f32.gmra.mxu0 %v2229_v1  ;;  %504 = vmatpush.msra.mxu3 %v2044_v17 }
  0x52   :  { %487 = vmatpush.msrb.mxu2 %v2088_v29  ;;  %644 = vmatpush.msra.mxu1 %v1928_v48 }
  0x53   :  { %505 = vmatpush.msra.mxu3 %v2061_v21  ;;  %161 = vmatmul.f32.gmra.mxu1 %v2208_v14 }
  0x54   :  { %488 = vmatpush.msrb.mxu2 %v2104_v33  ;;  %645 = vmatpush.msra.mxu1 %v1946_v52 }
  0x55   :  { %506 = vmatpush.msra.mxu3 %v2077_v26  ;;  %196 = vmatmul.f32.gmra.mxu2 %v2116_v36 }
  0x56   :  { %489 = vmatpush.msrb.mxu2 %v2125_v39  ;;  %626 = vmatpush.msra.mxu0 %v1760_v7  ;;  %v81_v7 = vld [vmem:[%s3154_s3] sm:$0x7] }
  0x57   :  { %507 = vmatpush.msra.mxu3 %v2093_v30  ;;  %646 = vmatpush.msra.mxu1 %v1964_v56 }
  0x58   :  { %490 = vmatpush.msrb.mxu2 %v2142_v46  ;;  %627 = vmatpush.msra.mxu0 %v1769_v9  ;;  %v236_v9 = vld [vmem:[%s3155_s5] sm:$0x7] }
  0x59   :  { %126 = vmatmul.f32.gmra.mxu0 %v32_v3  ;;  %508 = vmatpush.msra.mxu3 %v2109_v35  ;;  %v2333_v56 = vperm.slane %v236_v9, 1 }
  0x5a   :  { %491 = vmatpush.msrb.mxu2 %v2157_v54  ;;  %647 = vmatpush.msra.mxu1 %v1984_v60 }
  0x5b   :  { %509 = vmatpush.msra.mxu3 %v2130_v42  ;;  %164 = vmatmul.f32.gmra.mxu1 %v2229_v1  ;;  %3171 = vst [vmem:[#allocation7_spill] sm:$0xff] %v2333_v56 }
  0x5c   :  { %628 = vmatpush.msra.mxu0 %v1778_v11  ;;  %492 = vmatpush.msrb.mxu2 %v2173_v62  ;;  %v83_v11 = vperm.slane %v81_v7, 0 }
  0x5d   :  { %510 = vmatpush.msra.mxu3 %v2147_v50  ;;  %648 = vmatpush.msra.mxu1 %v2003_v0 }
  0x5e   :  { %199 = vmatmul.f32.gmra.mxu2 %v2185_v4  ;;  %629 = vmatpush.msra.mxu0 %v1787_v13 }
  0x5f   :  { %511 = vmatpush.msra.mxu3 %v2162_v55  ;;  %663 = vmatpush.msra.mxu2 %v1914_v44 }
  0x60   :  { %649 = vmatpush.msra.mxu1 %v2021_v8  ;;  %630 = vmatpush.msra.mxu0 %v1796_v15  ;;  %v2320_v15 = vperm.slane %v236_v9, 0 }
  0x61   :  { %351 = vmatmul.f32.vlgmr.msrb.gmra.mxu0 %v1687_v47  ;;  %512 = vmatpush.msra.mxu3 %v2178_v63 }
  0x62   :  { %664 = vmatpush.msra.mxu2 %v1933_v49  ;;  %650 = vmatpush.msra.mxu1 %v2039_v16  ;;  %3167 = vst [vmem:[#allocation3_spill] sm:$0xff] %v2320_v15  ;;  %v2331_v49 = vperm.slane %v81_v7, 1 }
  0x63   :  { %631 = vmatpush.msra.mxu0 %v1811_v19  ;;  %167 = vmatmul.f32.gmra.mxu1 %v32_v3 }
  0x64   :  { %665 = vmatpush.msra.mxu2 %v1951_v53  ;;  %651 = vmatpush.msra.mxu1 %v2056_v20  ;;  %3170 = vst [vmem:[#allocation6_spill] sm:$0xff] %v2331_v49 }
  0x65   :  { %632 = vmatpush.msra.mxu0 %v1823_v22 }
  0x66   :  { %666 = vmatpush.msra.mxu2 %v1969_v57  ;;  %652 = vmatpush.msra.mxu1 %v2072_v24 }
  0x67   :  { %202 = vmatmul.f32.gmra.mxu2 %v2208_v14  ;;  %633 = vmatpush.msra.mxu0 %v1835_v25 }
  0x68   :  { %667 = vmatpush.msra.mxu2 %v1989_v61  ;;  %653 = vmatpush.msra.mxu1 %v2088_v29 }
  0x69   :  { %634 = vmatpush.msra.mxu0 %v1847_v28 }
  0x6a   :  { %668 = vmatpush.msra.mxu2 %v2008_v2  ;;  %654 = vmatpush.msra.mxu1 %v2104_v33 }
  0x6c   :  { %669 = vmatpush.msra.mxu2 %v2026_v10  ;;  %655 = vmatpush.msra.mxu1 %v2125_v39 }
  0x6e   :  { %670 = vmatpush.msra.mxu2 %v2044_v17  ;;  %656 = vmatpush.msra.mxu1 %v2142_v46 }
  0x6f   :  { %205 = vmatmul.f32.gmra.mxu2 %v2229_v1 }
  0x70   :  { %671 = vmatpush.msra.mxu2 %v2061_v21  ;;  %657 = vmatpush.msra.mxu1 %v2157_v54 }
  0x72   :  { %672 = vmatpush.msra.mxu2 %v2077_v26  ;;  %658 = vmatpush.msra.mxu1 %v2173_v62  ;;  %v2341_v26 = vperm.slane %v81_v7, 2 }
  0x74   :  { %673 = vmatpush.msra.mxu2 %v2093_v30  ;;  %3174 = vst [vmem:[#allocation10_spill] sm:$0xff] %v2341_v26 }
  0x76   :  { %674 = vmatpush.msra.mxu2 %v2109_v35 }
  0x77   :  { %208 = vmatmul.f32.gmra.mxu2 %v32_v3 }
  0x78   :  { %675 = vmatpush.msra.mxu2 %v2130_v42  ;;  %v2348_v42 = vperm.slane %v236_v9, 2 }
  0x7a   :  { %676 = vmatpush.msra.mxu2 %v2147_v50 }
  0x7c   :  { %677 = vmatpush.msra.mxu2 %v2162_v55 }
  0x7e   :  { %678 = vmatpush.msra.mxu2 %v2178_v63 }
  0x9e   :  { %v106_v5 = vpop.f32.mrf.mxu0 }
  0x9f   :  { %v107_v28 = vadd.f32 %v106_v5, %v83_v11 }
  0xa3   :  { %v147_v53 = vpop.f32.mrf.mxu1 }
  0xa4   :  { %v148_v57 = vadd.f32 %v147_v53, %v2331_v49 }
  0xa5   :  { %v312_v22 = vpop.f32.mrf.mxu3 }
  0xa6   :  { %v109_v13 = vpop.f32.mrf.mxu0  ;;  %v313_v25 = vadd.f32 %v312_v22, %v2320_v15 }
  0xa7   :  { %v2322_v19 = vadd.f32 %v109_v13, %v83_v11 }
  0xa8   :  { %v355_v34 = vadd.f32 %v313_v25, %v107_v28 }
  0xaa   :  { %v1576_v40 = vmul.f32 -1.442695, %v355_v34 }
  0xac   :  { %1607 = vpow2.f32 %v1576_v40 }
  0xae   :  { %v112_v31 = vpop.f32.mrf.mxu0 }
  0xaf   :  { %v2325_v37 = vadd.f32 %v112_v31, %v83_v11 }
  0xb2   :  { %v1608_v44 = vpop.eup %1607 }
  0xb3   :  { %v359_v52 = vadd.f32 1.0, %v1608_v44 }
  0xb5   :  { %1609 = vrcp.f32 %v359_v52  ;;  %v371_v38 = vand.u32 2147483648, %v359_v52  ;;  %vm365_vm1 = vweird.f32 %v359_v52  ;;  %v369_v45 = vand.u32 2147483647, %v359_v52 }
  0xb6   :  { %v115_v41 = vpop.f32.mrf.mxu0 }
  0xb7   :  { %v2327_v43 = vadd.f32 %v115_v41, %v83_v11  ;;  %v372_v55 = vor.u32 1.1754944e-38, %v371_v38  ;;  %vm370_vm3 = vcmp.eq.f32.partialorder %v369_v45, 8.507059e+37  ;;  %v401_v41 = vld [vmem:[%s3156_s1] sm:$0xff] }
  0xb9   :  { %3168 = vst [vmem:[#allocation4_spill] sm:$0xff] %v2327_v43 }
  0xbb   :  { %v1610_v10 = vpop.eup %1609 }
  0xbc   :  { %v361_v16 = vmul.f32 %v1610_v10, %v359_v52  ;;  %vm366_vm0 = vweird.f32 %v1610_v10 }
  0xbd   :  { %v188_v17 = vpop.f32.mrf.mxu2  ;;  %vm367_vm2 = vmor %vm365_vm1, %vm366_vm0 }
  0xbe   :  { %v118_v47 = vpop.f32.mrf.mxu0  ;;  %v362_v23 = vsub.f32 1.0, %v361_v16  ;;  %v189_v63 = vadd.f32 %v188_v17, %v2341_v26 }
  0xbf   :  { %v2329_v48 = vadd.f32 %v118_v47, %v83_v11 }
  0xc0   :  { %v363_v27 = vmul.f32 %v1610_v10, %v362_v23 }
  0xc1   :  { %3169 = vst [vmem:[#allocation5_spill] sm:$0xff] %v2329_v48 }
  0xc2   :  { %v364_v35 = vadd.f32 %v1610_v10, %v363_v27 }
  0xc4   :  { %v368_v46 = vsel %vm367_vm2, %v1610_v10, %v364_v35 }
  0xc5   :  { %v332_v58 = vpop.f32.mrf.mxu3  ;;  %v373_v4 = vsel %vm370_vm3, %v372_v55, %v368_v46  ;;  %v2400_v46 = vld [vmem:[%s3152_s4 + $0x48] sm:$0xff]  ;;  %v2417_v55 = vld [vmem:[%s3152_s4] sm:$0xff] }
  0xc6   :  { %v333_v60 = vadd.f32 %v332_v58, %v2333_v56  ;;  %v121_v61 = vpop.f32.mrf.mxu0  ;;  %635 = vmatpush.msra.mxu0 %v2400_v46 }
  0xc7   :  { %v2337_v2 = vadd.f32 %v121_v61, %v83_v11 }
  0xc8   :  { %v375_v0 = vadd.f32 %v333_v60, %v148_v57  ;;  %v191_v29 = vpop.f32.mrf.mxu2  ;;  %v150_v60 = vpop.f32.mrf.mxu1 }
  0xc9   :  { %3172 = vst [vmem:[#allocation8_spill] sm:$0xff] %v2337_v2  ;;  %v2344_v32 = vadd.f32 %v191_v29, %v2341_v26 }
  0xca   :  { %v1577_v8 = vmul.f32 -1.442695, %v375_v0 }
  0xcc   :  { %1611 = vpow2.f32 %v1577_v8 }
  0xce   :  { %v124_v18 = vpop.f32.mrf.mxu0 }
  0xcf   :  { %v2339_v20 = vadd.f32 %v124_v18, %v83_v11 }
  0xd0   :  { %v194_v50 = vpop.f32.mrf.mxu2  ;;  %v2379_v61 = vpop.f32.mrf.mxu1 }
  0xd1   :  { %3173 = vst [vmem:[#allocation9_spill] sm:$0xff] %v2339_v20  ;;  %v2351_v59 = vadd.f32 %v194_v50, %v2341_v26  ;;  %v2406_v50 = vld [vmem:[%s3152_s4 + $0x30] sm:$0xff]  ;;  %v2710_v20 = vld [vmem:[%s3152_s4 + $0x28] sm:$0xff] }
  0xd2   :  { %v1612_v21 = vpop.eup %1611  ;;  %636 = vmatpush.msra.mxu0 %v2406_v50 }
  0xd3   :  { %v379_v24 = vadd.f32 1.0, %v1612_v21 }
  0xd5   :  { %1613 = vrcp.f32 %v379_v24  ;;  %vm385_vm4 = vweird.f32 %v379_v24  ;;  %v391_v7 = vand.u32 2147483648, %v379_v24  ;;  %v389_v9 = vand.u32 2147483647, %v379_v24 }
  0xd6   :  { %v127_v30 = vpop.f32.mrf.mxu0 }
  0xd7   :  { %v2346_v33 = vadd.f32 %v127_v30, %v83_v11  ;;  %v392_v22 = vor.u32 1.1754944e-38, %v391_v7  ;;  %vm390_vm7 = vcmp.eq.f32.partialorder %v389_v9, 8.507059e+37  ;;  %v151_v30 = vadd.f32 %v150_v60, %v2331_v49 }
  0xd8   :  { %v197_v1 = vpop.f32.mrf.mxu2  ;;  %v2381_v0 = vpop.f32.mrf.mxu1 }
  0xd9   :  { %3175 = vst [vmem:[#allocation11_spill] sm:$0xff] %v2346_v33  ;;  %v2356_v5 = vadd.f32 %v197_v1, %v2341_v26  ;;  %v2692_v33 = vld [vmem:[%s3152_s4 + $0x38] sm:$0xff] }
  0xda   :  { %3180 = vst [vmem:[#allocation16_spill] sm:$0xff] %v2381_v0 }
  0xdb   :  { %v1614_v36 = vpop.eup %1613  ;;  %3176 = vst [vmem:[#allocation12_spill] sm:$0xff] %v2356_v5 }
  0xdc   :  { %v381_v39 = vmul.f32 %v1614_v36, %v379_v24  ;;  %vm386_vm5 = vweird.f32 %v1614_v36 }
  0xdd   :  { %vm387_vm6 = vmor %vm385_vm4, %vm386_vm5 }
  0xde   :  { %v382_v51 = vsub.f32 1.0, %v381_v39  ;;  %v352_v54 = vpop.f32.mrf.mxu0 }
  0xdf   :  { %v353_v62 = vadd.f32 %v352_v54, %v2348_v42  ;;  %v2412_v54 = vld [vmem:[%s3152_s4 + $0x18] sm:$0xff] }
  0xe0   :  { %v383_v12 = vmul.f32 %v1614_v36, %v382_v51  ;;  %v2383_v8 = vpop.f32.mrf.mxu1  ;;  %637 = vmatpush.msra.mxu0 %v2412_v54 }
  0xe1   :  { %v395_v6 = vmul.f32 %v373_v4, %v353_v62  ;;  %v200_v31 = vpop.f32.mrf.mxu2  ;;  %3181 = vst [vmem:[#allocation17_spill] sm:$0xff] %v2383_v8 }
  0xe2   :  { %v384_v3 = vadd.f32 %v1614_v36, %v383_v12  ;;  %v2359_v40 = vadd.f32 %v200_v31, %v2341_v26  ;;  %638 = vmatpush.msra.mxu0 %v2417_v55 }
  0xe3   :  { %v396_v14 = vadd.f32 %v395_v6, %v189_v63 }
  0xe4   :  { %v388_v11 = vsel %vm387_vm6, %v1614_v36, %v384_v3  ;;  %3177 = vst [vmem:[#allocation13_spill] sm:$0xff] %v2359_v40 }
  0xe5   :  { %1615 = vtanh.f32 %v396_v14  ;;  %v393_v28 = vsel %vm390_vm7, %v392_v22, %v388_v11 }
  0xe8   :  { %v2385_v10 = vpop.f32.mrf.mxu1 }
  0xe9   :  { %3182 = vst [vmem:[#allocation18_spill] sm:$0xff] %v2385_v10  ;;  %v2724_v10 = vld [vmem:[%s3152_s4 + $0x10] sm:$0xff] }
  0xea   :  { %v203_v52 = vpop.f32.mrf.mxu2 }
  0xeb   :  { %v1616_v13 = vpop.eup %1615  ;;  %v2374_v53 = vadd.f32 %v203_v52, %v2341_v26 }
  0xec   :  { %v398_v25 = vsub.f32 0.0, %v1616_v13 }
  0xed   :  { %3178 = vst [vmem:[#allocation14_spill] sm:$0xff] %v2374_v53 }
  0xee   :  { %v399_v34 = vmul.f32 %v398_v25, %v393_v28 }
  0xf0   :  { %v400_v44 = vadd.f32 %v1616_v13, %v399_v34  ;;  %v2387_v16 = vpop.f32.mrf.mxu1 }
  0xf1   :  { %3183 = vst [vmem:[#allocation19_spill] sm:$0xff] %v2387_v16  ;;  %v2716_v16 = vld [vmem:[%s3152_s4 + $0x8] sm:$0xff] }
  0xf2   :  { %v2364_v47 = vmul.f32 %v401_v41, %v400_v44  ;;  %v206_v57 = vpop.f32.mrf.mxu2 }
  0xf3   :  { %v2377_v58 = vadd.f32 %v206_v57, %v2341_v26  ;;  %v2683_v26 = vld [vmem:[%s3152_s4 + $0x58] sm:$0xff] }
  0xf4   :  { %473 = vmatmul.f32.vlgmr.msrb.gmra.mxu1 %v2364_v47  ;;  %493 = vmatmul.f32.vlgmr.msrb.gmra.mxu2 %v2364_v47  ;;  %403 = vst [vmem:[%s3157_s6] sm:$0xff] %v2364_v47 }
  0xf5   :  { %513 = vmatmul.f32.vlgmr.msra.gmra.mxu3 %v2364_v47  ;;  %3179 = vst [vmem:[#allocation15_spill] sm:$0xff] %v2377_v58  ;;  %v2705_v58 = vld [vmem:[%s3152_s4 + $0x20] sm:$0xff] }
  0xf8   :  { %v2389_v17 = vpop.f32.mrf.mxu1 }
  0xf9   :  { %3184 = vst [vmem:[#allocation20_spill] sm:$0xff] %v2389_v17  ;;  %v2697_v17 = vld [vmem:[%s3152_s4 + $0x40] sm:$0xff] }
  0xfa   :  { %v2391_v18 = vpop.f32.mrf.mxu2 }
  0xfb   :  { %3185 = vst [vmem:[#allocation21_spill] sm:$0xff] %v2391_v18  ;;  %v2662_v18 = vld [vmem:[%s3152_s4 + $0x68] sm:$0xff] }
 0x171   :  { %v474_v21 = vpop.f32.mrf.mxu1 }
 0x172   :  { %v475_v23 = vadd.f32 %v474_v21, %v2320_v15 }
 0x174   :  { %v517_v24 = vadd.f32 %v475_v23, %v2322_v19 }
 0x176   :  { %v1578_v27 = vmul.f32 -1.442695, %v517_v24 }
 0x177   :  { %v494_v29 = vpop.f32.mrf.mxu2 }
 0x178   :  { %1617 = vpow2.f32 %v1578_v27  ;;  %v495_v35 = vadd.f32 %v494_v29, %v2333_v56  ;;  %v514_v3 = vpop.f32.mrf.mxu3 }
 0x179   :  { %v515_v22 = vadd.f32 %v514_v3, %v2348_v42  ;;  %v2506_v3 = vld [vmem:[%s3152_s4 + $0x130] sm:$0xff] }
 0x17a   :  { %v537_v36 = vadd.f32 %v495_v35, %v151_v30  ;;  %v1580_v30 = vld [vmem:[%s3156_s1 + $0x8] sm:$0xff] }
 0x17c   :  { %v1579_v38 = vmul.f32 -1.442695, %v537_v36 }
 0x17e   :  { %v1618_v39 = vpop.eup %1617  ;;  %1619 = vpow2.f32 %v1579_v38 }
 0x17f   :  { %v521_v45 = vadd.f32 1.0, %v1618_v39 }
 0x181   :  { %1621 = vrcp.f32 %v521_v45  ;;  %v533_v6 = vand.u32 2147483648, %v521_v45  ;;  %v531_v14 = vand.u32 2147483647, %v521_v45  ;;  %vm527_vm9 = vweird.f32 %v521_v45 }
 0x183   :  { %v534_v11 = vor.u32 1.1754944e-38, %v533_v6  ;;  %vm532_vm11 = vcmp.eq.f32.partialorder %v531_v14, 8.507059e+37  ;;  %v2482_v6 = vld [vmem:[%s3152_s4 + $0x140] sm:$0xff] }
 0x184   :  { %v1620_v19 = vpop.eup %1619  ;;  %v2496_v14 = vld [vmem:[%s3152_s4 + $0x120] sm:$0xff] }
 0x185   :  { %v541_v51 = vadd.f32 1.0, %v1620_v19  ;;  %v2445_v19 = vld [vmem:[%s3152_s4 + $0x170] sm:$0xff] }
 0x186   :  { %809 = vmatpush.msrb.mxu0 %v2445_v19 }
 0x187   :  { %v1622_v62 = vpop.eup %1621  ;;  %1623 = vrcp.f32 %v541_v51  ;;  %v553_v52 = vand.u32 2147483648, %v541_v51  ;;  %vm547_vm13 = vweird.f32 %v541_v51  ;;  %v551_v57 = vand.u32 2147483647, %v541_v51 }
 0x188   :  { %v523_v63 = vmul.f32 %v1622_v62, %v521_v45  ;;  %vm528_vm8 = vweird.f32 %v1622_v62  ;;  %v2440_v45 = vld [vmem:[%s3152_s4 + $0x168] sm:$0xff] }
 0x189   :  { %vm529_vm10 = vmor %vm527_vm9, %vm528_vm8  ;;  %v554_v23 = vor.u32 1.1754944e-38, %v553_v52  ;;  %vm552_vm15 = vcmp.eq.f32.partialorder %v551_v57, 8.507059e+37  ;;  %3186 = vst [vmem:[#allocation22_spill] sm:$0xff] %v2440_v45  ;;  %789 = vmatpush.msrb.mxu3 %v2440_v45  ;;  %955 = vmatpush.msrb.mxu2 %v2440_v45  ;;  %v2549_v52 = vld [vmem:[%s3152_s4 + $0x100] sm:$0xff] }
 0x18a   :  { %v524_v4 = vsub.f32 1.0, %v523_v63  ;;  %v2468_v63 = vld [vmem:[%s3152_s4 + $0x160] sm:$0xff] }
 0x18c   :  { %v525_v12 = vmul.f32 %v1622_v62, %v524_v4  ;;  %v2477_v4 = vld [vmem:[%s3152_s4 + $0x138] sm:$0xff] }
 0x18d   :  { %v1624_v1 = vpop.eup %1623 }
 0x18e   :  { %v543_v7 = vmul.f32 %v1624_v1, %v541_v51  ;;  %v526_v9 = vadd.f32 %v1622_v62, %v525_v12  ;;  %vm548_vm12 = vweird.f32 %v1624_v1  ;;  %v2458_v51 = vld [vmem:[%s3152_s4 + $0x150] sm:$0xff]  ;;  %v2487_v12 = vld [vmem:[%s3152_s4 + $0x148] sm:$0xff] }
 0x18f   :  { %vm549_vm14 = vmor %vm547_vm13, %vm548_vm12  ;;  %790 = vmatpush.msrb.mxu3 %v2458_v51  ;;  %956 = vmatpush.msrb.mxu2 %v2458_v51 }
 0x190   :  { %v544_v13 = vsub.f32 1.0, %v543_v7  ;;  %v530_v25 = vsel %vm529_vm10, %v1622_v62, %v526_v9  ;;  %v2463_v62 = vld [vmem:[%s3152_s4 + $0x158] sm:$0xff] }
 0x191   :  { %v535_v28 = vsel %vm532_vm11, %v534_v11, %v530_v25  ;;  %810 = vmatpush.msrb.mxu0 %v2463_v62  ;;  %791 = vmatpush.msrb.mxu3 %v2477_v4  ;;  %v154_v11 = vadd.f32 %v2379_v61, %v2331_v49  ;;  %v2519_v25 = vld [vmem:[%s3152_s4 + $0x108] sm:$0xff]  ;;  %v2529_v61 = vld [vmem:[%s3152_s4 + $0x118] sm:$0xff] }
 0x192   :  { %v557_v31 = vmul.f32 %v535_v28, %v515_v22  ;;  %v545_v34 = vmul.f32 %v1624_v1, %v544_v13  ;;  %957 = vmatpush.msrb.mxu2 %v2477_v4  ;;  %v2524_v28 = vld [vmem:[%s3152_s4 + $0x110] sm:$0xff] }
 0x193   :  { %811 = vmatpush.msrb.mxu0 %v2482_v6  ;;  %792 = vmatpush.msrb.mxu3 %v2496_v14 }
 0x194   :  { %v558_v41 = vadd.f32 %v557_v31, %v2344_v32  ;;  %v546_v44 = vadd.f32 %v1624_v1, %v545_v34  ;;  %958 = vmatpush.msrb.mxu2 %v2496_v14 }
 0x195   :  { %793 = vmatpush.msrb.mxu3 %v2519_v25 }
 0x196   :  { %1625 = vtanh.f32 %v558_v41  ;;  %v550_v60 = vsel %vm549_vm14, %v1624_v1, %v546_v44  ;;  %v2501_v1 = vld [vmem:[%s3152_s4 + $0x128] sm:$0xff]  ;;  %v2539_v41 = vld [vmem:[%s3152_s4 + $0xf0] sm:$0xff]  ;;  %v2544_v44 = vld [vmem:[%s3152_s4 + $0xf8] sm:$0xff]  ;;  %959 = vmatpush.msrb.mxu2 %v2519_v25 }
 0x197   :  { %v555_v27 = vsel %vm552_vm15, %v554_v23, %v550_v60  ;;  %812 = vmatpush.msrb.mxu0 %v2501_v1  ;;  %794 = vmatpush.msrb.mxu3 %v2539_v41  ;;  %v2558_v60 = vld [vmem:[%s3152_s4 + $0xd8] sm:$0xff]  ;;  %v2571_v23 = vld [vmem:[%s3152_s4 + $0xe8] sm:$0xff] }
 0x198   :  { %960 = vmatpush.msrb.mxu2 %v2539_v41 }
 0x199   :  { %813 = vmatpush.msrb.mxu0 %v2524_v28  ;;  %795 = vmatpush.msrb.mxu3 %v2558_v60 }
 0x19a   :  { %961 = vmatpush.msrb.mxu2 %v2558_v60 }
 0x19b   :  { %814 = vmatpush.msrb.mxu0 %v2544_v44 }
 0x19c   :  { %v1626_v21 = vpop.eup %1625 }
 0x19d   :  { %v560_v24 = vsub.f32 %v2364_v47, %v1626_v21 }
 0x19f   :  { %v561_v29 = vmul.f32 %v560_v24, %v555_v27  ;;  %v2577_v24 = vld [vmem:[%s3152_s4 + $0xc0] sm:$0xff]  ;;  %v2582_v27 = vld [vmem:[%s3152_s4 + $0xc8] sm:$0xff] }
 0x1a0   :  { %796 = vmatpush.msrb.mxu3 %v2577_v24  ;;  %962 = vmatpush.msrb.mxu2 %v2577_v24 }
 0x1a1   :  { %v562_v32 = vadd.f32 %v1626_v21, %v561_v29  ;;  %v2563_v21 = vld [vmem:[%s3152_s4 + $0xe0] sm:$0xff]  ;;  %v2587_v29 = vld [vmem:[%s3152_s4 + $0xd0] sm:$0xff] }
 0x1a2   :  { %815 = vmatpush.msrb.mxu0 %v2563_v21 }
 0x1a3   :  { %v565_v35 = vmul.f32 %v1580_v30, %v562_v32  ;;  %v568_v36 = vsub.f32 %v562_v32, %v2364_v47  ;;  %v2601_v32 = vld [vmem:[%s3152_s4 + $0xb0] sm:$0xff] }
 0x1a4   :  { %816 = vmatpush.msrb.mxu0 %v2582_v27 }
 0x1a5   :  { %1581 = vst [vmem:[%s3157_s6 + $0x8] sm:$0xff] %v565_v35  ;;  %v569_v38 = vmul.f32 %v1580_v30, %v568_v36  ;;  %v2596_v30 = vld [vmem:[%s3152_s4 + $0xa8] sm:$0xff]  ;;  %v2606_v35 = vld [vmem:[%s3152_s4 + $0xb8] sm:$0xff]  ;;  %v2615_v36 = vld [vmem:[%s3152_s4 + $0x90] sm:$0xff] }
 0x1a6   :  { %797 = vmatpush.msrb.mxu3 %v2596_v30  ;;  %817 = vmatpush.msrb.mxu0 %v2601_v32 }
 0x1a7   :  { %v2432_v39 = vadd.f32 %v569_v38, %v2364_v47  ;;  %v2450_v47 = vld [vmem:[%s3152_s4 + $0x178] sm:$0xff]  ;;  %963 = vmatpush.msrb.mxu2 %v2596_v30 }
 0x1a8   :  { %829 = vmatpush.msrb.mxu1 %v2450_v47  ;;  %v2620_v38 = vld [vmem:[%s3152_s4 + $0x98] sm:$0xff]  ;;  %798 = vmatpush.msrb.mxu3 %v2615_v36 }
 0x1a9   :  { %639 = vmatmul.f32.vlgmr.msra.gmra.mxu0 %v2432_v39  ;;  %659 = vmatmul.f32.vlgmr.msra.gmra.mxu1 %v2432_v39 }
 0x1aa   :  { %679 = vmatmul.f32.vlgmr.msra.gmra.mxu2 %v2432_v39  ;;  %830 = vmatpush.msrb.mxu1 %v2468_v63 }
 0x1ab   :  { %818 = vmatpush.msrb.mxu0 %v2620_v38  ;;  %964 = vmatpush.msrb.mxu2 %v2615_v36 }
 0x1ac   :  { %831 = vmatpush.msrb.mxu1 %v2487_v12 }
 0x1ae   :  { %832 = vmatpush.msrb.mxu1 %v2506_v3 }
 0x1b0   :  { %833 = vmatpush.msrb.mxu1 %v2529_v61 }
 0x1b2   :  { %834 = vmatpush.msrb.mxu1 %v2549_v52 }
 0x1b4   :  { %835 = vmatpush.msrb.mxu1 %v2571_v23 }
 0x1b6   :  { %836 = vmatpush.msrb.mxu1 %v2587_v29 }
 0x1b8   :  { %837 = vmatpush.msrb.mxu1 %v2606_v35 }
 0x226   :  { %v640_v7 = vpop.f32.mrf.mxu0  ;;  %v660_v9 = vpop.f32.mrf.mxu1 }
 0x227   :  { %v641_v13 = vadd.f32 %v640_v7, %v2320_v15  ;;  %v661_v22 = vadd.f32 %v660_v9, %v2333_v56  ;;  %v2625_v7 = vld [vmem:[%s3152_s4 + $0xa0] sm:$0xff] }
 0x228   :  { %838 = vmatpush.msrb.mxu1 %v2625_v7 }
 0x229   :  { %v683_v31 = vadd.f32 %v641_v13, %v2325_v37  ;;  %v703_v34 = vadd.f32 %v661_v22, %v154_v11  ;;  %v2634_v11 = vld [vmem:[%s3152_s4 + $0x78] sm:$0xff]  ;;  %v2639_v13 = vld [vmem:[%s3152_s4 + $0x80] sm:$0xff]  ;;  %v2644_v22 = vld [vmem:[%s3152_s4 + $0x88] sm:$0xff] }
 0x22a   :  { %799 = vmatpush.msrb.mxu3 %v2634_v11  ;;  %819 = vmatpush.msrb.mxu0 %v2639_v13 }
 0x22b   :  { %v1582_v37 = vmul.f32 -1.442695, %v683_v31  ;;  %v1583_v57 = vmul.f32 -1.442695, %v703_v34  ;;  %839 = vmatpush.msrb.mxu1 %v2644_v22  ;;  %965 = vmatpush.msrb.mxu2 %v2634_v11 }
 0x22c   :  { %820 = vmatpush.msrb.mxu0 %v2662_v18 }
 0x22d   :  { %1627 = vpow2.f32 %v1582_v37 }
 0x22e   :  { %1629 = vpow2.f32 %v1583_v57  ;;  %v2657_v57 = vld [vmem:[%s3152_s4 + $0x60] sm:$0xff] }
 0x22f   :  { %800 = vmatpush.msrb.mxu3 %v2657_v57  ;;  %966 = vmatpush.msrb.mxu2 %v2657_v57 }
 0x231   :  { %801 = vmatpush.msrb.mxu3 %v2400_v46  ;;  %967 = vmatpush.msrb.mxu2 %v2400_v46 }
 0x233   :  { %v1628_v9 = vpop.eup %1627  ;;  %802 = vmatpush.msrb.mxu3 %v2406_v50  ;;  %968 = vmatpush.msrb.mxu2 %v2406_v50 }
 0x234   :  { %v1630_v31 = vpop.eup %1629  ;;  %v2647_v34 = vadd.f32 1.0, %v1628_v9  ;;  %v2667_v9 = vld [vmem:[%s3152_s4 + $0x70] sm:$0xff] }
 0x235   :  { %v2651_v37 = vadd.f32 1.0, %v1630_v31  ;;  %840 = vmatpush.msrb.mxu1 %v2667_v9  ;;  %v2678_v31 = vld [vmem:[%s3152_s4 + $0x50] sm:$0xff]  ;;  %803 = vmatpush.msrb.mxu3 %v2412_v54 }
 0x236   :  { %1631 = vrcp.f32 %v2647_v34  ;;  %821 = vmatpush.msrb.mxu0 %v2678_v31  ;;  %969 = vmatpush.msrb.mxu2 %v2412_v54  ;;  %v699_v5 = vand.u32 2147483648, %v2647_v34  ;;  %v697_v15 = vand.u32 2147483647, %v2647_v34  ;;  %vm693_vm1 = vweird.f32 %v2647_v34 }
 0x237   :  { %1633 = vrcp.f32 %v2651_v37  ;;  %841 = vmatpush.msrb.mxu1 %v2683_v26  ;;  %804 = vmatpush.msrb.mxu3 %v2417_v55  ;;  %vm713_vm5 = vweird.f32 %v2651_v37 }
 0x238   :  { %822 = vmatpush.msrb.mxu0 %v2692_v33  ;;  %970 = vmatpush.msrb.mxu2 %v2417_v55  ;;  %v700_v0 = vor.u32 1.1754944e-38, %v699_v5  ;;  %vm698_vm3 = vcmp.eq.f32.partialorder %v697_v15, 8.507059e+37 }
 0x239   :  { %842 = vmatpush.msrb.mxu1 %v2697_v17  ;;  %975 = vmatpush.msra.mxu3 %v2445_v19 }
 0x23a   :  { %823 = vmatpush.msrb.mxu0 %v2705_v58  ;;  %1141 = vmatpush.msra.mxu2 %v2445_v19 }
 0x23b   :  { %843 = vmatpush.msrb.mxu1 %v2710_v20  ;;  %976 = vmatpush.msra.mxu3 %v2463_v62 }
 0x23c   :  { %v1632_v53 = vpop.eup %1631  ;;  %824 = vmatpush.msrb.mxu0 %v2716_v16  ;;  %1142 = vmatpush.msra.mxu2 %v2463_v62 }
 0x23d   :  { %v2726_v2 = vpop.eup %1633  ;;  %v689_v40 = vmul.f32 %v1632_v53, %v2647_v34  ;;  %844 = vmatpush.msrb.mxu1 %v2724_v10  ;;  %vm694_vm0 = vweird.f32 %v1632_v53  ;;  %977 = vmatpush.msra.mxu3 %v2482_v6 }
 0x23e   :  { %v709_v8 = vmul.f32 %v2726_v2, %v2651_v37  ;;  %995 = vmatpush.msra.mxu0 %v2450_v47  ;;  %vm695_vm2 = vmor %vm693_vm1, %vm694_vm0  ;;  %1143 = vmatpush.msra.mxu2 %v2482_v6  ;;  %vm714_vm4 = vweird.f32 %v2726_v2 }
 0x23f   :  { %v690_v48 = vsub.f32 1.0, %v689_v40  ;;  %1121 = vmatpush.msra.mxu1 %v2440_v45  ;;  %v680_v40 = vpop.f32.mrf.mxu2  ;;  %978 = vmatpush.msra.mxu3 %v2501_v1  ;;  %vm715_vm6 = vmor %vm713_vm5, %vm714_vm4 }
 0x240   :  { %996 = vmatpush.msra.mxu0 %v2468_v63  ;;  %v681_v49 = vadd.f32 %v680_v40, %v2348_v42  ;;  %1144 = vmatpush.msra.mxu2 %v2501_v1  ;;  %v1584_v40 = vld [vmem:[%s3156_s1 + $0x10] sm:$0xff] }
 0x241   :  { %v691_v43 = vmul.f32 %v1632_v53, %v690_v48  ;;  %1122 = vmatpush.msra.mxu1 %v2458_v51  ;;  %v710_v48 = vsub.f32 1.0, %v709_v8  ;;  %979 = vmatpush.msra.mxu3 %v2524_v28 }
 0x242   :  { %997 = vmatpush.msra.mxu0 %v2487_v12  ;;  %1145 = vmatpush.msra.mxu2 %v2524_v28 }
 0x243   :  { %v692_v56 = vadd.f32 %v1632_v53, %v691_v43  ;;  %1123 = vmatpush.msra.mxu1 %v2477_v4  ;;  %v711_v5 = vmul.f32 %v2726_v2, %v710_v48  ;;  %980 = vmatpush.msra.mxu3 %v2544_v44 }
 0x244   :  { %998 = vmatpush.msra.mxu0 %v2506_v3  ;;  %1146 = vmatpush.msra.mxu2 %v2544_v44 }
 0x245   :  { %v696_v45 = vsel %vm695_vm2, %v1632_v53, %v692_v56  ;;  %1124 = vmatpush.msra.mxu1 %v2496_v14  ;;  %981 = vmatpush.msra.mxu3 %v2563_v21  ;;  %v719_v56 = vand.u32 2147483648, %v2651_v37 }
 0x246   :  { %v701_v43 = vsel %vm698_vm3, %v700_v0, %v696_v45  ;;  %999 = vmatpush.msra.mxu0 %v2529_v61  ;;  %1147 = vmatpush.msra.mxu2 %v2563_v21 }
 0x247   :  { %v723_v8 = vmul.f32 %v701_v43, %v681_v49  ;;  %1125 = vmatpush.msra.mxu1 %v2519_v25  ;;  %v712_v49 = vadd.f32 %v2726_v2, %v711_v5  ;;  %982 = vmatpush.msra.mxu3 %v2582_v27  ;;  %v720_v45 = vor.u32 1.1754944e-38, %v719_v56 }
 0x248   :  { %1000 = vmatpush.msra.mxu0 %v2549_v52  ;;  %1148 = vmatpush.msra.mxu2 %v2582_v27 }
 0x249   :  { %v724_v15 = vadd.f32 %v723_v8, %v2351_v59  ;;  %1126 = vmatpush.msra.mxu1 %v2539_v41  ;;  %v717_v59 = vand.u32 2147483647, %v2651_v37  ;;  %983 = vmatpush.msra.mxu3 %v2601_v32  ;;  %v716_v53 = vsel %vm715_vm6, %v2726_v2, %v712_v49 }
 0x24a   :  { %1001 = vmatpush.msra.mxu0 %v2571_v23  ;;  %1149 = vmatpush.msra.mxu2 %v2601_v32 }
 0x24b   :  { %1635 = vtanh.f32 %v724_v15  ;;  %1127 = vmatpush.msra.mxu1 %v2558_v60  ;;  %984 = vmatpush.msra.mxu3 %v2620_v38  ;;  %vm718_vm7 = vcmp.eq.f32.partialorder %v717_v59, 8.507059e+37 }
 0x24c   :  { %1002 = vmatpush.msra.mxu0 %v2587_v29  ;;  %v721_v37 = vsel %vm718_vm7, %v720_v45, %v716_v53  ;;  %1150 = vmatpush.msra.mxu2 %v2620_v38 }
 0x24d   :  { %1128 = vmatpush.msra.mxu1 %v2577_v24  ;;  %985 = vmatpush.msra.mxu3 %v2639_v13 }
 0x24e   :  { %1003 = vmatpush.msra.mxu0 %v2606_v35  ;;  %1151 = vmatpush.msra.mxu2 %v2639_v13 }
 0x24f   :  { %1129 = vmatpush.msra.mxu1 %v2596_v30  ;;  %986 = vmatpush.msra.mxu3 %v2662_v18 }
 0x250   :  { %1004 = vmatpush.msra.mxu0 %v2625_v7  ;;  %1152 = vmatpush.msra.mxu2 %v2662_v18 }
 0x251   :  { %v1636_v0 = vpop.eup %1635  ;;  %1130 = vmatpush.msra.mxu1 %v2615_v36  ;;  %987 = vmatpush.msra.mxu3 %v2678_v31 }
 0x252   :  { %v726_v34 = vsub.f32 %v2432_v39, %v1636_v0  ;;  %1005 = vmatpush.msra.mxu0 %v2644_v22  ;;  %1153 = vmatpush.msra.mxu2 %v2678_v31 }
 0x253   :  { %1131 = vmatpush.msra.mxu1 %v2634_v11  ;;  %988 = vmatpush.msra.mxu3 %v2692_v33 }
 0x254   :  { %v727_v2 = vmul.f32 %v726_v34, %v721_v37  ;;  %1006 = vmatpush.msra.mxu0 %v2667_v9  ;;  %1154 = vmatpush.msra.mxu2 %v2692_v33 }
 0x255   :  { %1132 = vmatpush.msra.mxu1 %v2657_v57  ;;  %989 = vmatpush.msra.mxu3 %v2705_v58 }
 0x256   :  { %v728_v48 = vadd.f32 %v1636_v0, %v727_v2  ;;  %1007 = vmatpush.msra.mxu0 %v2683_v26  ;;  %1155 = vmatpush.msra.mxu2 %v2705_v58  ;;  %v3193_v0 = vld [vmem:[#allocation12_spill] sm:$0xff] }
 0x257   :  { %1133 = vmatpush.msra.mxu1 %v2400_v46  ;;  %990 = vmatpush.msra.mxu3 %v2716_v16  ;;  %v3187_v46 = vld [vmem:[#allocation22_spill] sm:$0xff] }
 0x258   :  { %v731_v43 = vmul.f32 %v1584_v40, %v728_v48  ;;  %v734_v8 = vsub.f32 %v728_v48, %v2432_v39  ;;  %1008 = vmatpush.msra.mxu0 %v2697_v17  ;;  %1156 = vmatpush.msra.mxu2 %v2716_v16 }
 0x259   :  { %1134 = vmatpush.msra.mxu1 %v2406_v50 }
 0x25a   :  { %1585 = vst [vmem:[%s3157_s6 + $0x10] sm:$0xff] %v731_v43  ;;  %v735_v5 = vmul.f32 %v1584_v40, %v734_v8  ;;  %1009 = vmatpush.msra.mxu0 %v2710_v20 }
 0x25b   :  { %1135 = vmatpush.msra.mxu1 %v2412_v54  ;;  %v3188_v54 = vld [vmem:[#allocation6_spill] sm:$0xff] }
 0x25c   :  { %v2814_v15 = vadd.f32 %v735_v5, %v2432_v39  ;;  %1010 = vmatpush.msra.mxu0 %v2724_v10 }
 0x25d   :  { %1136 = vmatpush.msra.mxu1 %v2417_v55  ;;  %v3189_v55 = vld [vmem:[#allocation16_spill] sm:$0xff] }
 0x25e   :  { %805 = vmatmul.f32.vlgmr.msrb.gmra.mxu3 %v2814_v15  ;;  %825 = vmatmul.f32.vlgmr.msrb.gmra.mxu0 %v2814_v15  ;;  %v157_v39 = vadd.f32 %v3189_v55, %v3188_v54 }
 0x25f   :  { %845 = vmatmul.f32.vlgmr.msrb.gmra.mxu1 %v2814_v15  ;;  %1161 = vmatpush.msrb.mxu3 %v2450_v47 }
 0x260   :  { %1287 = vmatpush.msrb.mxu0 %v3187_v46  ;;  %1307 = vmatpush.msrb.mxu1 %v2445_v19  ;;  %v3190_v19 = vld [vmem:[#allocation7_spill] sm:$0xff] }
 0x261   :  { %1162 = vmatpush.msrb.mxu3 %v2468_v63 }
 0x262   :  { %1288 = vmatpush.msrb.mxu0 %v2458_v51  ;;  %1308 = vmatpush.msrb.mxu1 %v2463_v62 }
 0x263   :  { %1163 = vmatpush.msrb.mxu3 %v2487_v12 }
 0x264   :  { %1289 = vmatpush.msrb.mxu0 %v2477_v4  ;;  %1309 = vmatpush.msrb.mxu1 %v2482_v6  ;;  %v3191_v6 = vld [vmem:[#allocation3_spill] sm:$0xff] }
 0x265   :  { %1164 = vmatpush.msrb.mxu3 %v2506_v3 }
 0x266   :  { %1290 = vmatpush.msrb.mxu0 %v2496_v14  ;;  %1310 = vmatpush.msrb.mxu1 %v2501_v1  ;;  %v3192_v1 = vld [vmem:[#allocation4_spill] sm:$0xff] }
 0x267   :  { %1165 = vmatpush.msrb.mxu3 %v2529_v61 }
 0x268   :  { %1291 = vmatpush.msrb.mxu0 %v2519_v25  ;;  %1311 = vmatpush.msrb.mxu1 %v2524_v28 }
 0x269   :  { %1166 = vmatpush.msrb.mxu3 %v2549_v52 }
 0x26a   :  { %1292 = vmatpush.msrb.mxu0 %v2539_v41  ;;  %1312 = vmatpush.msrb.mxu1 %v2544_v44 }
 0x26b   :  { %1167 = vmatpush.msrb.mxu3 %v2571_v23 }
 0x26c   :  { %1293 = vmatpush.msrb.mxu0 %v2558_v60  ;;  %1313 = vmatpush.msrb.mxu1 %v2563_v21 }
 0x26d   :  { %1168 = vmatpush.msrb.mxu3 %v2587_v29 }
 0x26e   :  { %1294 = vmatpush.msrb.mxu0 %v2577_v24  ;;  %1314 = vmatpush.msrb.mxu1 %v2582_v27 }
 0x26f   :  { %1169 = vmatpush.msrb.mxu3 %v2606_v35 }
 0x270   :  { %1295 = vmatpush.msrb.mxu0 %v2596_v30  ;;  %1315 = vmatpush.msrb.mxu1 %v2601_v32 }
 0x271   :  { %1170 = vmatpush.msrb.mxu3 %v2625_v7 }
 0x272   :  { %1296 = vmatpush.msrb.mxu0 %v2615_v36  ;;  %1316 = vmatpush.msrb.mxu1 %v2620_v38 }
 0x273   :  { %1171 = vmatpush.msrb.mxu3 %v2644_v22 }
 0x274   :  { %1297 = vmatpush.msrb.mxu0 %v2634_v11  ;;  %1317 = vmatpush.msrb.mxu1 %v2639_v13 }
 0x275   :  { %1172 = vmatpush.msrb.mxu3 %v2667_v9 }
 0x276   :  { %1298 = vmatpush.msrb.mxu0 %v2657_v57  ;;  %1318 = vmatpush.msrb.mxu1 %v2662_v18 }
 0x277   :  { %1173 = vmatpush.msrb.mxu3 %v2683_v26 }
 0x278   :  { %1319 = vmatpush.msrb.mxu1 %v2678_v31 }
 0x279   :  { %1174 = vmatpush.msrb.mxu3 %v2697_v17 }
 0x27a   :  { %1320 = vmatpush.msrb.mxu1 %v2692_v33 }
 0x27b   :  { %1175 = vmatpush.msrb.mxu3 %v2710_v20 }
 0x27c   :  { %1321 = vmatpush.msrb.mxu1 %v2705_v58 }
 0x27d   :  { %1176 = vmatpush.msrb.mxu3 %v2724_v10 }
 0x27e   :  { %1322 = vmatpush.msrb.mxu1 %v2716_v16 }
 0x2db   :  { %v826_v50 = vpop.f32.mrf.mxu0 }
 0x2dc   :  { %v827_v18 = vadd.f32 %v826_v50, %v3190_v19  ;;  %v846_v38 = vpop.f32.mrf.mxu1  ;;  %v1588_v50 = vld [vmem:[%s3156_s1 + $0x18] sm:$0xff] }
 0x2dd   :  { %v847_v31 = vadd.f32 %v846_v38, %v2348_v42 }
 0x2de   :  { %v869_v51 = vadd.f32 %v827_v18, %v157_v39 }
 0x2e0   :  { %v1587_v62 = vmul.f32 -1.442695, %v869_v51 }
 0x2e1   :  { %v806_v4 = vpop.f32.mrf.mxu3 }
 0x2e2   :  { %v807_v14 = vadd.f32 %v806_v4, %v3191_v6  ;;  %1637 = vpow2.f32 %v1587_v62 }
 0x2e4   :  { %v849_v25 = vadd.f32 %v807_v14, %v3192_v1 }
 0x2e6   :  { %v1586_v33 = vmul.f32 -1.442695, %v849_v25 }
 0x2e8   :  { %1639 = vpow2.f32 %v1586_v33  ;;  %v1638_v28 = vpop.eup %1637 }
 0x2e9   :  { %v873_v41 = vadd.f32 1.0, %v1638_v28 }
 0x2eb   :  { %v885_v37 = vand.u32 2147483648, %v873_v41  ;;  %vm879_vm13 = vweird.f32 %v873_v41  ;;  %v883_v2 = vand.u32 2147483647, %v873_v41 }
 0x2ed   :  { %v886_v43 = vor.u32 1.1754944e-38, %v885_v37  ;;  %vm884_vm15 = vcmp.eq.f32.partialorder %v883_v2, 8.507059e+37 }
 0x2ee   :  { %v1640_v58 = vpop.eup %1639 }
 0x2ef   :  { %v853_v16 = vadd.f32 1.0, %v1640_v58 }
 0x2f1   :  { %1641 = vrcp.f32 %v853_v16  ;;  %v865_v30 = vand.u32 2147483648, %v853_v16  ;;  %v863_v36 = vand.u32 2147483647, %v853_v16  ;;  %vm859_vm9 = vweird.f32 %v853_v16 }
 0x2f2   :  { %1643 = vrcp.f32 %v873_v41 }
 0x2f3   :  { %v866_v57 = vor.u32 1.1754944e-38, %v865_v30  ;;  %vm864_vm11 = vcmp.eq.f32.partialorder %v863_v36, 8.507059e+37 }
 0x2f7   :  { %v1642_v44 = vpop.eup %1641 }
 0x2f8   :  { %v1644_v60 = vpop.eup %1643  ;;  %v855_v21 = vmul.f32 %v1642_v44, %v853_v16  ;;  %vm860_vm8 = vweird.f32 %v1642_v44 }
 0x2f9   :  { %v875_v27 = vmul.f32 %v1644_v60, %v873_v41  ;;  %vm861_vm10 = vmor %vm859_vm9, %vm860_vm8  ;;  %vm880_vm12 = vweird.f32 %v1644_v60 }
 0x2fa   :  { %v856_v24 = vsub.f32 1.0, %v855_v21  ;;  %vm881_vm14 = vmor %vm879_vm13, %vm880_vm12 }
 0x2fb   :  { %v876_v13 = vsub.f32 1.0, %v875_v27 }
 0x2fc   :  { %v857_v32 = vmul.f32 %v1642_v44, %v856_v24 }
 0x2fd   :  { %v877_v53 = vmul.f32 %v1644_v60, %v876_v13 }
 0x2fe   :  { %v858_v11 = vadd.f32 %v1642_v44, %v857_v32  ;;  %v3196_v32 = vld [vmem:[#allocation13_spill] sm:$0xff] }
 0x2ff   :  { %v878_v34 = vadd.f32 %v1644_v60, %v877_v53 }
 0x300   :  { %v862_v49 = vsel %vm861_vm10, %v1642_v44, %v858_v11 }
 0x301   :  { %v867_v56 = vsel %vm864_vm11, %v866_v57, %v862_v49  ;;  %v882_v40 = vsel %vm881_vm14, %v1644_v60, %v878_v34 }
 0x302   :  { %v889_v59 = vmul.f32 %v867_v56, %v847_v31  ;;  %v887_v5 = vsel %vm884_vm15, %v886_v43, %v882_v40 }
 0x304   :  { %v890_v45 = vadd.f32 %v889_v59, %v3193_v0  ;;  %v1592_v0 = vld [vmem:[%s3156_s1 + $0x20] sm:$0xff] }
 0x306   :  { %1645 = vtanh.f32 %v890_v45 }
 0x30c   :  { %v1646_v48 = vpop.eup %1645 }
 0x30d   :  { %v892_v8 = vsub.f32 %v2814_v15, %v1646_v48 }
 0x30f   :  { %v893_v46 = vmul.f32 %v892_v8, %v887_v5  ;;  %v3197_v8 = vld [vmem:[#allocation8_spill] sm:$0xff] }
 0x311   :  { %v894_v55 = vadd.f32 %v1646_v48, %v893_v46 }
 0x313   :  { %v897_v39 = vmul.f32 %v1588_v50, %v894_v55  ;;  %v900_v18 = vsub.f32 %v894_v55, %v2814_v15  ;;  %v3198_v55 = vld [vmem:[#allocation18_spill] sm:$0xff] }
 0x315   :  { %1589 = vst [vmem:[%s3157_s6 + $0x18] sm:$0xff] %v897_v39  ;;  %v901_v51 = vmul.f32 %v1588_v50, %v900_v18  ;;  %v163_v39 = vadd.f32 %v3198_v55, %v3188_v54 }
 0x317   :  { %v2887_v62 = vadd.f32 %v901_v51, %v2814_v15 }
 0x319   :  { %971 = vmatmul.f32.vlgmr.msrb.gmra.mxu2 %v2887_v62  ;;  %991 = vmatmul.f32.vlgmr.msra.gmra.mxu3 %v2887_v62 }
 0x31a   :  { %1011 = vmatmul.f32.vlgmr.msra.gmra.mxu0 %v2887_v62  ;;  %1327 = vmatpush.msrb.mxu2 %v2450_v47 }
 0x31c   :  { %1328 = vmatpush.msrb.mxu2 %v2468_v63 }
 0x31e   :  { %1329 = vmatpush.msrb.mxu2 %v2487_v12  ;;  %v3194_v12 = vld [vmem:[#allocation17_spill] sm:$0xff] }
 0x320   :  { %1330 = vmatpush.msrb.mxu2 %v2506_v3  ;;  %v160_v3 = vadd.f32 %v3194_v12, %v3188_v54  ;;  %v2937_v12 = vld [vmem:[%s3152_s4 + $0x48] sm:$0xff] }
 0x321   :  { %1299 = vmatpush.msrb.mxu0 %v2937_v12 }
 0x322   :  { %1331 = vmatpush.msrb.mxu2 %v2529_v61 }
 0x324   :  { %1332 = vmatpush.msrb.mxu2 %v2549_v52 }
 0x326   :  { %1333 = vmatpush.msrb.mxu2 %v2571_v23  ;;  %v3195_v23 = vld [vmem:[#allocation5_spill] sm:$0xff] }
 0x328   :  { %1334 = vmatpush.msrb.mxu2 %v2587_v29 }
 0x32a   :  { %1335 = vmatpush.msrb.mxu2 %v2606_v35 }
 0x32c   :  { %1336 = vmatpush.msrb.mxu2 %v2625_v7 }
 0x32e   :  { %1337 = vmatpush.msrb.mxu2 %v2644_v22 }
 0x330   :  { %1338 = vmatpush.msrb.mxu2 %v2667_v9 }
 0x332   :  { %1339 = vmatpush.msrb.mxu2 %v2683_v26 }
 0x334   :  { %1340 = vmatpush.msrb.mxu2 %v2697_v17 }
 0x336   :  { %1341 = vmatpush.msrb.mxu2 %v2710_v20 }
 0x338   :  { %1342 = vmatpush.msrb.mxu2 %v2724_v10 }
 0x397   :  { %v1012_v58 = vpop.f32.mrf.mxu0 }
 0x398   :  { %v1013_v60 = vadd.f32 %v1012_v58, %v2348_v42 }
 0x39c   :  { %v972_v47 = vpop.f32.mrf.mxu2  ;;  %v992_v63 = vpop.f32.mrf.mxu3 }
 0x39d   :  { %v973_v61 = vadd.f32 %v972_v47, %v3191_v6  ;;  %v993_v52 = vadd.f32 %v992_v63, %v3190_v19 }
 0x39f   :  { %v1015_v29 = vadd.f32 %v973_v61, %v3195_v23  ;;  %v1035_v35 = vadd.f32 %v993_v52, %v160_v3  ;;  %v2943_v61 = vld [vmem:[%s3152_s4 + $0x30] sm:$0xff]  ;;  %v2949_v23 = vld [vmem:[%s3152_s4 + $0x18] sm:$0xff] }
 0x3a0   :  { %1300 = vmatpush.msrb.mxu0 %v2943_v61 }
 0x3a1   :  { %v1590_v7 = vmul.f32 -1.442695, %v1015_v29  ;;  %v1591_v26 = vmul.f32 -1.442695, %v1035_v35  ;;  %v2954_v29 = vld [vmem:[%s3152_s4] sm:$0xff] }
 0x3a2   :  { %1301 = vmatpush.msrb.mxu0 %v2949_v23 }
 0x3a3   :  { %1647 = vpow2.f32 %v1590_v7 }
 0x3a4   :  { %1649 = vpow2.f32 %v1591_v26  ;;  %1302 = vmatpush.msrb.mxu0 %v2954_v29 }
 0x3a9   :  { %v1648_v17 = vpop.eup %1647 }
 0x3aa   :  { %v1650_v20 = vpop.eup %1649  ;;  %v1019_v22 = vadd.f32 1.0, %v1648_v17 }
 0x3ab   :  { %v1039_v10 = vadd.f32 1.0, %v1650_v20 }
 0x3ac   :  { %1651 = vrcp.f32 %v1019_v22  ;;  %v1031_v1 = vand.u32 2147483648, %v1019_v22  ;;  %v1029_v28 = vand.u32 2147483647, %v1019_v22  ;;  %vm1025_vm1 = vweird.f32 %v1019_v22 }
 0x3ad   :  { %1653 = vrcp.f32 %v1039_v10  ;;  %v1051_v11 = vand.u32 2147483648, %v1039_v10  ;;  %vm1045_vm5 = vweird.f32 %v1039_v10  ;;  %v1049_v13 = vand.u32 2147483647, %v1039_v10 }
 0x3ae   :  { %v1032_v16 = vor.u32 1.1754944e-38, %v1031_v1  ;;  %vm1030_vm3 = vcmp.eq.f32.partialorder %v1029_v28, 8.507059e+37 }
 0x3af   :  { %v1052_v49 = vor.u32 1.1754944e-38, %v1051_v11  ;;  %vm1050_vm7 = vcmp.eq.f32.partialorder %v1049_v13, 8.507059e+37  ;;  %v1596_v13 = vld [vmem:[%s3156_s1 + $0x28] sm:$0xff] }
 0x3b2   :  { %v1652_v9 = vpop.eup %1651 }
 0x3b3   :  { %v1654_v15 = vpop.eup %1653  ;;  %v1021_v4 = vmul.f32 %v1652_v9, %v1019_v22  ;;  %vm1026_vm0 = vweird.f32 %v1652_v9 }
 0x3b4   :  { %v1041_v25 = vmul.f32 %v1654_v15, %v1039_v10  ;;  %vm1027_vm2 = vmor %vm1025_vm1, %vm1026_vm0  ;;  %vm1046_vm4 = vweird.f32 %v1654_v15 }
 0x3b5   :  { %v1022_v14 = vsub.f32 1.0, %v1021_v4  ;;  %vm1047_vm6 = vmor %vm1045_vm5, %vm1046_vm4 }
 0x3b6   :  { %v1042_v44 = vsub.f32 1.0, %v1041_v25 }
 0x3b7   :  { %v1023_v33 = vmul.f32 %v1652_v9, %v1022_v14 }
 0x3b8   :  { %v1043_v30 = vmul.f32 %v1654_v15, %v1042_v44 }
 0x3b9   :  { %v1024_v41 = vadd.f32 %v1652_v9, %v1023_v33 }
 0x3ba   :  { %v1044_v38 = vadd.f32 %v1654_v15, %v1043_v30 }
 0x3bb   :  { %v1028_v21 = vsel %vm1027_vm2, %v1652_v9, %v1024_v41 }
 0x3bc   :  { %v1033_v24 = vsel %vm1030_vm3, %v1032_v16, %v1028_v21  ;;  %v1048_v57 = vsel %vm1047_vm6, %v1654_v15, %v1044_v38  ;;  %v3199_v16 = vld [vmem:[#allocation14_spill] sm:$0xff] }
 0x3bd   :  { %v1055_v27 = vmul.f32 %v1033_v24, %v1013_v60  ;;  %v1053_v59 = vsel %vm1050_vm7, %v1052_v49, %v1048_v57 }
 0x3bf   :  { %v1056_v36 = vadd.f32 %v1055_v27, %v3196_v32 }
 0x3c1   :  { %1655 = vtanh.f32 %v1056_v36 }
 0x3c7   :  { %v1656_v31 = vpop.eup %1655 }
 0x3c8   :  { %v1058_v56 = vsub.f32 %v2887_v62, %v1656_v31 }
 0x3ca   :  { %v1059_v53 = vmul.f32 %v1058_v56, %v1053_v59 }
 0x3cc   :  { %v1060_v45 = vadd.f32 %v1656_v31, %v1059_v53  ;;  %v1450_v53 = vld [vmem:[%s3152_s4 + $0x168] sm:$0xff] }
 0x3cd   :  { %1453 = vmatpush.msra.mxu3 %v1450_v53  ;;  %v1409_v53 = vld [vmem:[%s3152_s4 + $0x20] sm:$0xff] }
 0x3ce   :  { %v1063_v34 = vmul.f32 %v1592_v0, %v1060_v45  ;;  %v1066_v37 = vsub.f32 %v1060_v45, %v2887_v62  ;;  %v1452_v45 = vld [vmem:[%s3152_s4 + $0x178] sm:$0xff] }
 0x3d0   :  { %1593 = vst [vmem:[%s3157_s6 + $0x20] sm:$0xff] %v1063_v34  ;;  %v1067_v2 = vmul.f32 %v1592_v0, %v1066_v37  ;;  %v1451_v0 = vld [vmem:[%s3152_s4 + $0x170] sm:$0xff]  ;;  %v1448_v37 = vld [vmem:[%s3152_s4 + $0x158] sm:$0xff] }
 0x3d1   :  { %1473 = vmatpush.msra.mxu0 %v1451_v0  ;;  %v1447_v34 = vld [vmem:[%s3152_s4 + $0x150] sm:$0xff]  ;;  %v1406_v0 = vld [vmem:[%s3152_s4 + $0x8] sm:$0xff] }
 0x3d2   :  { %v2924_v40 = vadd.f32 %v1067_v2, %v2887_v62  ;;  %v1449_v2 = vld [vmem:[%s3152_s4 + $0x160] sm:$0xff]  ;;  %1454 = vmatpush.msra.mxu3 %v1447_v34 }
 0x3d3   :  { %1474 = vmatpush.msra.mxu0 %v1448_v37 }
 0x3d4   :  { %1137 = vmatmul.f32.vlgmr.msra.gmra.mxu1 %v2924_v40  ;;  %1157 = vmatmul.f32.vlgmr.msra.gmra.mxu2 %v2924_v40 }
 0x3d5   :  { %1177 = vmatmul.f32.vlgmr.msrb.gmra.mxu3 %v2924_v40  ;;  %1493 = vmatpush.msra.mxu1 %v1452_v45 }
 0x3d7   :  { %1494 = vmatpush.msra.mxu1 %v1449_v2 }
 0x451   :  { %v1138_v48 = vpop.f32.mrf.mxu1 }
 0x452   :  { %v1139_v43 = vadd.f32 %v1138_v48, %v3191_v6  ;;  %v1445_v48 = vld [vmem:[%s3152_s4 + $0x140] sm:$0xff] }
 0x453   :  { %1475 = vmatpush.msra.mxu0 %v1445_v48 }
 0x454   :  { %v1181_v5 = vadd.f32 %v1139_v43, %v3197_v8  ;;  %v1446_v43 = vld [vmem:[%s3152_s4 + $0x148] sm:$0xff]  ;;  %v1441_v8 = vld [vmem:[%s3152_s4 + $0x120] sm:$0xff] }
 0x455   :  { %1495 = vmatpush.msra.mxu1 %v1446_v43 }
 0x456   :  { %v1594_v46 = vmul.f32 -1.442695, %v1181_v5  ;;  %v1442_v5 = vld [vmem:[%s3152_s4 + $0x128] sm:$0xff] }
 0x457   :  { %v1158_v50 = vpop.f32.mrf.mxu2  ;;  %1476 = vmatpush.msra.mxu0 %v1442_v5 }
 0x458   :  { %1657 = vpow2.f32 %v1594_v46  ;;  %v1159_v18 = vadd.f32 %v1158_v50, %v3190_v19  ;;  %v1178_v9 = vpop.f32.mrf.mxu3  ;;  %v1443_v46 = vld [vmem:[%s3152_s4 + $0x130] sm:$0xff] }
 0x459   :  { %v1179_v25 = vadd.f32 %v1178_v9, %v2348_v42  ;;  %1496 = vmatpush.msra.mxu1 %v1443_v46  ;;  %v1432_v9 = vld [vmem:[%s3152_s4 + $0xd8] sm:$0xff] }
 0x45a   :  { %v1201_v51 = vadd.f32 %v1159_v18, %v163_v39  ;;  %v3200_v39 = vld [vmem:[#allocation19_spill] sm:$0xff] }
 0x45b   :  { %v166_v18 = vadd.f32 %v3200_v39, %v3188_v54 }
 0x45c   :  { %v1595_v62 = vmul.f32 -1.442695, %v1201_v51 }
 0x45e   :  { %v1658_v47 = vpop.eup %1657  ;;  %1659 = vpow2.f32 %v1595_v62 }
 0x45f   :  { %v1185_v63 = vadd.f32 1.0, %v1658_v47  ;;  %v1438_v47 = vld [vmem:[%s3152_s4 + $0x108] sm:$0xff] }
 0x461   :  { %1661 = vrcp.f32 %v1185_v63  ;;  %v1197_v17 = vand.u32 2147483648, %v1185_v63  ;;  %v1195_v22 = vand.u32 2147483647, %v1185_v63  ;;  %vm1191_vm9 = vweird.f32 %v1185_v63 }
 0x463   :  { %v1198_v14 = vor.u32 1.1754944e-38, %v1197_v17  ;;  %vm1196_vm11 = vcmp.eq.f32.partialorder %v1195_v22, 8.507059e+37  ;;  %v1436_v17 = vld [vmem:[%s3152_s4 + $0xf8] sm:$0xff] }
 0x464   :  { %v1660_v3 = vpop.eup %1659 }
 0x465   :  { %v1205_v52 = vadd.f32 1.0, %v1660_v3  ;;  %v1440_v3 = vld [vmem:[%s3152_s4 + $0x118] sm:$0xff] }
 0x466   :  { %1497 = vmatpush.msra.mxu1 %v1440_v3 }
 0x467   :  { %v1662_v35 = vpop.eup %1661  ;;  %1663 = vrcp.f32 %v1205_v52  ;;  %v1217_v21 = vand.u32 2147483648, %v1205_v52  ;;  %vm1211_vm13 = vweird.f32 %v1205_v52  ;;  %v1215_v24 = vand.u32 2147483647, %v1205_v52 }
 0x468   :  { %v1187_v7 = vmul.f32 %v1662_v35, %v1185_v63  ;;  %vm1192_vm8 = vweird.f32 %v1662_v35  ;;  %v1439_v63 = vld [vmem:[%s3152_s4 + $0x110] sm:$0xff] }
 0x469   :  { %vm1193_vm10 = vmor %vm1191_vm9, %vm1192_vm8  ;;  %v1218_v32 = vor.u32 1.1754944e-38, %v1217_v21  ;;  %vm1216_vm15 = vcmp.eq.f32.partialorder %v1215_v24, 8.507059e+37  ;;  %1477 = vmatpush.msra.mxu0 %v1439_v63  ;;  %v1420_v21 = vld [vmem:[%s3152_s4 + $0x78] sm:$0xff]  ;;  %v1421_v24 = vld [vmem:[%s3152_s4 + $0x80] sm:$0xff] }
 0x46a   :  { %v1188_v26 = vsub.f32 1.0, %v1187_v7 }
 0x46b   :  { %1478 = vmatpush.msra.mxu0 %v1436_v17 }
 0x46c   :  { %v1189_v20 = vmul.f32 %v1662_v35, %v1188_v26  ;;  %v1435_v26 = vld [vmem:[%s3152_s4 + $0xf0] sm:$0xff] }
 0x46d   :  { %v1664_v10 = vpop.eup %1663 }
 0x46e   :  { %v1207_v15 = vmul.f32 %v1664_v10, %v1205_v52  ;;  %v1190_v4 = vadd.f32 %v1662_v35, %v1189_v20  ;;  %vm1212_vm12 = vweird.f32 %v1664_v10  ;;  %v3201_v52 = vld [vmem:[#allocation9_spill] sm:$0xff]  ;;  %v1437_v20 = vld [vmem:[%s3152_s4 + $0x100] sm:$0xff] }
 0x46f   :  { %vm1213_vm14 = vmor %vm1211_vm13, %vm1212_vm12  ;;  %1498 = vmatpush.msra.mxu1 %v1437_v20 }
 0x470   :  { %v1208_v1 = vsub.f32 1.0, %v1207_v15  ;;  %v1194_v33 = vsel %vm1193_vm10, %v1662_v35, %v1190_v4  ;;  %v1433_v15 = vld [vmem:[%s3152_s4 + $0xe0] sm:$0xff]  ;;  %v1434_v4 = vld [vmem:[%s3152_s4 + $0xe8] sm:$0xff] }
 0x471   :  { %v1199_v28 = vsel %vm1196_vm11, %v1198_v14, %v1194_v33  ;;  %1479 = vmatpush.msra.mxu0 %v1433_v15  ;;  %1499 = vmatpush.msra.mxu1 %v1434_v4  ;;  %v1429_v14 = vld [vmem:[%s3152_s4 + $0xc0] sm:$0xff]  ;;  %v1426_v33 = vld [vmem:[%s3152_s4 + $0xa8] sm:$0xff] }
 0x472   :  { %v1221_v58 = vmul.f32 %v1199_v28, %v1179_v25  ;;  %v1209_v41 = vmul.f32 %v1664_v10, %v1208_v1  ;;  %v1430_v1 = vld [vmem:[%s3152_s4 + $0xc8] sm:$0xff]  ;;  %v1431_v25 = vld [vmem:[%s3152_s4 + $0xd0] sm:$0xff] }
 0x473   :  { %1480 = vmatpush.msra.mxu0 %v1430_v1  ;;  %1500 = vmatpush.msra.mxu1 %v1431_v25  ;;  %v1427_v28 = vld [vmem:[%s3152_s4 + $0xb0] sm:$0xff] }
 0x474   :  { %v1222_v44 = vadd.f32 %v1221_v58, %v3199_v16  ;;  %v1210_v60 = vadd.f32 %v1664_v10, %v1209_v41  ;;  %v1428_v58 = vld [vmem:[%s3152_s4 + $0xb8] sm:$0xff]  ;;  %v1423_v41 = vld [vmem:[%s3152_s4 + $0x90] sm:$0xff] }
 0x475   :  { %1481 = vmatpush.msra.mxu0 %v1427_v28  ;;  %1501 = vmatpush.msra.mxu1 %v1428_v58  ;;  %v1424_v16 = vld [vmem:[%s3152_s4 + $0x98] sm:$0xff] }
 0x476   :  { %1665 = vtanh.f32 %v1222_v44  ;;  %v1214_v27 = vsel %vm1213_vm14, %v1664_v10, %v1210_v60  ;;  %v1425_v44 = vld [vmem:[%s3152_s4 + $0xa0] sm:$0xff] }
 0x477   :  { %v1219_v38 = vsel %vm1216_vm15, %v1218_v32, %v1214_v27  ;;  %1482 = vmatpush.msra.mxu0 %v1424_v16  ;;  %1502 = vmatpush.msra.mxu1 %v1425_v44  ;;  %v1422_v27 = vld [vmem:[%s3152_s4 + $0x88] sm:$0xff] }
 0x479   :  { %1483 = vmatpush.msra.mxu0 %v1421_v24  ;;  %1503 = vmatpush.msra.mxu1 %v1422_v27 }
 0x47c   :  { %v1666_v30 = vpop.eup %1665 }
 0x47d   :  { %v1224_v36 = vsub.f32 %v2924_v40, %v1666_v30 }
 0x47f   :  { %v1225_v11 = vmul.f32 %v1224_v36, %v1219_v38  ;;  %v1417_v38 = vld [vmem:[%s3152_s4 + $0x60] sm:$0xff] }
 0x481   :  { %v1226_v57 = vadd.f32 %v1666_v30, %v1225_v11  ;;  %v1418_v11 = vld [vmem:[%s3152_s4 + $0x68] sm:$0xff] }
 0x482   :  { %1484 = vmatpush.msra.mxu0 %v1418_v11 }
 0x483   :  { %v1229_v31 = vmul.f32 %v1596_v13, %v1226_v57  ;;  %v1232_v49 = vsub.f32 %v1226_v57, %v2924_v40  ;;  %v1415_v57 = vld [vmem:[%s3152_s4 + $0x50] sm:$0xff] }
 0x484   :  { %1485 = vmatpush.msra.mxu0 %v1415_v57 }
 0x485   :  { %1597 = vst [vmem:[%s3157_s6 + $0x28] sm:$0xff] %v1229_v31  ;;  %v1233_v56 = vmul.f32 %v1596_v13, %v1232_v49  ;;  %v1419_v13 = vld [vmem:[%s3152_s4 + $0x70] sm:$0xff]  ;;  %v1416_v31 = vld [vmem:[%s3152_s4 + $0x58] sm:$0xff] }
 0x486   :  { %1504 = vmatpush.msra.mxu1 %v1419_v13  ;;  %v1412_v49 = vld [vmem:[%s3152_s4 + $0x38] sm:$0xff] }
 0x487   :  { %v2969_v59 = vadd.f32 %v1233_v56, %v2924_v40  ;;  %v1444_v40 = vld [vmem:[%s3152_s4 + $0x138] sm:$0xff]  ;;  %v1413_v56 = vld [vmem:[%s3152_s4 + $0x40] sm:$0xff]  ;;  %1486 = vmatpush.msra.mxu0 %v1412_v49 }
 0x488   :  { %1455 = vmatpush.msra.mxu3 %v1444_v40  ;;  %1505 = vmatpush.msra.mxu1 %v1416_v31 }
 0x489   :  { %1303 = vmatmul.f32.vlgmr.msrb.gmra.mxu0 %v2969_v59  ;;  %1323 = vmatmul.f32.vlgmr.msrb.gmra.mxu1 %v2969_v59 }
 0x48a   :  { %1343 = vmatmul.f32.vlgmr.msrb.gmra.mxu2 %v2969_v59  ;;  %1456 = vmatpush.msra.mxu3 %v1441_v8 }
 0x48b   :  { %1506 = vmatpush.msra.mxu1 %v1413_v56  ;;  %1487 = vmatpush.msra.mxu0 %v1409_v53 }
 0x48c   :  { %1457 = vmatpush.msra.mxu3 %v1438_v47 }
 0x48d   :  { %1488 = vmatpush.msra.mxu0 %v1406_v0 }
 0x48e   :  { %1458 = vmatpush.msra.mxu3 %v1435_v26 }
 0x490   :  { %1459 = vmatpush.msra.mxu3 %v1432_v9 }
 0x492   :  { %1460 = vmatpush.msra.mxu3 %v1429_v14 }
 0x494   :  { %1461 = vmatpush.msra.mxu3 %v1426_v33  ;;  %v3203_v33 = vld [vmem:[#allocation20_spill] sm:$0xff] }
 0x495   :  { %v169_v28 = vadd.f32 %v3203_v33, %v3188_v54 }
 0x496   :  { %1462 = vmatpush.msra.mxu3 %v1423_v41 }
 0x498   :  { %1463 = vmatpush.msra.mxu3 %v1420_v21  ;;  %v3204_v21 = vld [vmem:[#allocation11_spill] sm:$0xff] }
 0x49a   :  { %1464 = vmatpush.msra.mxu3 %v1417_v38 }
 0x49c   :  { %1465 = vmatpush.msra.mxu3 %v2937_v12  ;;  %v1410_v12 = vld [vmem:[%s3152_s4 + $0x28] sm:$0xff] }
 0x49d   :  { %1507 = vmatpush.msra.mxu1 %v1410_v12 }
 0x49e   :  { %1466 = vmatpush.msra.mxu3 %v2943_v61  ;;  %v1407_v61 = vld [vmem:[%s3152_s4 + $0x10] sm:$0xff] }
 0x49f   :  { %1508 = vmatpush.msra.mxu1 %v1407_v61 }
 0x4a0   :  { %1467 = vmatpush.msra.mxu3 %v2949_v23 }
 0x4a2   :  { %1468 = vmatpush.msra.mxu3 %v2954_v29 }
 0x506   :  { %v1304_v50 = vpop.f32.mrf.mxu0  ;;  %v1324_v55 = vpop.f32.mrf.mxu1 }
 0x507   :  { %v1305_v51 = vadd.f32 %v1304_v50, %v3191_v6  ;;  %v1325_v62 = vadd.f32 %v1324_v55, %v3190_v19 }
 0x509   :  { %v1347_v35 = vadd.f32 %v1305_v51, %v3201_v52  ;;  %v1367_v7 = vadd.f32 %v1325_v62, %v166_v18  ;;  %v3202_v62 = vld [vmem:[#allocation15_spill] sm:$0xff] }
 0x50b   :  { %v1598_v22 = vmul.f32 -1.442695, %v1347_v35  ;;  %v1599_v10 = vmul.f32 -1.442695, %v1367_v7 }
 0x50d   :  { %1667 = vpow2.f32 %v1598_v22  ;;  %v1344_v5 = vpop.f32.mrf.mxu2 }
 0x50e   :  { %1669 = vpow2.f32 %v1599_v10  ;;  %v1345_v55 = vadd.f32 %v1344_v5, %v2348_v42  ;;  %v1600_v10 = vld [vmem:[%s3156_s1 + $0x30] sm:$0xff] }
 0x513   :  { %v1668_v60 = vpop.eup %1667 }
 0x514   :  { %v1670_v30 = vpop.eup %1669  ;;  %v1351_v32 = vadd.f32 1.0, %v1668_v60 }
 0x515   :  { %v1371_v36 = vadd.f32 1.0, %v1670_v30 }
 0x516   :  { %1671 = vrcp.f32 %v1351_v32  ;;  %v1363_v48 = vand.u32 2147483648, %v1351_v32  ;;  %v1361_v8 = vand.u32 2147483647, %v1351_v32  ;;  %vm1357_vm1 = vweird.f32 %v1351_v32 }
 0x517   :  { %1673 = vrcp.f32 %v1371_v36  ;;  %v1383_v3 = vand.u32 2147483648, %v1371_v36  ;;  %vm1377_vm5 = vweird.f32 %v1371_v36  ;;  %v1381_v52 = vand.u32 2147483647, %v1371_v36 }
 0x518   :  { %v1364_v50 = vor.u32 1.1754944e-38, %v1363_v48  ;;  %vm1362_vm3 = vcmp.eq.f32.partialorder %v1361_v8, 8.507059e+37 }
 0x519   :  { %v1384_v26 = vor.u32 1.1754944e-38, %v1383_v3  ;;  %vm1382_vm7 = vcmp.eq.f32.partialorder %v1381_v52, 8.507059e+37 }
 0x51c   :  { %v1672_v45 = vpop.eup %1671 }
 0x51d   :  { %v1674_v34 = vpop.eup %1673  ;;  %v1353_v37 = vmul.f32 %v1672_v45, %v1351_v32  ;;  %vm1358_vm0 = vweird.f32 %v1672_v45 }
 0x51e   :  { %v1373_v40 = vmul.f32 %v1674_v34, %v1371_v36  ;;  %vm1359_vm2 = vmor %vm1357_vm1, %vm1358_vm0  ;;  %vm1378_vm4 = vweird.f32 %v1674_v34 }
 0x51f   :  { %v1354_v2 = vsub.f32 1.0, %v1353_v37  ;;  %vm1379_vm6 = vmor %vm1377_vm5, %vm1378_vm4  ;;  %v3206_v37 = vld [vmem:[#allocation21_spill] sm:$0xff] }
 0x520   :  { %v1374_v46 = vsub.f32 1.0, %v1373_v40 }
 0x521   :  { %v1355_v43 = vmul.f32 %v1672_v45, %v1354_v2 }
 0x522   :  { %v1375_v51 = vmul.f32 %v1674_v34, %v1374_v46 }
 0x523   :  { %v1356_v23 = vadd.f32 %v1672_v45, %v1355_v43 }
 0x524   :  { %v1376_v63 = vadd.f32 %v1674_v34, %v1375_v51 }
 0x525   :  { %v1360_v39 = vsel %vm1359_vm2, %v1672_v45, %v1356_v23 }
 0x526   :  { %v1365_v18 = vsel %vm1362_vm3, %v1364_v50, %v1360_v39  ;;  %v1380_v35 = vsel %vm1379_vm6, %v1674_v34, %v1376_v63  ;;  %v3205_v34 = vld [vmem:[#allocation10_spill] sm:$0xff] }
 0x527   :  { %v1387_v29 = vmul.f32 %v1365_v18, %v1345_v55  ;;  %v1385_v20 = vsel %vm1382_vm7, %v1384_v26, %v1380_v35  ;;  %v210_v2 = vadd.f32 %v3206_v37, %v3205_v34 }
 0x529   :  { %v1388_v47 = vadd.f32 %v1387_v29, %v3202_v62  ;;  %v1604_v29 = vld [vmem:[%s3156_s1 + $0x38] sm:$0xff] }
 0x52b   :  { %1675 = vtanh.f32 %v1388_v47 }
 0x531   :  { %v1676_v7 = vpop.eup %1675 }
 0x532   :  { %v1390_v17 = vsub.f32 %v2969_v59, %v1676_v7 }
 0x534   :  { %v1391_v22 = vmul.f32 %v1390_v17, %v1385_v20 }
 0x536   :  { %v1392_v9 = vadd.f32 %v1676_v7, %v1391_v22 }
 0x538   :  { %v1395_v15 = vmul.f32 %v1600_v10, %v1392_v9  ;;  %v1398_v4 = vsub.f32 %v1392_v9, %v2969_v59 }
 0x53a   :  { %1601 = vst [vmem:[%s3157_s6 + $0x30] sm:$0xff] %v1395_v15  ;;  %v1399_v14 = vmul.f32 %v1600_v10, %v1398_v4 }
 0x53c   :  { %v3126_v1 = vadd.f32 %v1399_v14, %v2969_v59 }
 0x53e   :  { %1469 = vmatmul.f32.vlgmr.msra.gmra.mxu3 %v3126_v1  ;;  %1489 = vmatmul.f32.vlgmr.msra.gmra.mxu0 %v3126_v1 }
 0x53f   :  { %1509 = vmatmul.f32.vlgmr.msra.gmra.mxu1 %v3126_v1 }
 0x5bb   :  { %v1490_v25 = vpop.f32.mrf.mxu0 }
 0x5bc   :  { %v1491_v58 = vadd.f32 %v1490_v25, %v3190_v19  ;;  %v1510_v49 = vpop.f32.mrf.mxu1 }
 0x5bd   :  { %v1511_v0 = vadd.f32 %v1510_v49, %v2348_v42 }
 0x5be   :  { %v1533_v41 = vadd.f32 %v1491_v58, %v169_v28 }
 0x5c0   :  { %v1603_v16 = vmul.f32 -1.442695, %v1533_v41 }
 0x5c1   :  { %v1470_v44 = vpop.f32.mrf.mxu3 }
 0x5c2   :  { %v1471_v60 = vadd.f32 %v1470_v44, %v3191_v6  ;;  %1677 = vpow2.f32 %v1603_v16 }
 0x5c4   :  { %v1513_v59 = vadd.f32 %v1471_v60, %v3204_v21 }
 0x5c6   :  { %v1602_v24 = vmul.f32 -1.442695, %v1513_v59 }
 0x5c8   :  { %1679 = vpow2.f32 %v1602_v24  ;;  %v1678_v27 = vpop.eup %1677 }
 0x5c9   :  { %v1537_v32 = vadd.f32 1.0, %v1678_v27 }
 0x5cb   :  { %v1549_v5 = vand.u32 2147483648, %v1537_v32  ;;  %vm1543_vm13 = vweird.f32 %v1537_v32  ;;  %v1547_v23 = vand.u32 2147483647, %v1537_v32 }
 0x5cd   :  { %v1550_v55 = vor.u32 1.1754944e-38, %v1549_v5  ;;  %vm1548_vm15 = vcmp.eq.f32.partialorder %v1547_v23, 8.507059e+37 }
 0x5ce   :  { %v1680_v30 = vpop.eup %1679 }
 0x5cf   :  { %v1517_v36 = vadd.f32 1.0, %v1680_v30 }
 0x5d1   :  { %1681 = vrcp.f32 %v1517_v36  ;;  %v1529_v57 = vand.u32 2147483648, %v1517_v36  ;;  %v1527_v6 = vand.u32 2147483647, %v1517_v36  ;;  %vm1523_vm9 = vweird.f32 %v1517_v36 }
 0x5d2   :  { %1683 = vrcp.f32 %v1537_v32 }
 0x5d3   :  { %v1530_v12 = vor.u32 1.1754944e-38, %v1529_v57  ;;  %vm1528_vm11 = vcmp.eq.f32.partialorder %v1527_v6, 8.507059e+37 }
 0x5d7   :  { %v1682_v38 = vpop.eup %1681 }
 0x5d8   :  { %v1684_v54 = vpop.eup %1683  ;;  %v1519_v11 = vmul.f32 %v1682_v38, %v1517_v36  ;;  %vm1524_vm8 = vweird.f32 %v1682_v38 }
 0x5d9   :  { %v1539_v13 = vmul.f32 %v1684_v54, %v1537_v32  ;;  %vm1525_vm10 = vmor %vm1523_vm9, %vm1524_vm8  ;;  %vm1544_vm12 = vweird.f32 %v1684_v54 }
 0x5da   :  { %v1520_v19 = vsub.f32 1.0, %v1519_v11  ;;  %vm1545_vm14 = vmor %vm1543_vm13, %vm1544_vm12 }
 0x5db   :  { %v1540_v53 = vsub.f32 1.0, %v1539_v13 }
 0x5dc   :  { %v1521_v31 = vmul.f32 %v1682_v38, %v1520_v19 }
 0x5dd   :  { %v1541_v48 = vmul.f32 %v1684_v54, %v1540_v53 }
 0x5de   :  { %v1522_v56 = vadd.f32 %v1682_v38, %v1521_v31 }
 0x5df   :  { %v1542_v8 = vadd.f32 %v1684_v54, %v1541_v48 }
 0x5e0   :  { %v1526_v45 = vsel %vm1525_vm10, %v1682_v38, %v1522_v56 }
 0x5e1   :  { %v1531_v61 = vsel %vm1528_vm11, %v1530_v12, %v1526_v45  ;;  %v1546_v46 = vsel %vm1545_vm14, %v1684_v54, %v1542_v8 }
 0x5e2   :  { %v1553_v40 = vmul.f32 %v1531_v61, %v1511_v0  ;;  %v1551_v39 = vsel %vm1548_vm15, %v1550_v55, %v1546_v46 }
 0x5e4   :  { %v1554_v43 = vadd.f32 %v1553_v40, %v210_v2 }
 0x5e6   :  { %1685 = vtanh.f32 %v1554_v43 }
 0x5ec   :  { %v1686_v50 = vpop.eup %1685 }
 0x5ed   :  { %v1556_v42 = vsub.f32 %v3126_v1, %v1686_v50 }
 0x5ef   :  { %v1557_v18 = vmul.f32 %v1556_v42, %v1551_v39 }
 0x5f1   :  { %v1558_v51 = vadd.f32 %v1686_v50, %v1557_v18 }
 0x5f3   :  { %v1561_v62 = vmul.f32 %v1604_v29, %v1558_v51  ;;  %v1564_v47 = vsub.f32 %v1558_v51, %v3126_v1 }
 0x5f5   :  { %1605 = vst [vmem:[%s3157_s6 + $0x38] sm:$0xff] %v1561_v62  ;;  %v1565_v63 = vmul.f32 %v1604_v29, %v1564_v47 }
 0x5f7   :  { %v1566_v3 = vadd.f32 %v1565_v63, %v3126_v1 }
 0x5f9   :  { %1567 = vst [vmem:[%s3158_s7] sm:$0xff] %v1566_v3 }

</bundles_post_ra>
